<compile_context>
chip_gen: v6e
topology: v6e:2x2x1
jax: 0.10.0
libtpu: 0.0.40
codegen_flags: <defaults>
</compile_context>

<pallas_src>
import functools
import math

import jax
import jax.numpy as jnp
from jax.experimental import pallas as pl
from jax.experimental.pallas import tpu as pltpu


def _vmem_spec():
    # whole-array block resident in VMEM (grid-less call)
    return pl.BlockSpec(memory_space=pltpu.MemorySpace.VMEM)


# --------------------------------------------------------------------------
# In-kernel helpers (operate on VMEM-resident values / refs)
# --------------------------------------------------------------------------

def _dot(a, b):
    return jnp.dot(a, b, preferred_element_type=jnp.float32)


def _dot_bt(a, b):
    # a @ b.T without materializing the transpose (rhs contracts on dim 1).
    return jax.lax.dot_general(a, b, (((1,), (1,)), ((), ())),
                               preferred_element_type=jnp.float32)


def _softmax_lastdim(s):
    s = s - jnp.max(s, axis=-1, keepdims=True)
    p = jnp.exp(s)
    return p * pl.reciprocal(jnp.sum(p, axis=-1, keepdims=True), approx=True)


def _layernorm(x, g_ref, b_ref):
    mu = jnp.mean(x, axis=-1, keepdims=True)
    xc = x - mu
    var = jnp.mean(xc * xc, axis=-1, keepdims=True)
    return xc * jax.lax.rsqrt(var + 1e-5) * g_ref[...] + b_ref[...]


def _linear(x, w_ref, b_ref, activation=None):
    y = _dot(x, w_ref[...]) + b_ref[...]
    if activation == "gelu":
        # TODO(synk): BART uses exact erf GELU; tanh approximation used here
        # for a guaranteed EUP lowering (small systematic numeric difference).
        y = jax.nn.gelu(y, approximate=True)
    return y


def _mha(xq, xkv, ap, bias, B, Sq, Sk, H, D):
    """Multi-head attention, batched over all (head, batch) pairs.

    xq: (B*Sq, D), xkv: (B*Sk, D).
    bias: additive bias broadcastable to (H*B, Sq, Sk); stacking order along
    the leading axis is head-major (index n = h*B + b).
    """
    dh = D // H
    scale = 1.0 / math.sqrt(dh)
    q = _dot(xq, ap["wq"][...]) + ap["bq"][...]          # (B*Sq, D)
    kv = _dot(xkv, ap["wkv"][...]) + ap["bkv"][...]      # (B*Sk, 2D) fused K|V
    q3 = q.reshape(B, Sq, D)
    k3 = kv[:, :D].reshape(B, Sk, D)
    v3 = kv[:, D:].reshape(B, Sk, D)

    # Head-major regroup along the leading (batch) axis: one slice+concat per
    # head instead of per-(batch,head) matmuls.
    qh = jnp.concatenate([q3[:, :, h * dh:(h + 1) * dh] for h in range(H)], axis=0)
    kh = jnp.concatenate([k3[:, :, h * dh:(h + 1) * dh] for h in range(H)], axis=0)
    vh = jnp.concatenate([v3[:, :, h * dh:(h + 1) * dh] for h in range(H)], axis=0)

    # One batched score matmul + one batched softmax + one batched P@V for all
    # H*B (head, batch) pairs.
    s = jax.lax.dot_general(qh, kh, (((2,), (2,)), ((0,), (0,))),
                            preferred_element_type=jnp.float32) * scale + bias
    p = _softmax_lastdim(s)                              # (H*B, Sq, Sk)
    o = jax.lax.dot_general(p, vh, (((2,), (1,)), ((0,), (0,))),
                            preferred_element_type=jnp.float32)  # (H*B, Sq, dh)

    # Reassemble (batch rows along sublanes, heads along lanes) and apply ONE
    # output projection for all heads and batches.
    ctx = jnp.concatenate(
        [jnp.concatenate([o[h * B + b] for h in range(H)], axis=-1) for b in range(B)],
        axis=0)                                          # (B*Sq, D)
    return _dot(ctx, ap["wo"][...]) + ap["bo"][...]


def _memory_read(z, mem_ref):
    # TODO(synk): EntailmentMemory/DiscourseMemory source not provided; assumed
    # standard softmax attention read over the (slots, d_model) memory matrix.
    mem = mem_ref[...]
    s = _dot_bt(z, mem)                                  # (B, slots)
    return _dot(_softmax_lastdim(s), mem)                # (B, D)


# --------------------------------------------------------------------------
# The single fused forward kernel
# --------------------------------------------------------------------------

def _bart_forward_kernel(treedef, n_leaves, dims, *refs):
    B, Se, Sd, D, H = dims
    enc_in_ref, dec_in_ref, padb_ref = refs[0], refs[1], refs[2]
    param_refs = refs[3:3 + n_leaves]
    logits_ref = refs[3 + n_leaves]
    ortho_ref = refs[4 + n_leaves]
    p = jax.tree_util.tree_unflatten(treedef, param_refs)

    pad_bias = padb_ref[...]                             # (H*B, 1, Se) additive key bias

    # ------------------------------ encoder ------------------------------
    x = _layernorm(enc_in_ref[...], p["enc_ln_emb_g"], p["enc_ln_emb_b"])
    for lp in p["enc_layers"]:
        h = _mha(x, x, lp["self_attn"], pad_bias, B, Se, Se, H, D)
        x = _layernorm(x + h, lp["ln1_g"], lp["ln1_b"])
        ff = _linear(x, lp["fc1_w"], lp["fc1_b"], activation="gelu")
        ff = _linear(ff, lp["fc2_w"], lp["fc2_b"])
        x = _layernorm(x + ff, lp["ln2_g"], lp["ln2_b"])
    enc_out = x                                          # (B*Se, D)

    # -------------- batched memory read + decoder input construction ------
    z_tok = jnp.concatenate([enc_out[b * Se:b * Se + 1, :] for b in range(B)],
                            axis=0)                      # (B, D) first tokens
    z = _memory_read(z_tok, p["erm_memory"])
    z_d = _memory_read(z_tok, p["ddm_memory"])
    zsum = z + z_d                                       # (B, D)
    pieces = []
    for b in range(B):
        pieces.append(zsum[b:b + 1, :])
        pieces.append(jnp.zeros((Sd - 1, D), jnp.float32))
    y_in = dec_in_ref[...] + jnp.concatenate(pieces, axis=0)   # += on first token of each batch
    y = _layernorm(y_in, p["dec_ln_emb_g"], p["dec_ln_emb_b"])

    # causal bias built once in-kernel (broadcasts over all H*B pairs)
    ri = jax.lax.broadcasted_iota(jnp.int32, (Sd, Sd), 0)
    ci = jax.lax.broadcasted_iota(jnp.int32, (Sd, Sd), 1)
    causal_bias = jnp.where(ci <= ri, 0.0, -1e9).astype(jnp.float32)

    # ------------------------------ decoder ------------------------------
    for lp in p["dec_layers"]:
        h = _mha(y, y, lp["self_attn"], causal_bias, B, Sd, Sd, H, D)
        y = _layernorm(y + h, lp["ln1_g"], lp["ln1_b"])
        h = _mha(y, enc_out, lp["cross_attn"], pad_bias, B, Sd, Se, H, D)
        y = _layernorm(y + h, lp["ln2_g"], lp["ln2_b"])
        ff = _linear(y, lp["fc1_w"], lp["fc1_b"], activation="gelu")
        ff = _linear(ff, lp["fc2_w"], lp["fc2_b"])
        y = _layernorm(y + ff, lp["ln3_g"], lp["ln3_b"])

    # --------------------- LM head + orthogonality loss -------------------
    logits_ref[...] = _dot(y, p["lm_head_w"][...]) + p["final_logits_bias"][...]
    pm = _dot_bt(p["erm_memory"][...], p["ddm_memory"][...])
    # TODO(synk): kept as a (1,1) VMEM output (scalar SMEM writeback of a
    # vector reduction is riskier to lower and the saving is negligible).
    ortho_ref[...] = jnp.broadcast_to(jnp.sum(pm * pm), (1, 1))


# --------------------------------------------------------------------------
# Wrapper (embedding gathers stay in XLA; everything else is one pallas_call)
# --------------------------------------------------------------------------

def bart_with_memory_forward(params, input_ids, attention_mask, decoder_input_ids,
                             *, num_heads):
    tok = params["shared_tok_emb"]
    B, Se = input_ids.shape
    Sd = decoder_input_ids.shape[1]
    D = tok.shape[1]
    V = params["lm_head_w"].shape[1]
    H = num_heads

    # Token/position embedding gathers (data-dependent) are left to XLA.
    enc_in = (jnp.take(tok, input_ids, axis=0)
              + params["enc_pos_emb"][:Se][None]).reshape(B * Se, D)
    dec_in = (jnp.take(tok, decoder_input_ids, axis=0)
              + params["dec_pos_emb"][:Sd][None]).reshape(B * Sd, D)
    # Additive pad bias, pre-tiled head-major to (H*B, 1, Se) so the kernel
    # adds it directly to the batched (H*B, Sq, Se) score tensor.
    pad = (1.0 - attention_mask.astype(jnp.float32)) * -1e9           # (B, Se)
    pad_bias = jnp.tile(pad, (H, 1))[:, None, :]                       # (H*B, 1, Se)

    kparams = {k: v for k, v in params.items()
               if k not in ("shared_tok_emb", "enc_pos_emb", "dec_pos_emb")}
    leaves, treedef = jax.tree_util.tree_flatten(kparams)

    kernel = functools.partial(_bart_forward_kernel, treedef, len(leaves),
                               (B, Se, Sd, D, H))
    logits2d, ortho = pl.pallas_call(
        kernel,
        out_shape=(jax.ShapeDtypeStruct((B * Sd, V), jnp.float32),
                   jax.ShapeDtypeStruct((1, 1), jnp.float32)),
        in_specs=[_vmem_spec()] * (3 + len(leaves)),
        out_specs=(_vmem_spec(), _vmem_spec()),
    )(enc_in, dec_in, pad_bias, *leaves)
    return logits2d.reshape(B, Sd, V), ortho[0, 0]


# --------------------------------------------------------------------------
# Deterministic synthetic parameters
# --------------------------------------------------------------------------

def _dense(key, shape, scale=0.02):
    return scale * jax.random.normal(key, shape, dtype=jnp.float32)


def _init_attn(key, d):
    ks = jax.random.split(key, 4)
    return {"wq": _dense(ks[0], (d, d)), "bq": jnp.zeros((1, d), jnp.float32),
            "wkv": jnp.concatenate([_dense(ks[1], (d, d)), _dense(ks[2], (d, d))], axis=1),
            "bkv": jnp.zeros((1, 2 * d), jnp.float32),
            "wo": _dense(ks[3], (d, d)), "bo": jnp.zeros((1, d), jnp.float32)}


def _ln_pair(d):
    return jnp.ones((1, d), jnp.float32), jnp.zeros((1, d), jnp.float32)


def _init_enc_layer(key, d, ffn):
    ks = jax.random.split(key, 3)
    ln1_g, ln1_b = _ln_pair(d)
    ln2_g, ln2_b = _ln_pair(d)
    return {"self_attn": _init_attn(ks[0], d),
            "ln1_g": ln1_g, "ln1_b": ln1_b,
            "fc1_w": _dense(ks[1], (d, ffn)), "fc1_b": jnp.zeros((1, ffn), jnp.float32),
            "fc2_w": _dense(ks[2], (ffn, d)), "fc2_b": jnp.zeros((1, d), jnp.float32),
            "ln2_g": ln2_g, "ln2_b": ln2_b}


def _init_dec_layer(key, d, ffn):
    ks = jax.random.split(key, 4)
    ln1_g, ln1_b = _ln_pair(d)
    ln2_g, ln2_b = _ln_pair(d)
    ln3_g, ln3_b = _ln_pair(d)
    return {"self_attn": _init_attn(ks[0], d),
            "cross_attn": _init_attn(ks[1], d),
            "ln1_g": ln1_g, "ln1_b": ln1_b,
            "ln2_g": ln2_g, "ln2_b": ln2_b,
            "fc1_w": _dense(ks[2], (d, ffn)), "fc1_b": jnp.zeros((1, ffn), jnp.float32),
            "fc2_w": _dense(ks[3], (ffn, d)), "fc2_b": jnp.zeros((1, d), jnp.float32),
            "ln3_g": ln3_g, "ln3_b": ln3_b}


def init_params(key, *, vocab, d_model, ffn, max_pos, n_enc, n_dec,
                erm_slots, ddm_slots):
    keys = jax.random.split(key, 8 + n_enc + n_dec)
    enc_g, enc_b = _ln_pair(d_model)
    dec_g, dec_b = _ln_pair(d_model)
    return {
        "shared_tok_emb": _dense(keys[0], (vocab, d_model)),
        "enc_pos_emb": _dense(keys[1], (max_pos, d_model)),
        "dec_pos_emb": _dense(keys[2], (max_pos, d_model)),
        "enc_ln_emb_g": enc_g, "enc_ln_emb_b": enc_b,
        "dec_ln_emb_g": dec_g, "dec_ln_emb_b": dec_b,
        "lm_head_w": _dense(keys[3], (d_model, vocab)),
        "final_logits_bias": jnp.zeros((1, vocab), jnp.float32),
        "erm_memory": _dense(keys[4], (erm_slots, d_model), scale=0.1),
        "ddm_memory": _dense(keys[5], (ddm_slots, d_model), scale=0.1),
        "enc_layers": [_init_enc_layer(keys[6 + i], d_model, ffn) for i in range(n_enc)],
        "dec_layers": [_init_dec_layer(keys[6 + n_enc + i], d_model, ffn) for i in range(n_dec)],
    }


# --------------------------------------------------------------------------

if __name__ == "__main__":
    key = jax.random.PRNGKey(0)
    B, S_enc, S_dec = 2, 8, 8
    VOCAB, D_MODEL, FFN, HEADS = 128, 32, 64, 4   # vocab=128 -> lane-dense logits
    ERM_SLOTS, DDM_SLOTS = 10, 5

    k_params, k_in, k_dec = jax.random.split(key, 3)
    params = init_params(k_params, vocab=VOCAB, d_model=D_MODEL, ffn=FFN,
                         max_pos=16, n_enc=1, n_dec=1,
                         erm_slots=ERM_SLOTS, ddm_slots=DDM_SLOTS)

    input_ids = jax.random.randint(k_in, (B, S_enc), 0, VOCAB, dtype=jnp.int32)
    decoder_input_ids = jax.random.randint(k_dec, (B, S_dec), 0, VOCAB, dtype=jnp.int32)
    attention_mask = jnp.ones((B, S_enc), dtype=jnp.int32).at[1, 6:].set(0)

    fwd = jax.jit(functools.partial(bart_with_memory_forward, num_heads=HEADS))
    lm_logits, o_loss = fwd(params, input_ids, attention_mask, decoder_input_ids)
    jax.block_until_ready((lm_logits, o_loss))

    assert lm_logits.shape == (B, S_dec, VOCAB)
    assert o_loss.shape == ()
    print("KERNEL_OK")
</pallas_src>

<mosaic_0001>
module attributes {stable_mosaic.version = 11 : i64} {
  func.func @_bart_forward_kernel(%arg0: memref<16x32xf32, #tpu.memory_space<vmem>>, %arg1: memref<16x32xf32, #tpu.memory_space<vmem>>, %arg2: memref<8x1x8xf32, #tpu.memory_space<vmem>>, %arg3: memref<5x32xf32, #tpu.memory_space<vmem>>, %arg4: memref<1x64xf32, #tpu.memory_space<vmem>>, %arg5: memref<1x32xf32, #tpu.memory_space<vmem>>, %arg6: memref<1x32xf32, #tpu.memory_space<vmem>>, %arg7: memref<32x64xf32, #tpu.memory_space<vmem>>, %arg8: memref<32x32xf32, #tpu.memory_space<vmem>>, %arg9: memref<32x32xf32, #tpu.memory_space<vmem>>, %arg10: memref<1x64xf32, #tpu.memory_space<vmem>>, %arg11: memref<32x64xf32, #tpu.memory_space<vmem>>, %arg12: memref<1x32xf32, #tpu.memory_space<vmem>>, %arg13: memref<64x32xf32, #tpu.memory_space<vmem>>, %arg14: memref<1x32xf32, #tpu.memory_space<vmem>>, %arg15: memref<1x32xf32, #tpu.memory_space<vmem>>, %arg16: memref<1x32xf32, #tpu.memory_space<vmem>>, %arg17: memref<1x32xf32, #tpu.memory_space<vmem>>, %arg18: memref<1x32xf32, #tpu.memory_space<vmem>>, %arg19: memref<1x32xf32, #tpu.memory_space<vmem>>, %arg20: memref<1x64xf32, #tpu.memory_space<vmem>>, %arg21: memref<1x32xf32, #tpu.memory_space<vmem>>, %arg22: memref<1x32xf32, #tpu.memory_space<vmem>>, %arg23: memref<32x64xf32, #tpu.memory_space<vmem>>, %arg24: memref<32x32xf32, #tpu.memory_space<vmem>>, %arg25: memref<32x32xf32, #tpu.memory_space<vmem>>, %arg26: memref<1x32xf32, #tpu.memory_space<vmem>>, %arg27: memref<1x32xf32, #tpu.memory_space<vmem>>, %arg28: memref<1x64xf32, #tpu.memory_space<vmem>>, %arg29: memref<32x64xf32, #tpu.memory_space<vmem>>, %arg30: memref<1x32xf32, #tpu.memory_space<vmem>>, %arg31: memref<64x32xf32, #tpu.memory_space<vmem>>, %arg32: memref<1x32xf32, #tpu.memory_space<vmem>>, %arg33: memref<1x32xf32, #tpu.memory_space<vmem>>, %arg34: memref<1x32xf32, #tpu.memory_space<vmem>>, %arg35: memref<1x32xf32, #tpu.memory_space<vmem>>, %arg36: memref<1x64xf32, #tpu.memory_space<vmem>>, %arg37: memref<1x32xf32, #tpu.memory_space<vmem>>, %arg38: memref<1x32xf32, #tpu.memory_space<vmem>>, %arg39: memref<32x64xf32, #tpu.memory_space<vmem>>, %arg40: memref<32x32xf32, #tpu.memory_space<vmem>>, %arg41: memref<32x32xf32, #tpu.memory_space<vmem>>, %arg42: memref<1x32xf32, #tpu.memory_space<vmem>>, %arg43: memref<1x32xf32, #tpu.memory_space<vmem>>, %arg44: memref<10x32xf32, #tpu.memory_space<vmem>>, %arg45: memref<1x128xf32, #tpu.memory_space<vmem>>, %arg46: memref<32x128xf32, #tpu.memory_space<vmem>>, %arg47: memref<16x128xf32, #tpu.memory_space<vmem>>, %arg48: memref<1x1xf32, #tpu.memory_space<vmem>>) attributes {dimension_semantics = [], scalar_prefetch = 0 : i64, scratch_operands = 0 : i64, tpu.core_type = #tpu.core_type<tc>} {
    %c0 = arith.constant 0 : index
    %c0_0 = arith.constant 0 : index
    %c0_1 = arith.constant 0 : index
    %0 = vector.load %arg2[%c0, %c0_0, %c0_1] : memref<8x1x8xf32, #tpu.memory_space<vmem>>, vector<8x1x8xf32>
    %c0_2 = arith.constant 0 : index
    %c0_3 = arith.constant 0 : index
    %1 = vector.load %arg0[%c0_2, %c0_3] : memref<16x32xf32, #tpu.memory_space<vmem>>, vector<16x32xf32>
    %cst = arith.constant dense<0.000000e+00> : vector<16xf32>
    %2 = vector.multi_reduction <add>, %1, %cst [1] : vector<16x32xf32> to vector<16xf32>
    %3 = vector.shape_cast %2 : vector<16xf32> to vector<16x1xf32>
    %cst_4 = arith.constant 3.200000e+01 : f32
    %4 = vector.broadcast %cst_4 : f32 to vector<16x1xf32>
    %5 = arith.divf %3, %4 : vector<16x1xf32>
    %6 = vector.broadcast %5 : vector<16x1xf32> to vector<16x32xf32>
    %7 = arith.subf %1, %6 : vector<16x32xf32>
    %8 = arith.mulf %7, %7 : vector<16x32xf32>
    %cst_5 = arith.constant dense<0.000000e+00> : vector<16xf32>
    %9 = vector.multi_reduction <add>, %8, %cst_5 [1] : vector<16x32xf32> to vector<16xf32>
    %10 = vector.shape_cast %9 : vector<16xf32> to vector<16x1xf32>
    %cst_6 = arith.constant 3.200000e+01 : f32
    %11 = vector.broadcast %cst_6 : f32 to vector<16x1xf32>
    %12 = arith.divf %10, %11 : vector<16x1xf32>
    %cst_7 = arith.constant 9.99999974E-6 : f32
    %13 = vector.broadcast %cst_7 : f32 to vector<16x1xf32>
    %14 = arith.addf %12, %13 : vector<16x1xf32>
    %15 = math.rsqrt %14 : vector<16x1xf32>
    %16 = vector.broadcast %15 : vector<16x1xf32> to vector<16x32xf32>
    %17 = arith.mulf %7, %16 : vector<16x32xf32>
    %c0_8 = arith.constant 0 : index
    %c0_9 = arith.constant 0 : index
    %18 = vector.load %arg43[%c0_8, %c0_9] : memref<1x32xf32, #tpu.memory_space<vmem>>, vector<1x32xf32>
    %19 = vector.broadcast %18 : vector<1x32xf32> to vector<16x32xf32>
    %20 = arith.mulf %17, %19 : vector<16x32xf32>
    %c0_10 = arith.constant 0 : index
    %c0_11 = arith.constant 0 : index
    %21 = vector.load %arg42[%c0_10, %c0_11] : memref<1x32xf32, #tpu.memory_space<vmem>>, vector<1x32xf32>
    %22 = vector.broadcast %21 : vector<1x32xf32> to vector<16x32xf32>
    %23 = arith.addf %20, %22 : vector<16x32xf32>
    %c0_12 = arith.constant 0 : index
    %c0_13 = arith.constant 0 : index
    %24 = vector.load %arg41[%c0_12, %c0_13] : memref<32x32xf32, #tpu.memory_space<vmem>>, vector<32x32xf32>
    %cst_14 = arith.constant dense<0.000000e+00> : vector<16x32xf32>
    %25 = tpu.matmul %23, %24, %cst_14 {dimension_numbers = #tpu.dot_dimension_numbers<[1], [0], [0], [1], [0, 0, 1, 1], [], []>} : vector<16x32xf32>, vector<32x32xf32>, vector<16x32xf32> -> vector<16x32xf32>
    %c0_15 = arith.constant 0 : index
    %c0_16 = arith.constant 0 : index
    %26 = vector.load %arg38[%c0_15, %c0_16] : memref<1x32xf32, #tpu.memory_space<vmem>>, vector<1x32xf32>
    %27 = vector.broadcast %26 : vector<1x32xf32> to vector<16x32xf32>
    %28 = arith.addf %25, %27 : vector<16x32xf32>
    %c0_17 = arith.constant 0 : index
    %c0_18 = arith.constant 0 : index
    %29 = vector.load %arg39[%c0_17, %c0_18] : memref<32x64xf32, #tpu.memory_space<vmem>>, vector<32x64xf32>
    %cst_19 = arith.constant dense<0.000000e+00> : vector<16x64xf32>
    %30 = tpu.matmul %23, %29, %cst_19 {dimension_numbers = #tpu.dot_dimension_numbers<[1], [0], [0], [1], [0, 0, 1, 1], [], []>} : vector<16x32xf32>, vector<32x64xf32>, vector<16x64xf32> -> vector<16x64xf32>
    %c0_20 = arith.constant 0 : index
    %c0_21 = arith.constant 0 : index
    %31 = vector.load %arg36[%c0_20, %c0_21] : memref<1x64xf32, #tpu.memory_space<vmem>>, vector<1x64xf32>
    %32 = vector.broadcast %31 : vector<1x64xf32> to vector<16x64xf32>
    %33 = arith.addf %30, %32 : vector<16x64xf32>
    %34 = vector.shape_cast %28 : vector<16x32xf32> to vector<2x8x32xf32>
    %35 = vector.extract_strided_slice %33 {offsets = [0, 0], sizes = [16, 32], strides = [1, 1]} : vector<16x64xf32> to vector<16x32xf32>
    %36 = vector.shape_cast %35 : vector<16x32xf32> to vector<2x8x32xf32>
    %37 = vector.extract_strided_slice %33 {offsets = [0, 32], sizes = [16, 32], strides = [1, 1]} : vector<16x64xf32> to vector<16x32xf32>
    %38 = vector.shape_cast %37 : vector<16x32xf32> to vector<2x8x32xf32>
    %39 = vector.extract_strided_slice %34 {offsets = [0, 0, 0], sizes = [2, 8, 8], strides = [1, 1, 1]} : vector<2x8x32xf32> to vector<2x8x8xf32>
    %40 = vector.extract_strided_slice %34 {offsets = [0, 0, 8], sizes = [2, 8, 8], strides = [1, 1, 1]} : vector<2x8x32xf32> to vector<2x8x8xf32>
    %41 = vector.extract_strided_slice %34 {offsets = [0, 0, 16], sizes = [2, 8, 8], strides = [1, 1, 1]} : vector<2x8x32xf32> to vector<2x8x8xf32>
    %42 = vector.extract_strided_slice %34 {offsets = [0, 0, 24], sizes = [2, 8, 8], strides = [1, 1, 1]} : vector<2x8x32xf32> to vector<2x8x8xf32>
    %43 = tpu.concatenate %39, %40, %41, %42 in 0 : vector<2x8x8xf32>, vector<2x8x8xf32>, vector<2x8x8xf32>, vector<2x8x8xf32> -> vector<8x8x8xf32>
    %44 = vector.extract_strided_slice %36 {offsets = [0, 0, 0], sizes = [2, 8, 8], strides = [1, 1, 1]} : vector<2x8x32xf32> to vector<2x8x8xf32>
    %45 = vector.extract_strided_slice %36 {offsets = [0, 0, 8], sizes = [2, 8, 8], strides = [1, 1, 1]} : vector<2x8x32xf32> to vector<2x8x8xf32>
    %46 = vector.extract_strided_slice %36 {offsets = [0, 0, 16], sizes = [2, 8, 8], strides = [1, 1, 1]} : vector<2x8x32xf32> to vector<2x8x8xf32>
    %47 = vector.extract_strided_slice %36 {offsets = [0, 0, 24], sizes = [2, 8, 8], strides = [1, 1, 1]} : vector<2x8x32xf32> to vector<2x8x8xf32>
    %48 = tpu.concatenate %44, %45, %46, %47 in 0 : vector<2x8x8xf32>, vector<2x8x8xf32>, vector<2x8x8xf32>, vector<2x8x8xf32> -> vector<8x8x8xf32>
    %49 = vector.extract_strided_slice %38 {offsets = [0, 0, 0], sizes = [2, 8, 8], strides = [1, 1, 1]} : vector<2x8x32xf32> to vector<2x8x8xf32>
    %50 = vector.extract_strided_slice %38 {offsets = [0, 0, 8], sizes = [2, 8, 8], strides = [1, 1, 1]} : vector<2x8x32xf32> to vector<2x8x8xf32>
    %51 = vector.extract_strided_slice %38 {offsets = [0, 0, 16], sizes = [2, 8, 8], strides = [1, 1, 1]} : vector<2x8x32xf32> to vector<2x8x8xf32>
    %52 = vector.extract_strided_slice %38 {offsets = [0, 0, 24], sizes = [2, 8, 8], strides = [1, 1, 1]} : vector<2x8x32xf32> to vector<2x8x8xf32>
    %53 = tpu.concatenate %49, %50, %51, %52 in 0 : vector<2x8x8xf32>, vector<2x8x8xf32>, vector<2x8x8xf32>, vector<2x8x8xf32> -> vector<8x8x8xf32>
    %cst_22 = arith.constant dense<0.000000e+00> : vector<8x8x8xf32>
    %54 = tpu.matmul %43, %48, %cst_22 {dimension_numbers = #tpu.dot_dimension_numbers<[2], [2], [1], [1], [0, 0, 0, 1, 1, 1], [0], [0]>} : vector<8x8x8xf32>, vector<8x8x8xf32>, vector<8x8x8xf32> -> vector<8x8x8xf32>
    %cst_23 = arith.constant 0.353553385 : f32
    %55 = vector.broadcast %cst_23 : f32 to vector<8x8x8xf32>
    %56 = arith.mulf %54, %55 : vector<8x8x8xf32>
    %57 = vector.broadcast %0 : vector<8x1x8xf32> to vector<8x8x8xf32>
    %58 = arith.addf %56, %57 : vector<8x8x8xf32>
    %cst_24 = arith.constant dense<0xFF800000> : vector<8x8xf32>
    %59 = vector.multi_reduction <maximumf>, %58, %cst_24 [2] : vector<8x8x8xf32> to vector<8x8xf32>
    %60 = vector.shape_cast %59 : vector<8x8xf32> to vector<8x8x1xf32>
    %61 = vector.broadcast %60 : vector<8x8x1xf32> to vector<8x8x8xf32>
    %62 = arith.subf %58, %61 : vector<8x8x8xf32>
    %63 = math.exp %62 : vector<8x8x8xf32>
    %cst_25 = arith.constant dense<0.000000e+00> : vector<8x8xf32>
    %64 = vector.multi_reduction <add>, %63, %cst_25 [2] : vector<8x8x8xf32> to vector<8x8xf32>
    %65 = vector.shape_cast %64 : vector<8x8xf32> to vector<8x8x1xf32>
    %66 = tpu.reciprocal %65 {approx = true} : vector<8x8x1xf32> -> vector<8x8x1xf32>
    %67 = vector.broadcast %66 : vector<8x8x1xf32> to vector<8x8x8xf32>
    %68 = arith.mulf %63, %67 : vector<8x8x8xf32>
    %cst_26 = arith.constant dense<0.000000e+00> : vector<8x8x8xf32>
    %69 = tpu.matmul %68, %53, %cst_26 {dimension_numbers = #tpu.dot_dimension_numbers<[2], [1], [1], [2], [0, 0, 0, 1, 1, 2], [0], [0]>} : vector<8x8x8xf32>, vector<8x8x8xf32>, vector<8x8x8xf32> -> vector<8x8x8xf32>
    %70 = vector.extract_strided_slice %69 {offsets = [0, 0, 0], sizes = [1, 8, 8], strides = [1, 1, 1]} : vector<8x8x8xf32> to vector<1x8x8xf32>
    %71 = vector.shape_cast %70 : vector<1x8x8xf32> to vector<8x8xf32>
    %72 = vector.extract_strided_slice %69 {offsets = [2, 0, 0], sizes = [1, 8, 8], strides = [1, 1, 1]} : vector<8x8x8xf32> to vector<1x8x8xf32>
    %73 = vector.shape_cast %72 : vector<1x8x8xf32> to vector<8x8xf32>
    %74 = vector.extract_strided_slice %69 {offsets = [4, 0, 0], sizes = [1, 8, 8], strides = [1, 1, 1]} : vector<8x8x8xf32> to vector<1x8x8xf32>
    %75 = vector.shape_cast %74 : vector<1x8x8xf32> to vector<8x8xf32>
    %76 = vector.extract_strided_slice %69 {offsets = [6, 0, 0], sizes = [1, 8, 8], strides = [1, 1, 1]} : vector<8x8x8xf32> to vector<1x8x8xf32>
    %77 = vector.shape_cast %76 : vector<1x8x8xf32> to vector<8x8xf32>
    %78 = tpu.concatenate %71, %73, %75, %77 in 1 : vector<8x8xf32>, vector<8x8xf32>, vector<8x8xf32>, vector<8x8xf32> -> vector<8x32xf32>
    %79 = vector.extract_strided_slice %69 {offsets = [1, 0, 0], sizes = [1, 8, 8], strides = [1, 1, 1]} : vector<8x8x8xf32> to vector<1x8x8xf32>
    %80 = vector.shape_cast %79 : vector<1x8x8xf32> to vector<8x8xf32>
    %81 = vector.extract_strided_slice %69 {offsets = [3, 0, 0], sizes = [1, 8, 8], strides = [1, 1, 1]} : vector<8x8x8xf32> to vector<1x8x8xf32>
    %82 = vector.shape_cast %81 : vector<1x8x8xf32> to vector<8x8xf32>
    %83 = vector.extract_strided_slice %69 {offsets = [5, 0, 0], sizes = [1, 8, 8], strides = [1, 1, 1]} : vector<8x8x8xf32> to vector<1x8x8xf32>
    %84 = vector.shape_cast %83 : vector<1x8x8xf32> to vector<8x8xf32>
    %85 = vector.extract_strided_slice %69 {offsets = [7, 0, 0], sizes = [1, 8, 8], strides = [1, 1, 1]} : vector<8x8x8xf32> to vector<1x8x8xf32>
    %86 = vector.shape_cast %85 : vector<1x8x8xf32> to vector<8x8xf32>
    %87 = tpu.concatenate %80, %82, %84, %86 in 1 : vector<8x8xf32>, vector<8x8xf32>, vector<8x8xf32>, vector<8x8xf32> -> vector<8x32xf32>
    %88 = tpu.concatenate %78, %87 in 0 : vector<8x32xf32>, vector<8x32xf32> -> vector<16x32xf32>
    %c0_27 = arith.constant 0 : index
    %c0_28 = arith.constant 0 : index
    %89 = vector.load %arg40[%c0_27, %c0_28] : memref<32x32xf32, #tpu.memory_space<vmem>>, vector<32x32xf32>
    %cst_29 = arith.constant dense<0.000000e+00> : vector<16x32xf32>
    %90 = tpu.matmul %88, %89, %cst_29 {dimension_numbers = #tpu.dot_dimension_numbers<[1], [0], [0], [1], [0, 0, 1, 1], [], []>} : vector<16x32xf32>, vector<32x32xf32>, vector<16x32xf32> -> vector<16x32xf32>
    %c0_30 = arith.constant 0 : index
    %c0_31 = arith.constant 0 : index
    %91 = vector.load %arg37[%c0_30, %c0_31] : memref<1x32xf32, #tpu.memory_space<vmem>>, vector<1x32xf32>
    %92 = vector.broadcast %91 : vector<1x32xf32> to vector<16x32xf32>
    %93 = arith.addf %90, %92 : vector<16x32xf32>
    %94 = arith.addf %23, %93 : vector<16x32xf32>
    %cst_32 = arith.constant dense<0.000000e+00> : vector<16xf32>
    %95 = vector.multi_reduction <add>, %94, %cst_32 [1] : vector<16x32xf32> to vector<16xf32>
    %96 = vector.shape_cast %95 : vector<16xf32> to vector<16x1xf32>
    %cst_33 = arith.constant 3.200000e+01 : f32
    %97 = vector.broadcast %cst_33 : f32 to vector<16x1xf32>
    %98 = arith.divf %96, %97 : vector<16x1xf32>
    %99 = vector.broadcast %98 : vector<16x1xf32> to vector<16x32xf32>
    %100 = arith.subf %94, %99 : vector<16x32xf32>
    %101 = arith.mulf %100, %100 : vector<16x32xf32>
    %cst_34 = arith.constant dense<0.000000e+00> : vector<16xf32>
    %102 = vector.multi_reduction <add>, %101, %cst_34 [1] : vector<16x32xf32> to vector<16xf32>
    %103 = vector.shape_cast %102 : vector<16xf32> to vector<16x1xf32>
    %cst_35 = arith.constant 3.200000e+01 : f32
    %104 = vector.broadcast %cst_35 : f32 to vector<16x1xf32>
    %105 = arith.divf %103, %104 : vector<16x1xf32>
    %cst_36 = arith.constant 9.99999974E-6 : f32
    %106 = vector.broadcast %cst_36 : f32 to vector<16x1xf32>
    %107 = arith.addf %105, %106 : vector<16x1xf32>
    %108 = math.rsqrt %107 : vector<16x1xf32>
    %109 = vector.broadcast %108 : vector<16x1xf32> to vector<16x32xf32>
    %110 = arith.mulf %100, %109 : vector<16x32xf32>
    %c0_37 = arith.constant 0 : index
    %c0_38 = arith.constant 0 : index
    %111 = vector.load %arg33[%c0_37, %c0_38] : memref<1x32xf32, #tpu.memory_space<vmem>>, vector<1x32xf32>
    %112 = vector.broadcast %111 : vector<1x32xf32> to vector<16x32xf32>
    %113 = arith.mulf %110, %112 : vector<16x32xf32>
    %c0_39 = arith.constant 0 : index
    %c0_40 = arith.constant 0 : index
    %114 = vector.load %arg32[%c0_39, %c0_40] : memref<1x32xf32, #tpu.memory_space<vmem>>, vector<1x32xf32>
    %115 = vector.broadcast %114 : vector<1x32xf32> to vector<16x32xf32>
    %116 = arith.addf %113, %115 : vector<16x32xf32>
    %c0_41 = arith.constant 0 : index
    %c0_42 = arith.constant 0 : index
    %117 = vector.load %arg29[%c0_41, %c0_42] : memref<32x64xf32, #tpu.memory_space<vmem>>, vector<32x64xf32>
    %cst_43 = arith.constant dense<0.000000e+00> : vector<16x64xf32>
    %118 = tpu.matmul %116, %117, %cst_43 {dimension_numbers = #tpu.dot_dimension_numbers<[1], [0], [0], [1], [0, 0, 1, 1], [], []>} : vector<16x32xf32>, vector<32x64xf32>, vector<16x64xf32> -> vector<16x64xf32>
    %c0_44 = arith.constant 0 : index
    %c0_45 = arith.constant 0 : index
    %119 = vector.load %arg28[%c0_44, %c0_45] : memref<1x64xf32, #tpu.memory_space<vmem>>, vector<1x64xf32>
    %120 = vector.broadcast %119 : vector<1x64xf32> to vector<16x64xf32>
    %121 = arith.addf %118, %120 : vector<16x64xf32>
    %122 = arith.mulf %121, %121 : vector<16x64xf32>
    %123 = arith.mulf %121, %122 : vector<16x64xf32>
    %cst_46 = arith.constant 4.471500e-02 : f32
    %124 = vector.broadcast %cst_46 : f32 to vector<16x64xf32>
    %125 = arith.mulf %124, %123 : vector<16x64xf32>
    %126 = arith.addf %121, %125 : vector<16x64xf32>
    %cst_47 = arith.constant 0.797884583 : f32
    %127 = vector.broadcast %cst_47 : f32 to vector<16x64xf32>
    %128 = arith.mulf %127, %126 : vector<16x64xf32>
    %129 = math.tanh %128 : vector<16x64xf32>
    %cst_48 = arith.constant 1.000000e+00 : f32
    %130 = vector.broadcast %cst_48 : f32 to vector<16x64xf32>
    %131 = arith.addf %130, %129 : vector<16x64xf32>
    %cst_49 = arith.constant 5.000000e-01 : f32
    %132 = vector.broadcast %cst_49 : f32 to vector<16x64xf32>
    %133 = arith.mulf %132, %131 : vector<16x64xf32>
    %134 = arith.mulf %121, %133 : vector<16x64xf32>
    %c0_50 = arith.constant 0 : index
    %c0_51 = arith.constant 0 : index
    %135 = vector.load %arg31[%c0_50, %c0_51] : memref<64x32xf32, #tpu.memory_space<vmem>>, vector<64x32xf32>
    %cst_52 = arith.constant dense<0.000000e+00> : vector<16x32xf32>
    %136 = tpu.matmul %134, %135, %cst_52 {dimension_numbers = #tpu.dot_dimension_numbers<[1], [0], [0], [1], [0, 0, 1, 1], [], []>} : vector<16x64xf32>, vector<64x32xf32>, vector<16x32xf32> -> vector<16x32xf32>
    %c0_53 = arith.constant 0 : index
    %c0_54 = arith.constant 0 : index
    %137 = vector.load %arg30[%c0_53, %c0_54] : memref<1x32xf32, #tpu.memory_space<vmem>>, vector<1x32xf32>
    %138 = vector.broadcast %137 : vector<1x32xf32> to vector<16x32xf32>
    %139 = arith.addf %136, %138 : vector<16x32xf32>
    %140 = arith.addf %116, %139 : vector<16x32xf32>
    %cst_55 = arith.constant dense<0.000000e+00> : vector<16xf32>
    %141 = vector.multi_reduction <add>, %140, %cst_55 [1] : vector<16x32xf32> to vector<16xf32>
    %142 = vector.shape_cast %141 : vector<16xf32> to vector<16x1xf32>
    %cst_56 = arith.constant 3.200000e+01 : f32
    %143 = vector.broadcast %cst_56 : f32 to vector<16x1xf32>
    %144 = arith.divf %142, %143 : vector<16x1xf32>
    %145 = vector.broadcast %144 : vector<16x1xf32> to vector<16x32xf32>
    %146 = arith.subf %140, %145 : vector<16x32xf32>
    %147 = arith.mulf %146, %146 : vector<16x32xf32>
    %cst_57 = arith.constant dense<0.000000e+00> : vector<16xf32>
    %148 = vector.multi_reduction <add>, %147, %cst_57 [1] : vector<16x32xf32> to vector<16xf32>
    %149 = vector.shape_cast %148 : vector<16xf32> to vector<16x1xf32>
    %cst_58 = arith.constant 3.200000e+01 : f32
    %150 = vector.broadcast %cst_58 : f32 to vector<16x1xf32>
    %151 = arith.divf %149, %150 : vector<16x1xf32>
    %cst_59 = arith.constant 9.99999974E-6 : f32
    %152 = vector.broadcast %cst_59 : f32 to vector<16x1xf32>
    %153 = arith.addf %151, %152 : vector<16x1xf32>
    %154 = math.rsqrt %153 : vector<16x1xf32>
    %155 = vector.broadcast %154 : vector<16x1xf32> to vector<16x32xf32>
    %156 = arith.mulf %146, %155 : vector<16x32xf32>
    %c0_60 = arith.constant 0 : index
    %c0_61 = arith.constant 0 : index
    %157 = vector.load %arg35[%c0_60, %c0_61] : memref<1x32xf32, #tpu.memory_space<vmem>>, vector<1x32xf32>
    %158 = vector.broadcast %157 : vector<1x32xf32> to vector<16x32xf32>
    %159 = arith.mulf %156, %158 : vector<16x32xf32>
    %c0_62 = arith.constant 0 : index
    %c0_63 = arith.constant 0 : index
    %160 = vector.load %arg34[%c0_62, %c0_63] : memref<1x32xf32, #tpu.memory_space<vmem>>, vector<1x32xf32>
    %161 = vector.broadcast %160 : vector<1x32xf32> to vector<16x32xf32>
    %162 = arith.addf %159, %161 : vector<16x32xf32>
    %163 = vector.extract_strided_slice %162 {offsets = [0, 0], sizes = [1, 32], strides = [1, 1]} : vector<16x32xf32> to vector<1x32xf32>
    %164 = vector.extract_strided_slice %162 {offsets = [8, 0], sizes = [1, 32], strides = [1, 1]} : vector<16x32xf32> to vector<1x32xf32>
    %165 = tpu.concatenate %163, %164 in 0 : vector<1x32xf32>, vector<1x32xf32> -> vector<2x32xf32>
    %c0_64 = arith.constant 0 : index
    %c0_65 = arith.constant 0 : index
    %166 = vector.load %arg44[%c0_64, %c0_65] : memref<10x32xf32, #tpu.memory_space<vmem>>, vector<10x32xf32>
    %cst_66 = arith.constant dense<0.000000e+00> : vector<2x10xf32>
    %167 = tpu.matmul %165, %166, %cst_66 {dimension_numbers = #tpu.dot_dimension_numbers<[1], [1], [0], [0], [0, 0, 1, 0], [], []>} : vector<2x32xf32>, vector<10x32xf32>, vector<2x10xf32> -> vector<2x10xf32>
    %cst_67 = arith.constant dense<0xFF800000> : vector<2xf32>
    %168 = vector.multi_reduction <maximumf>, %167, %cst_67 [1] : vector<2x10xf32> to vector<2xf32>
    %169 = vector.shape_cast %168 : vector<2xf32> to vector<2x1xf32>
    %170 = vector.broadcast %169 : vector<2x1xf32> to vector<2x10xf32>
    %171 = arith.subf %167, %170 : vector<2x10xf32>
    %172 = math.exp %171 : vector<2x10xf32>
    %cst_68 = arith.constant dense<0.000000e+00> : vector<2xf32>
    %173 = vector.multi_reduction <add>, %172, %cst_68 [1] : vector<2x10xf32> to vector<2xf32>
    %174 = vector.shape_cast %173 : vector<2xf32> to vector<2x1xf32>
    %175 = tpu.reciprocal %174 {approx = true} : vector<2x1xf32> -> vector<2x1xf32>
    %176 = vector.broadcast %175 : vector<2x1xf32> to vector<2x10xf32>
    %177 = arith.mulf %172, %176 : vector<2x10xf32>
    %cst_69 = arith.constant dense<0.000000e+00> : vector<2x32xf32>
    %178 = tpu.matmul %177, %166, %cst_69 {dimension_numbers = #tpu.dot_dimension_numbers<[1], [0], [0], [1], [0, 0, 1, 1], [], []>} : vector<2x10xf32>, vector<10x32xf32>, vector<2x32xf32> -> vector<2x32xf32>
    %c0_70 = arith.constant 0 : index
    %c0_71 = arith.constant 0 : index
    %179 = vector.load %arg3[%c0_70, %c0_71] : memref<5x32xf32, #tpu.memory_space<vmem>>, vector<5x32xf32>
    %cst_72 = arith.constant dense<0.000000e+00> : vector<2x5xf32>
    %180 = tpu.matmul %165, %179, %cst_72 {dimension_numbers = #tpu.dot_dimension_numbers<[1], [1], [0], [0], [0, 0, 1, 0], [], []>} : vector<2x32xf32>, vector<5x32xf32>, vector<2x5xf32> -> vector<2x5xf32>
    %cst_73 = arith.constant dense<0xFF800000> : vector<2xf32>
    %181 = vector.multi_reduction <maximumf>, %180, %cst_73 [1] : vector<2x5xf32> to vector<2xf32>
    %182 = vector.shape_cast %181 : vector<2xf32> to vector<2x1xf32>
    %183 = vector.broadcast %182 : vector<2x1xf32> to vector<2x5xf32>
    %184 = arith.subf %180, %183 : vector<2x5xf32>
    %185 = math.exp %184 : vector<2x5xf32>
    %cst_74 = arith.constant dense<0.000000e+00> : vector<2xf32>
    %186 = vector.multi_reduction <add>, %185, %cst_74 [1] : vector<2x5xf32> to vector<2xf32>
    %187 = vector.shape_cast %186 : vector<2xf32> to vector<2x1xf32>
    %188 = tpu.reciprocal %187 {approx = true} : vector<2x1xf32> -> vector<2x1xf32>
    %189 = vector.broadcast %188 : vector<2x1xf32> to vector<2x5xf32>
    %190 = arith.mulf %185, %189 : vector<2x5xf32>
    %cst_75 = arith.constant dense<0.000000e+00> : vector<2x32xf32>
    %191 = tpu.matmul %190, %179, %cst_75 {dimension_numbers = #tpu.dot_dimension_numbers<[1], [0], [0], [1], [0, 0, 1, 1], [], []>} : vector<2x5xf32>, vector<5x32xf32>, vector<2x32xf32> -> vector<2x32xf32>
    %192 = arith.addf %178, %191 : vector<2x32xf32>
    %193 = vector.extract_strided_slice %192 {offsets = [0, 0], sizes = [1, 32], strides = [1, 1]} : vector<2x32xf32> to vector<1x32xf32>
    %cst_76 = arith.constant 0.000000e+00 : f32
    %194 = vector.broadcast %cst_76 : f32 to vector<7x32xf32>
    %195 = vector.extract_strided_slice %192 {offsets = [1, 0], sizes = [1, 32], strides = [1, 1]} : vector<2x32xf32> to vector<1x32xf32>
    %cst_77 = arith.constant 0.000000e+00 : f32
    %196 = vector.broadcast %cst_77 : f32 to vector<7x32xf32>
    %c0_78 = arith.constant 0 : index
    %c0_79 = arith.constant 0 : index
    %197 = vector.load %arg1[%c0_78, %c0_79] : memref<16x32xf32, #tpu.memory_space<vmem>>, vector<16x32xf32>
    %198 = tpu.concatenate %193, %194, %195, %196 in 0 : vector<1x32xf32>, vector<7x32xf32>, vector<1x32xf32>, vector<7x32xf32> -> vector<16x32xf32>
    %199 = arith.addf %197, %198 : vector<16x32xf32>
    %cst_80 = arith.constant dense<0.000000e+00> : vector<16xf32>
    %200 = vector.multi_reduction <add>, %199, %cst_80 [1] : vector<16x32xf32> to vector<16xf32>
    %201 = vector.shape_cast %200 : vector<16xf32> to vector<16x1xf32>
    %cst_81 = arith.constant 3.200000e+01 : f32
    %202 = vector.broadcast %cst_81 : f32 to vector<16x1xf32>
    %203 = arith.divf %201, %202 : vector<16x1xf32>
    %204 = vector.broadcast %203 : vector<16x1xf32> to vector<16x32xf32>
    %205 = arith.subf %199, %204 : vector<16x32xf32>
    %206 = arith.mulf %205, %205 : vector<16x32xf32>
    %cst_82 = arith.constant dense<0.000000e+00> : vector<16xf32>
    %207 = vector.multi_reduction <add>, %206, %cst_82 [1] : vector<16x32xf32> to vector<16xf32>
    %208 = vector.shape_cast %207 : vector<16xf32> to vector<16x1xf32>
    %cst_83 = arith.constant 3.200000e+01 : f32
    %209 = vector.broadcast %cst_83 : f32 to vector<16x1xf32>
    %210 = arith.divf %208, %209 : vector<16x1xf32>
    %cst_84 = arith.constant 9.99999974E-6 : f32
    %211 = vector.broadcast %cst_84 : f32 to vector<16x1xf32>
    %212 = arith.addf %210, %211 : vector<16x1xf32>
    %213 = math.rsqrt %212 : vector<16x1xf32>
    %214 = vector.broadcast %213 : vector<16x1xf32> to vector<16x32xf32>
    %215 = arith.mulf %205, %214 : vector<16x32xf32>
    %c0_85 = arith.constant 0 : index
    %c0_86 = arith.constant 0 : index
    %216 = vector.load %arg27[%c0_85, %c0_86] : memref<1x32xf32, #tpu.memory_space<vmem>>, vector<1x32xf32>
    %217 = vector.broadcast %216 : vector<1x32xf32> to vector<16x32xf32>
    %218 = arith.mulf %215, %217 : vector<16x32xf32>
    %c0_87 = arith.constant 0 : index
    %c0_88 = arith.constant 0 : index
    %219 = vector.load %arg26[%c0_87, %c0_88] : memref<1x32xf32, #tpu.memory_space<vmem>>, vector<1x32xf32>
    %220 = vector.broadcast %219 : vector<1x32xf32> to vector<16x32xf32>
    %221 = arith.addf %218, %220 : vector<16x32xf32>
    %222 = tpu.iota {dimensions = array<i32: 0>} : vector<8x8xi32>
    %223 = tpu.iota {dimensions = array<i32: 1>} : vector<8x8xi32>
    %224 = arith.cmpi sle, %223, %222 : vector<8x8xi32>
    %cst_89 = arith.constant 0.000000e+00 : f32
    %cst_90 = arith.constant -1.000000e+09 : f32
    %225 = vector.broadcast %cst_89 : f32 to vector<8x8xf32>
    %226 = vector.broadcast %cst_90 : f32 to vector<8x8xf32>
    %227 = arith.select %224, %225, %226 : vector<8x8xi1>, vector<8x8xf32>
    %c0_91 = arith.constant 0 : index
    %c0_92 = arith.constant 0 : index
    %228 = vector.load %arg25[%c0_91, %c0_92] : memref<32x32xf32, #tpu.memory_space<vmem>>, vector<32x32xf32>
    %cst_93 = arith.constant dense<0.000000e+00> : vector<16x32xf32>
    %229 = tpu.matmul %221, %228, %cst_93 {dimension_numbers = #tpu.dot_dimension_numbers<[1], [0], [0], [1], [0, 0, 1, 1], [], []>} : vector<16x32xf32>, vector<32x32xf32>, vector<16x32xf32> -> vector<16x32xf32>
    %c0_94 = arith.constant 0 : index
    %c0_95 = arith.constant 0 : index
    %230 = vector.load %arg22[%c0_94, %c0_95] : memref<1x32xf32, #tpu.memory_space<vmem>>, vector<1x32xf32>
    %231 = vector.broadcast %230 : vector<1x32xf32> to vector<16x32xf32>
    %232 = arith.addf %229, %231 : vector<16x32xf32>
    %c0_96 = arith.constant 0 : index
    %c0_97 = arith.constant 0 : index
    %233 = vector.load %arg23[%c0_96, %c0_97] : memref<32x64xf32, #tpu.memory_space<vmem>>, vector<32x64xf32>
    %cst_98 = arith.constant dense<0.000000e+00> : vector<16x64xf32>
    %234 = tpu.matmul %221, %233, %cst_98 {dimension_numbers = #tpu.dot_dimension_numbers<[1], [0], [0], [1], [0, 0, 1, 1], [], []>} : vector<16x32xf32>, vector<32x64xf32>, vector<16x64xf32> -> vector<16x64xf32>
    %c0_99 = arith.constant 0 : index
    %c0_100 = arith.constant 0 : index
    %235 = vector.load %arg20[%c0_99, %c0_100] : memref<1x64xf32, #tpu.memory_space<vmem>>, vector<1x64xf32>
    %236 = vector.broadcast %235 : vector<1x64xf32> to vector<16x64xf32>
    %237 = arith.addf %234, %236 : vector<16x64xf32>
    %238 = vector.shape_cast %232 : vector<16x32xf32> to vector<2x8x32xf32>
    %239 = vector.extract_strided_slice %237 {offsets = [0, 0], sizes = [16, 32], strides = [1, 1]} : vector<16x64xf32> to vector<16x32xf32>
    %240 = vector.shape_cast %239 : vector<16x32xf32> to vector<2x8x32xf32>
    %241 = vector.extract_strided_slice %237 {offsets = [0, 32], sizes = [16, 32], strides = [1, 1]} : vector<16x64xf32> to vector<16x32xf32>
    %242 = vector.shape_cast %241 : vector<16x32xf32> to vector<2x8x32xf32>
    %243 = vector.extract_strided_slice %238 {offsets = [0, 0, 0], sizes = [2, 8, 8], strides = [1, 1, 1]} : vector<2x8x32xf32> to vector<2x8x8xf32>
    %244 = vector.extract_strided_slice %238 {offsets = [0, 0, 8], sizes = [2, 8, 8], strides = [1, 1, 1]} : vector<2x8x32xf32> to vector<2x8x8xf32>
    %245 = vector.extract_strided_slice %238 {offsets = [0, 0, 16], sizes = [2, 8, 8], strides = [1, 1, 1]} : vector<2x8x32xf32> to vector<2x8x8xf32>
    %246 = vector.extract_strided_slice %238 {offsets = [0, 0, 24], sizes = [2, 8, 8], strides = [1, 1, 1]} : vector<2x8x32xf32> to vector<2x8x8xf32>
    %247 = tpu.concatenate %243, %244, %245, %246 in 0 : vector<2x8x8xf32>, vector<2x8x8xf32>, vector<2x8x8xf32>, vector<2x8x8xf32> -> vector<8x8x8xf32>
    %248 = vector.extract_strided_slice %240 {offsets = [0, 0, 0], sizes = [2, 8, 8], strides = [1, 1, 1]} : vector<2x8x32xf32> to vector<2x8x8xf32>
    %249 = vector.extract_strided_slice %240 {offsets = [0, 0, 8], sizes = [2, 8, 8], strides = [1, 1, 1]} : vector<2x8x32xf32> to vector<2x8x8xf32>
    %250 = vector.extract_strided_slice %240 {offsets = [0, 0, 16], sizes = [2, 8, 8], strides = [1, 1, 1]} : vector<2x8x32xf32> to vector<2x8x8xf32>
    %251 = vector.extract_strided_slice %240 {offsets = [0, 0, 24], sizes = [2, 8, 8], strides = [1, 1, 1]} : vector<2x8x32xf32> to vector<2x8x8xf32>
    %252 = tpu.concatenate %248, %249, %250, %251 in 0 : vector<2x8x8xf32>, vector<2x8x8xf32>, vector<2x8x8xf32>, vector<2x8x8xf32> -> vector<8x8x8xf32>
    %253 = vector.extract_strided_slice %242 {offsets = [0, 0, 0], sizes = [2, 8, 8], strides = [1, 1, 1]} : vector<2x8x32xf32> to vector<2x8x8xf32>
    %254 = vector.extract_strided_slice %242 {offsets = [0, 0, 8], sizes = [2, 8, 8], strides = [1, 1, 1]} : vector<2x8x32xf32> to vector<2x8x8xf32>
    %255 = vector.extract_strided_slice %242 {offsets = [0, 0, 16], sizes = [2, 8, 8], strides = [1, 1, 1]} : vector<2x8x32xf32> to vector<2x8x8xf32>
    %256 = vector.extract_strided_slice %242 {offsets = [0, 0, 24], sizes = [2, 8, 8], strides = [1, 1, 1]} : vector<2x8x32xf32> to vector<2x8x8xf32>
    %257 = tpu.concatenate %253, %254, %255, %256 in 0 : vector<2x8x8xf32>, vector<2x8x8xf32>, vector<2x8x8xf32>, vector<2x8x8xf32> -> vector<8x8x8xf32>
    %cst_101 = arith.constant dense<0.000000e+00> : vector<8x8x8xf32>
    %258 = tpu.matmul %247, %252, %cst_101 {dimension_numbers = #tpu.dot_dimension_numbers<[2], [2], [1], [1], [0, 0, 0, 1, 1, 1], [0], [0]>} : vector<8x8x8xf32>, vector<8x8x8xf32>, vector<8x8x8xf32> -> vector<8x8x8xf32>
    %cst_102 = arith.constant 0.353553385 : f32
    %259 = vector.broadcast %cst_102 : f32 to vector<8x8x8xf32>
    %260 = arith.mulf %258, %259 : vector<8x8x8xf32>
    %261 = vector.shape_cast %227 : vector<8x8xf32> to vector<1x8x8xf32>
    %262 = vector.broadcast %261 : vector<1x8x8xf32> to vector<8x8x8xf32>
    %263 = arith.addf %260, %262 : vector<8x8x8xf32>
    %cst_103 = arith.constant dense<0xFF800000> : vector<8x8xf32>
    %264 = vector.multi_reduction <maximumf>, %263, %cst_103 [2] : vector<8x8x8xf32> to vector<8x8xf32>
    %265 = vector.shape_cast %264 : vector<8x8xf32> to vector<8x8x1xf32>
    %266 = vector.broadcast %265 : vector<8x8x1xf32> to vector<8x8x8xf32>
    %267 = arith.subf %263, %266 : vector<8x8x8xf32>
    %268 = math.exp %267 : vector<8x8x8xf32>
    %cst_104 = arith.constant dense<0.000000e+00> : vector<8x8xf32>
    %269 = vector.multi_reduction <add>, %268, %cst_104 [2] : vector<8x8x8xf32> to vector<8x8xf32>
    %270 = vector.shape_cast %269 : vector<8x8xf32> to vector<8x8x1xf32>
    %271 = tpu.reciprocal %270 {approx = true} : vector<8x8x1xf32> -> vector<8x8x1xf32>
    %272 = vector.broadcast %271 : vector<8x8x1xf32> to vector<8x8x8xf32>
    %273 = arith.mulf %268, %272 : vector<8x8x8xf32>
    %cst_105 = arith.constant dense<0.000000e+00> : vector<8x8x8xf32>
    %274 = tpu.matmul %273, %257, %cst_105 {dimension_numbers = #tpu.dot_dimension_numbers<[2], [1], [1], [2], [0, 0, 0, 1, 1, 2], [0], [0]>} : vector<8x8x8xf32>, vector<8x8x8xf32>, vector<8x8x8xf32> -> vector<8x8x8xf32>
    %275 = vector.extract_strided_slice %274 {offsets = [0, 0, 0], sizes = [1, 8, 8], strides = [1, 1, 1]} : vector<8x8x8xf32> to vector<1x8x8xf32>
    %276 = vector.shape_cast %275 : vector<1x8x8xf32> to vector<8x8xf32>
    %277 = vector.extract_strided_slice %274 {offsets = [2, 0, 0], sizes = [1, 8, 8], strides = [1, 1, 1]} : vector<8x8x8xf32> to vector<1x8x8xf32>
    %278 = vector.shape_cast %277 : vector<1x8x8xf32> to vector<8x8xf32>
    %279 = vector.extract_strided_slice %274 {offsets = [4, 0, 0], sizes = [1, 8, 8], strides = [1, 1, 1]} : vector<8x8x8xf32> to vector<1x8x8xf32>
    %280 = vector.shape_cast %279 : vector<1x8x8xf32> to vector<8x8xf32>
    %281 = vector.extract_strided_slice %274 {offsets = [6, 0, 0], sizes = [1, 8, 8], strides = [1, 1, 1]} : vector<8x8x8xf32> to vector<1x8x8xf32>
    %282 = vector.shape_cast %281 : vector<1x8x8xf32> to vector<8x8xf32>
    %283 = tpu.concatenate %276, %278, %280, %282 in 1 : vector<8x8xf32>, vector<8x8xf32>, vector<8x8xf32>, vector<8x8xf32> -> vector<8x32xf32>
    %284 = vector.extract_strided_slice %274 {offsets = [1, 0, 0], sizes = [1, 8, 8], strides = [1, 1, 1]} : vector<8x8x8xf32> to vector<1x8x8xf32>
    %285 = vector.shape_cast %284 : vector<1x8x8xf32> to vector<8x8xf32>
    %286 = vector.extract_strided_slice %274 {offsets = [3, 0, 0], sizes = [1, 8, 8], strides = [1, 1, 1]} : vector<8x8x8xf32> to vector<1x8x8xf32>
    %287 = vector.shape_cast %286 : vector<1x8x8xf32> to vector<8x8xf32>
    %288 = vector.extract_strided_slice %274 {offsets = [5, 0, 0], sizes = [1, 8, 8], strides = [1, 1, 1]} : vector<8x8x8xf32> to vector<1x8x8xf32>
    %289 = vector.shape_cast %288 : vector<1x8x8xf32> to vector<8x8xf32>
    %290 = vector.extract_strided_slice %274 {offsets = [7, 0, 0], sizes = [1, 8, 8], strides = [1, 1, 1]} : vector<8x8x8xf32> to vector<1x8x8xf32>
    %291 = vector.shape_cast %290 : vector<1x8x8xf32> to vector<8x8xf32>
    %292 = tpu.concatenate %285, %287, %289, %291 in 1 : vector<8x8xf32>, vector<8x8xf32>, vector<8x8xf32>, vector<8x8xf32> -> vector<8x32xf32>
    %293 = tpu.concatenate %283, %292 in 0 : vector<8x32xf32>, vector<8x32xf32> -> vector<16x32xf32>
    %c0_106 = arith.constant 0 : index
    %c0_107 = arith.constant 0 : index
    %294 = vector.load %arg24[%c0_106, %c0_107] : memref<32x32xf32, #tpu.memory_space<vmem>>, vector<32x32xf32>
    %cst_108 = arith.constant dense<0.000000e+00> : vector<16x32xf32>
    %295 = tpu.matmul %293, %294, %cst_108 {dimension_numbers = #tpu.dot_dimension_numbers<[1], [0], [0], [1], [0, 0, 1, 1], [], []>} : vector<16x32xf32>, vector<32x32xf32>, vector<16x32xf32> -> vector<16x32xf32>
    %c0_109 = arith.constant 0 : index
    %c0_110 = arith.constant 0 : index
    %296 = vector.load %arg21[%c0_109, %c0_110] : memref<1x32xf32, #tpu.memory_space<vmem>>, vector<1x32xf32>
    %297 = vector.broadcast %296 : vector<1x32xf32> to vector<16x32xf32>
    %298 = arith.addf %295, %297 : vector<16x32xf32>
    %299 = arith.addf %221, %298 : vector<16x32xf32>
    %cst_111 = arith.constant dense<0.000000e+00> : vector<16xf32>
    %300 = vector.multi_reduction <add>, %299, %cst_111 [1] : vector<16x32xf32> to vector<16xf32>
    %301 = vector.shape_cast %300 : vector<16xf32> to vector<16x1xf32>
    %cst_112 = arith.constant 3.200000e+01 : f32
    %302 = vector.broadcast %cst_112 : f32 to vector<16x1xf32>
    %303 = arith.divf %301, %302 : vector<16x1xf32>
    %304 = vector.broadcast %303 : vector<16x1xf32> to vector<16x32xf32>
    %305 = arith.subf %299, %304 : vector<16x32xf32>
    %306 = arith.mulf %305, %305 : vector<16x32xf32>
    %cst_113 = arith.constant dense<0.000000e+00> : vector<16xf32>
    %307 = vector.multi_reduction <add>, %306, %cst_113 [1] : vector<16x32xf32> to vector<16xf32>
    %308 = vector.shape_cast %307 : vector<16xf32> to vector<16x1xf32>
    %cst_114 = arith.constant 3.200000e+01 : f32
    %309 = vector.broadcast %cst_114 : f32 to vector<16x1xf32>
    %310 = arith.divf %308, %309 : vector<16x1xf32>
    %cst_115 = arith.constant 9.99999974E-6 : f32
    %311 = vector.broadcast %cst_115 : f32 to vector<16x1xf32>
    %312 = arith.addf %310, %311 : vector<16x1xf32>
    %313 = math.rsqrt %312 : vector<16x1xf32>
    %314 = vector.broadcast %313 : vector<16x1xf32> to vector<16x32xf32>
    %315 = arith.mulf %305, %314 : vector<16x32xf32>
    %c0_116 = arith.constant 0 : index
    %c0_117 = arith.constant 0 : index
    %316 = vector.load %arg15[%c0_116, %c0_117] : memref<1x32xf32, #tpu.memory_space<vmem>>, vector<1x32xf32>
    %317 = vector.broadcast %316 : vector<1x32xf32> to vector<16x32xf32>
    %318 = arith.mulf %315, %317 : vector<16x32xf32>
    %c0_118 = arith.constant 0 : index
    %c0_119 = arith.constant 0 : index
    %319 = vector.load %arg14[%c0_118, %c0_119] : memref<1x32xf32, #tpu.memory_space<vmem>>, vector<1x32xf32>
    %320 = vector.broadcast %319 : vector<1x32xf32> to vector<16x32xf32>
    %321 = arith.addf %318, %320 : vector<16x32xf32>
    %c0_120 = arith.constant 0 : index
    %c0_121 = arith.constant 0 : index
    %322 = vector.load %arg9[%c0_120, %c0_121] : memref<32x32xf32, #tpu.memory_space<vmem>>, vector<32x32xf32>
    %cst_122 = arith.constant dense<0.000000e+00> : vector<16x32xf32>
    %323 = tpu.matmul %321, %322, %cst_122 {dimension_numbers = #tpu.dot_dimension_numbers<[1], [0], [0], [1], [0, 0, 1, 1], [], []>} : vector<16x32xf32>, vector<32x32xf32>, vector<16x32xf32> -> vector<16x32xf32>
    %c0_123 = arith.constant 0 : index
    %c0_124 = arith.constant 0 : index
    %324 = vector.load %arg6[%c0_123, %c0_124] : memref<1x32xf32, #tpu.memory_space<vmem>>, vector<1x32xf32>
    %325 = vector.broadcast %324 : vector<1x32xf32> to vector<16x32xf32>
    %326 = arith.addf %323, %325 : vector<16x32xf32>
    %c0_125 = arith.constant 0 : index
    %c0_126 = arith.constant 0 : index
    %327 = vector.load %arg7[%c0_125, %c0_126] : memref<32x64xf32, #tpu.memory_space<vmem>>, vector<32x64xf32>
    %cst_127 = arith.constant dense<0.000000e+00> : vector<16x64xf32>
    %328 = tpu.matmul %162, %327, %cst_127 {dimension_numbers = #tpu.dot_dimension_numbers<[1], [0], [0], [1], [0, 0, 1, 1], [], []>} : vector<16x32xf32>, vector<32x64xf32>, vector<16x64xf32> -> vector<16x64xf32>
    %c0_128 = arith.constant 0 : index
    %c0_129 = arith.constant 0 : index
    %329 = vector.load %arg4[%c0_128, %c0_129] : memref<1x64xf32, #tpu.memory_space<vmem>>, vector<1x64xf32>
    %330 = vector.broadcast %329 : vector<1x64xf32> to vector<16x64xf32>
    %331 = arith.addf %328, %330 : vector<16x64xf32>
    %332 = vector.shape_cast %326 : vector<16x32xf32> to vector<2x8x32xf32>
    %333 = vector.extract_strided_slice %331 {offsets = [0, 0], sizes = [16, 32], strides = [1, 1]} : vector<16x64xf32> to vector<16x32xf32>
    %334 = vector.shape_cast %333 : vector<16x32xf32> to vector<2x8x32xf32>
    %335 = vector.extract_strided_slice %331 {offsets = [0, 32], sizes = [16, 32], strides = [1, 1]} : vector<16x64xf32> to vector<16x32xf32>
    %336 = vector.shape_cast %335 : vector<16x32xf32> to vector<2x8x32xf32>
    %337 = vector.extract_strided_slice %332 {offsets = [0, 0, 0], sizes = [2, 8, 8], strides = [1, 1, 1]} : vector<2x8x32xf32> to vector<2x8x8xf32>
    %338 = vector.extract_strided_slice %332 {offsets = [0, 0, 8], sizes = [2, 8, 8], strides = [1, 1, 1]} : vector<2x8x32xf32> to vector<2x8x8xf32>
    %339 = vector.extract_strided_slice %332 {offsets = [0, 0, 16], sizes = [2, 8, 8], strides = [1, 1, 1]} : vector<2x8x32xf32> to vector<2x8x8xf32>
    %340 = vector.extract_strided_slice %332 {offsets = [0, 0, 24], sizes = [2, 8, 8], strides = [1, 1, 1]} : vector<2x8x32xf32> to vector<2x8x8xf32>
    %341 = tpu.concatenate %337, %338, %339, %340 in 0 : vector<2x8x8xf32>, vector<2x8x8xf32>, vector<2x8x8xf32>, vector<2x8x8xf32> -> vector<8x8x8xf32>
    %342 = vector.extract_strided_slice %334 {offsets = [0, 0, 0], sizes = [2, 8, 8], strides = [1, 1, 1]} : vector<2x8x32xf32> to vector<2x8x8xf32>
    %343 = vector.extract_strided_slice %334 {offsets = [0, 0, 8], sizes = [2, 8, 8], strides = [1, 1, 1]} : vector<2x8x32xf32> to vector<2x8x8xf32>
    %344 = vector.extract_strided_slice %334 {offsets = [0, 0, 16], sizes = [2, 8, 8], strides = [1, 1, 1]} : vector<2x8x32xf32> to vector<2x8x8xf32>
    %345 = vector.extract_strided_slice %334 {offsets = [0, 0, 24], sizes = [2, 8, 8], strides = [1, 1, 1]} : vector<2x8x32xf32> to vector<2x8x8xf32>
    %346 = tpu.concatenate %342, %343, %344, %345 in 0 : vector<2x8x8xf32>, vector<2x8x8xf32>, vector<2x8x8xf32>, vector<2x8x8xf32> -> vector<8x8x8xf32>
    %347 = vector.extract_strided_slice %336 {offsets = [0, 0, 0], sizes = [2, 8, 8], strides = [1, 1, 1]} : vector<2x8x32xf32> to vector<2x8x8xf32>
    %348 = vector.extract_strided_slice %336 {offsets = [0, 0, 8], sizes = [2, 8, 8], strides = [1, 1, 1]} : vector<2x8x32xf32> to vector<2x8x8xf32>
    %349 = vector.extract_strided_slice %336 {offsets = [0, 0, 16], sizes = [2, 8, 8], strides = [1, 1, 1]} : vector<2x8x32xf32> to vector<2x8x8xf32>
    %350 = vector.extract_strided_slice %336 {offsets = [0, 0, 24], sizes = [2, 8, 8], strides = [1, 1, 1]} : vector<2x8x32xf32> to vector<2x8x8xf32>
    %351 = tpu.concatenate %347, %348, %349, %350 in 0 : vector<2x8x8xf32>, vector<2x8x8xf32>, vector<2x8x8xf32>, vector<2x8x8xf32> -> vector<8x8x8xf32>
    %cst_130 = arith.constant dense<0.000000e+00> : vector<8x8x8xf32>
    %352 = tpu.matmul %341, %346, %cst_130 {dimension_numbers = #tpu.dot_dimension_numbers<[2], [2], [1], [1], [0, 0, 0, 1, 1, 1], [0], [0]>} : vector<8x8x8xf32>, vector<8x8x8xf32>, vector<8x8x8xf32> -> vector<8x8x8xf32>
    %cst_131 = arith.constant 0.353553385 : f32
    %353 = vector.broadcast %cst_131 : f32 to vector<8x8x8xf32>
    %354 = arith.mulf %352, %353 : vector<8x8x8xf32>
    %355 = vector.broadcast %0 : vector<8x1x8xf32> to vector<8x8x8xf32>
    %356 = arith.addf %354, %355 : vector<8x8x8xf32>
    %cst_132 = arith.constant dense<0xFF800000> : vector<8x8xf32>
    %357 = vector.multi_reduction <maximumf>, %356, %cst_132 [2] : vector<8x8x8xf32> to vector<8x8xf32>
    %358 = vector.shape_cast %357 : vector<8x8xf32> to vector<8x8x1xf32>
    %359 = vector.broadcast %358 : vector<8x8x1xf32> to vector<8x8x8xf32>
    %360 = arith.subf %356, %359 : vector<8x8x8xf32>
    %361 = math.exp %360 : vector<8x8x8xf32>
    %cst_133 = arith.constant dense<0.000000e+00> : vector<8x8xf32>
    %362 = vector.multi_reduction <add>, %361, %cst_133 [2] : vector<8x8x8xf32> to vector<8x8xf32>
    %363 = vector.shape_cast %362 : vector<8x8xf32> to vector<8x8x1xf32>
    %364 = tpu.reciprocal %363 {approx = true} : vector<8x8x1xf32> -> vector<8x8x1xf32>
    %365 = vector.broadcast %364 : vector<8x8x1xf32> to vector<8x8x8xf32>
    %366 = arith.mulf %361, %365 : vector<8x8x8xf32>
    %cst_134 = arith.constant dense<0.000000e+00> : vector<8x8x8xf32>
    %367 = tpu.matmul %366, %351, %cst_134 {dimension_numbers = #tpu.dot_dimension_numbers<[2], [1], [1], [2], [0, 0, 0, 1, 1, 2], [0], [0]>} : vector<8x8x8xf32>, vector<8x8x8xf32>, vector<8x8x8xf32> -> vector<8x8x8xf32>
    %368 = vector.extract_strided_slice %367 {offsets = [0, 0, 0], sizes = [1, 8, 8], strides = [1, 1, 1]} : vector<8x8x8xf32> to vector<1x8x8xf32>
    %369 = vector.shape_cast %368 : vector<1x8x8xf32> to vector<8x8xf32>
    %370 = vector.extract_strided_slice %367 {offsets = [2, 0, 0], sizes = [1, 8, 8], strides = [1, 1, 1]} : vector<8x8x8xf32> to vector<1x8x8xf32>
    %371 = vector.shape_cast %370 : vector<1x8x8xf32> to vector<8x8xf32>
    %372 = vector.extract_strided_slice %367 {offsets = [4, 0, 0], sizes = [1, 8, 8], strides = [1, 1, 1]} : vector<8x8x8xf32> to vector<1x8x8xf32>
    %373 = vector.shape_cast %372 : vector<1x8x8xf32> to vector<8x8xf32>
    %374 = vector.extract_strided_slice %367 {offsets = [6, 0, 0], sizes = [1, 8, 8], strides = [1, 1, 1]} : vector<8x8x8xf32> to vector<1x8x8xf32>
    %375 = vector.shape_cast %374 : vector<1x8x8xf32> to vector<8x8xf32>
    %376 = tpu.concatenate %369, %371, %373, %375 in 1 : vector<8x8xf32>, vector<8x8xf32>, vector<8x8xf32>, vector<8x8xf32> -> vector<8x32xf32>
    %377 = vector.extract_strided_slice %367 {offsets = [1, 0, 0], sizes = [1, 8, 8], strides = [1, 1, 1]} : vector<8x8x8xf32> to vector<1x8x8xf32>
    %378 = vector.shape_cast %377 : vector<1x8x8xf32> to vector<8x8xf32>
    %379 = vector.extract_strided_slice %367 {offsets = [3, 0, 0], sizes = [1, 8, 8], strides = [1, 1, 1]} : vector<8x8x8xf32> to vector<1x8x8xf32>
    %380 = vector.shape_cast %379 : vector<1x8x8xf32> to vector<8x8xf32>
    %381 = vector.extract_strided_slice %367 {offsets = [5, 0, 0], sizes = [1, 8, 8], strides = [1, 1, 1]} : vector<8x8x8xf32> to vector<1x8x8xf32>
    %382 = vector.shape_cast %381 : vector<1x8x8xf32> to vector<8x8xf32>
    %383 = vector.extract_strided_slice %367 {offsets = [7, 0, 0], sizes = [1, 8, 8], strides = [1, 1, 1]} : vector<8x8x8xf32> to vector<1x8x8xf32>
    %384 = vector.shape_cast %383 : vector<1x8x8xf32> to vector<8x8xf32>
    %385 = tpu.concatenate %378, %380, %382, %384 in 1 : vector<8x8xf32>, vector<8x8xf32>, vector<8x8xf32>, vector<8x8xf32> -> vector<8x32xf32>
    %386 = tpu.concatenate %376, %385 in 0 : vector<8x32xf32>, vector<8x32xf32> -> vector<16x32xf32>
    %c0_135 = arith.constant 0 : index
    %c0_136 = arith.constant 0 : index
    %387 = vector.load %arg8[%c0_135, %c0_136] : memref<32x32xf32, #tpu.memory_space<vmem>>, vector<32x32xf32>
    %cst_137 = arith.constant dense<0.000000e+00> : vector<16x32xf32>
    %388 = tpu.matmul %386, %387, %cst_137 {dimension_numbers = #tpu.dot_dimension_numbers<[1], [0], [0], [1], [0, 0, 1, 1], [], []>} : vector<16x32xf32>, vector<32x32xf32>, vector<16x32xf32> -> vector<16x32xf32>
    %c0_138 = arith.constant 0 : index
    %c0_139 = arith.constant 0 : index
    %389 = vector.load %arg5[%c0_138, %c0_139] : memref<1x32xf32, #tpu.memory_space<vmem>>, vector<1x32xf32>
    %390 = vector.broadcast %389 : vector<1x32xf32> to vector<16x32xf32>
    %391 = arith.addf %388, %390 : vector<16x32xf32>
    %392 = arith.addf %321, %391 : vector<16x32xf32>
    %cst_140 = arith.constant dense<0.000000e+00> : vector<16xf32>
    %393 = vector.multi_reduction <add>, %392, %cst_140 [1] : vector<16x32xf32> to vector<16xf32>
    %394 = vector.shape_cast %393 : vector<16xf32> to vector<16x1xf32>
    %cst_141 = arith.constant 3.200000e+01 : f32
    %395 = vector.broadcast %cst_141 : f32 to vector<16x1xf32>
    %396 = arith.divf %394, %395 : vector<16x1xf32>
    %397 = vector.broadcast %396 : vector<16x1xf32> to vector<16x32xf32>
    %398 = arith.subf %392, %397 : vector<16x32xf32>
    %399 = arith.mulf %398, %398 : vector<16x32xf32>
    %cst_142 = arith.constant dense<0.000000e+00> : vector<16xf32>
    %400 = vector.multi_reduction <add>, %399, %cst_142 [1] : vector<16x32xf32> to vector<16xf32>
    %401 = vector.shape_cast %400 : vector<16xf32> to vector<16x1xf32>
    %cst_143 = arith.constant 3.200000e+01 : f32
    %402 = vector.broadcast %cst_143 : f32 to vector<16x1xf32>
    %403 = arith.divf %401, %402 : vector<16x1xf32>
    %cst_144 = arith.constant 9.99999974E-6 : f32
    %404 = vector.broadcast %cst_144 : f32 to vector<16x1xf32>
    %405 = arith.addf %403, %404 : vector<16x1xf32>
    %406 = math.rsqrt %405 : vector<16x1xf32>
    %407 = vector.broadcast %406 : vector<16x1xf32> to vector<16x32xf32>
    %408 = arith.mulf %398, %407 : vector<16x32xf32>
    %c0_145 = arith.constant 0 : index
    %c0_146 = arith.constant 0 : index
    %409 = vector.load %arg17[%c0_145, %c0_146] : memref<1x32xf32, #tpu.memory_space<vmem>>, vector<1x32xf32>
    %410 = vector.broadcast %409 : vector<1x32xf32> to vector<16x32xf32>
    %411 = arith.mulf %408, %410 : vector<16x32xf32>
    %c0_147 = arith.constant 0 : index
    %c0_148 = arith.constant 0 : index
    %412 = vector.load %arg16[%c0_147, %c0_148] : memref<1x32xf32, #tpu.memory_space<vmem>>, vector<1x32xf32>
    %413 = vector.broadcast %412 : vector<1x32xf32> to vector<16x32xf32>
    %414 = arith.addf %411, %413 : vector<16x32xf32>
    %c0_149 = arith.constant 0 : index
    %c0_150 = arith.constant 0 : index
    %415 = vector.load %arg11[%c0_149, %c0_150] : memref<32x64xf32, #tpu.memory_space<vmem>>, vector<32x64xf32>
    %cst_151 = arith.constant dense<0.000000e+00> : vector<16x64xf32>
    %416 = tpu.matmul %414, %415, %cst_151 {dimension_numbers = #tpu.dot_dimension_numbers<[1], [0], [0], [1], [0, 0, 1, 1], [], []>} : vector<16x32xf32>, vector<32x64xf32>, vector<16x64xf32> -> vector<16x64xf32>
    %c0_152 = arith.constant 0 : index
    %c0_153 = arith.constant 0 : index
    %417 = vector.load %arg10[%c0_152, %c0_153] : memref<1x64xf32, #tpu.memory_space<vmem>>, vector<1x64xf32>
    %418 = vector.broadcast %417 : vector<1x64xf32> to vector<16x64xf32>
    %419 = arith.addf %416, %418 : vector<16x64xf32>
    %420 = arith.mulf %419, %419 : vector<16x64xf32>
    %421 = arith.mulf %419, %420 : vector<16x64xf32>
    %cst_154 = arith.constant 4.471500e-02 : f32
    %422 = vector.broadcast %cst_154 : f32 to vector<16x64xf32>
    %423 = arith.mulf %422, %421 : vector<16x64xf32>
    %424 = arith.addf %419, %423 : vector<16x64xf32>
    %cst_155 = arith.constant 0.797884583 : f32
    %425 = vector.broadcast %cst_155 : f32 to vector<16x64xf32>
    %426 = arith.mulf %425, %424 : vector<16x64xf32>
    %427 = math.tanh %426 : vector<16x64xf32>
    %cst_156 = arith.constant 1.000000e+00 : f32
    %428 = vector.broadcast %cst_156 : f32 to vector<16x64xf32>
    %429 = arith.addf %428, %427 : vector<16x64xf32>
    %cst_157 = arith.constant 5.000000e-01 : f32
    %430 = vector.broadcast %cst_157 : f32 to vector<16x64xf32>
    %431 = arith.mulf %430, %429 : vector<16x64xf32>
    %432 = arith.mulf %419, %431 : vector<16x64xf32>
    %c0_158 = arith.constant 0 : index
    %c0_159 = arith.constant 0 : index
    %433 = vector.load %arg13[%c0_158, %c0_159] : memref<64x32xf32, #tpu.memory_space<vmem>>, vector<64x32xf32>
    %cst_160 = arith.constant dense<0.000000e+00> : vector<16x32xf32>
    %434 = tpu.matmul %432, %433, %cst_160 {dimension_numbers = #tpu.dot_dimension_numbers<[1], [0], [0], [1], [0, 0, 1, 1], [], []>} : vector<16x64xf32>, vector<64x32xf32>, vector<16x32xf32> -> vector<16x32xf32>
    %c0_161 = arith.constant 0 : index
    %c0_162 = arith.constant 0 : index
    %435 = vector.load %arg12[%c0_161, %c0_162] : memref<1x32xf32, #tpu.memory_space<vmem>>, vector<1x32xf32>
    %436 = vector.broadcast %435 : vector<1x32xf32> to vector<16x32xf32>
    %437 = arith.addf %434, %436 : vector<16x32xf32>
    %438 = arith.addf %414, %437 : vector<16x32xf32>
    %cst_163 = arith.constant dense<0.000000e+00> : vector<16xf32>
    %439 = vector.multi_reduction <add>, %438, %cst_163 [1] : vector<16x32xf32> to vector<16xf32>
    %440 = vector.shape_cast %439 : vector<16xf32> to vector<16x1xf32>
    %cst_164 = arith.constant 3.200000e+01 : f32
    %441 = vector.broadcast %cst_164 : f32 to vector<16x1xf32>
    %442 = arith.divf %440, %441 : vector<16x1xf32>
    %443 = vector.broadcast %442 : vector<16x1xf32> to vector<16x32xf32>
    %444 = arith.subf %438, %443 : vector<16x32xf32>
    %445 = arith.mulf %444, %444 : vector<16x32xf32>
    %cst_165 = arith.constant dense<0.000000e+00> : vector<16xf32>
    %446 = vector.multi_reduction <add>, %445, %cst_165 [1] : vector<16x32xf32> to vector<16xf32>
    %447 = vector.shape_cast %446 : vector<16xf32> to vector<16x1xf32>
    %cst_166 = arith.constant 3.200000e+01 : f32
    %448 = vector.broadcast %cst_166 : f32 to vector<16x1xf32>
    %449 = arith.divf %447, %448 : vector<16x1xf32>
    %cst_167 = arith.constant 9.99999974E-6 : f32
    %450 = vector.broadcast %cst_167 : f32 to vector<16x1xf32>
    %451 = arith.addf %449, %450 : vector<16x1xf32>
    %452 = math.rsqrt %451 : vector<16x1xf32>
    %453 = vector.broadcast %452 : vector<16x1xf32> to vector<16x32xf32>
    %454 = arith.mulf %444, %453 : vector<16x32xf32>
    %c0_168 = arith.constant 0 : index
    %c0_169 = arith.constant 0 : index
    %455 = vector.load %arg19[%c0_168, %c0_169] : memref<1x32xf32, #tpu.memory_space<vmem>>, vector<1x32xf32>
    %456 = vector.broadcast %455 : vector<1x32xf32> to vector<16x32xf32>
    %457 = arith.mulf %454, %456 : vector<16x32xf32>
    %c0_170 = arith.constant 0 : index
    %c0_171 = arith.constant 0 : index
    %458 = vector.load %arg18[%c0_170, %c0_171] : memref<1x32xf32, #tpu.memory_space<vmem>>, vector<1x32xf32>
    %459 = vector.broadcast %458 : vector<1x32xf32> to vector<16x32xf32>
    %460 = arith.addf %457, %459 : vector<16x32xf32>
    %c0_172 = arith.constant 0 : index
    %c0_173 = arith.constant 0 : index
    %461 = vector.load %arg46[%c0_172, %c0_173] : memref<32x128xf32, #tpu.memory_space<vmem>>, vector<32x128xf32>
    %cst_174 = arith.constant dense<0.000000e+00> : vector<16x128xf32>
    %462 = tpu.matmul %460, %461, %cst_174 {dimension_numbers = #tpu.dot_dimension_numbers<[1], [0], [0], [1], [0, 0, 1, 1], [], []>} : vector<16x32xf32>, vector<32x128xf32>, vector<16x128xf32> -> vector<16x128xf32>
    %c0_175 = arith.constant 0 : index
    %c0_176 = arith.constant 0 : index
    %463 = vector.load %arg45[%c0_175, %c0_176] : memref<1x128xf32, #tpu.memory_space<vmem>>, vector<1x128xf32>
    %464 = vector.broadcast %463 : vector<1x128xf32> to vector<16x128xf32>
    %465 = arith.addf %462, %464 : vector<16x128xf32>
    %c0_177 = arith.constant 0 : index
    %c0_178 = arith.constant 0 : index
    %466 = vector.load %arg47[%c0_177, %c0_178] : memref<16x128xf32, #tpu.memory_space<vmem>>, vector<16x128xf32>
    tpu.vector_store %arg47[%c0_177, %c0_178], %465 {strides = array<i32>} : memref<16x128xf32, #tpu.memory_space<vmem>>, vector<16x128xf32>,
    %c0_179 = arith.constant 0 : index
    %c0_180 = arith.constant 0 : index
    %467 = vector.load %arg44[%c0_179, %c0_180] : memref<10x32xf32, #tpu.memory_space<vmem>>, vector<10x32xf32>
    %c0_181 = arith.constant 0 : index
    %c0_182 = arith.constant 0 : index
    %468 = vector.load %arg3[%c0_181, %c0_182] : memref<5x32xf32, #tpu.memory_space<vmem>>, vector<5x32xf32>
    %cst_183 = arith.constant dense<0.000000e+00> : vector<10x5xf32>
    %469 = tpu.matmul %467, %468, %cst_183 {dimension_numbers = #tpu.dot_dimension_numbers<[1], [1], [0], [0], [0, 0, 1, 0], [], []>} : vector<10x32xf32>, vector<5x32xf32>, vector<10x5xf32> -> vector<10x5xf32>
    %470 = arith.mulf %469, %469 : vector<10x5xf32>
    %471 = vector.shape_cast %470 : vector<10x5xf32> to vector<1x10x5xf32>
    %cst_184 = arith.constant dense<0.000000e+00> : vector<1xf32>
    %472 = vector.multi_reduction <add>, %471, %cst_184 [1, 2] : vector<1x10x5xf32> to vector<1xf32>
    %473 = vector.shape_cast %472 : vector<1xf32> to vector<1x1x1xf32>
    %474 = vector.extract %473[0, 0, 0] : f32 from vector<1x1x1xf32>
    %475 = vector.broadcast %474 : f32 to vector<1x1xf32>
    %c0_185 = arith.constant 0 : index
    %c0_186 = arith.constant 0 : index
    %476 = vector.load %arg48[%c0_185, %c0_186] : memref<1x1xf32, #tpu.memory_space<vmem>>, vector<1x1xf32>
    tpu.vector_store %arg48[%c0_185, %c0_186], %475 {strides = array<i32>} : memref<1x1xf32, #tpu.memory_space<vmem>>, vector<1x1xf32>,
    return
  }
}

</mosaic_0001>

<bundles_post_ra>
// kernel: bart_with_memory_forward.1
= control target key start
LH: loop header
LB: loop body
LE: loop exit
PB: predicated region body
PF: predicated region fallthrough
CT: control target
= control target key end

     0   :  { %s7842_s6 = smov 1   ;;  %s7843_s10 = smov 2   ;;  %s8933_s0 = inlined_call_operand.smem [shape: u32[49], index: -1, kind: input, shape index: {}] }
   0x1   :  { %s7919_s5 = sld [smem:[%s8933_s0]]   ;;  %s7844_s14 = smov 3  }
   0x2   :  { %s7924_s9 = sld [smem:[%s8933_s0 + %s7842_s6]]   ;;  %s7845_s18 = smov 4  }
   0x3   :  { %s7929_s13 = sld [smem:[%s8933_s0 + %s7843_s10]]   ;;  %s7846_s22 = smov 5  }
   0x4   :  { %s7934_s17 = sld [smem:[%s8933_s0 + %s7844_s14]]   ;;  %s7847_s26 = smov 6  }
   0x5   :  { %s7939_s21 = sld [smem:[%s8933_s0 + %s7845_s18]]   ;;  %s7848_s30 = smov 7  }
   0x6   :  { %s7944_s25 = sld [smem:[%s8933_s0 + %s7846_s22]]   ;;  %s7849_s4 = smov 8  }
   0x7   :  { %s7949_s29 = sld [smem:[%s8933_s0 + %s7847_s26]]   ;;  %s7850_s10 = smov 9  }
   0x8   :  { %8946 = sst [smem:[#allocation26_spill]] %s7924_s9  ;;  %s7851_s15 = smov 10  }
   0x9   :  { %s7954_s3 = sld [smem:[%s8933_s0 + %s7848_s30]]   ;;  %s7852_s20 = smov 11  }
   0xa   :  { %8947 = sst [smem:[#allocation27_spill]] %s7934_s17  ;;  %s7853_s26 = smov 12  }
   0xb   :  { %8948 = sst [smem:[#allocation28_spill]] %s7939_s21  ;;  %s7854_s1 = smov 13  }
   0xc   :  { %8949 = sst [smem:[#allocation29_spill]] %s7944_s25  ;;  %s7855_s7 = smov 14  }
   0xd   :  { %8950 = sst [smem:[#allocation30_spill]] %s7949_s29  ;;  %s7857_s22 = smov 16  }
   0xe   :  { %s7959_s8 = sld [smem:[%s8933_s0 + %s7849_s4]]   ;;  %s7858_s28 = smov 17  }
   0xf   :  { %8951 = sst [smem:[#allocation31_spill]] %s7954_s3 }
  0x10   :  { %s7964_s14 = sld [smem:[%s8933_s0 + %s7850_s10]]  }
  0x11   :  { %s7969_s19 = sld [smem:[%s8933_s0 + %s7851_s15]]   ;;  %s7856_s15 = smov 15  }
  0x12   :  { %s7974_s24 = sld [smem:[%s8933_s0 + %s7852_s20]]  }
  0x13   :  { %s7979_s30 = sld [smem:[%s8933_s0 + %s7853_s26]]  }
  0x14   :  { %8952 = sst [smem:[#allocation32_spill]] %s7959_s8 }
  0x15   :  { %s7984_s6 = sld [smem:[%s8933_s0 + %s7854_s1]]  }
  0x16   :  { %8953 = sst [smem:[#allocation33_spill]] %s7964_s14 }
  0x17   :  { %8954 = sst [smem:[#allocation34_spill]] %s7969_s19 }
  0x18   :  { %8955 = sst [smem:[#allocation35_spill]] %s7974_s24 }
  0x19   :  { %8956 = sst [smem:[#allocation36_spill]] %s7979_s30 }
  0x1a   :  { %s7989_s12 = sld [smem:[%s8933_s0 + %s7855_s7]]   ;;  %s7859_s7 = smov 18  }
  0x1b   :  { %8957 = sst [smem:[#allocation37_spill]] %s7984_s6 }
  0x1c   :  { %s7994_s20 = sld [smem:[%s8933_s0 + %s7856_s15]]   ;;  %s7860_s15 = smov 19  }
  0x1d   :  { %s7999_s27 = sld [smem:[%s8933_s0 + %s7857_s22]]   ;;  %s7861_s22 = smov 20  }
  0x1e   :  { %s8004_s4 = sld [smem:[%s8933_s0 + %s7858_s28]]   ;;  %s7862_s28 = smov 21  }
  0x1f   :  { %s8009_s30 = sld [smem:[%s8933_s0 + %s7859_s7]]   ;;  %s7863_s7 = smov 22  }
  0x20   :  { %8958 = sst [smem:[#allocation38_spill]] %s7989_s12 }
  0x21   :  { %s8014_s19 = sld [smem:[%s8933_s0 + %s7860_s15]]   ;;  %s7864_s15 = smov 23  }
  0x22   :  { %8959 = sst [smem:[#allocation39_spill]] %s7994_s20 }
  0x23   :  { %8960 = sst [smem:[#allocation40_spill]] %s7999_s27 }
  0x24   :  { %8961 = sst [smem:[#allocation41_spill]] %s8004_s4 }
  0x25   :  { %8962 = sst [smem:[#allocation42_spill]] %s8009_s30 }
  0x26   :  { %s8019_s6 = sld [smem:[%s8933_s0 + %s7861_s22]]   ;;  %s7865_s22 = smov 24  }
  0x27   :  { %8963 = sst [smem:[#allocation43_spill]] %s8014_s19 }
  0x28   :  { %s8024_s27 = sld [smem:[%s8933_s0 + %s7862_s28]]   ;;  %s7866_s28 = smov 25  }
  0x29   :  { %s8029_s30 = sld [smem:[%s8933_s0 + %s7863_s7]]   ;;  %s7867_s7 = smov 26  }
  0x2a   :  { %s8034_s19 = sld [smem:[%s8933_s0 + %s7864_s15]]   ;;  %s7868_s15 = smov 27  }
  0x2b   :  { %s8039_s4 = sld [smem:[%s8933_s0 + %s7865_s22]]   ;;  %s7869_s22 = smov 28  }
  0x2c   :  { %8964 = sst [smem:[#allocation44_spill]] %s8019_s6 }
  0x2d   :  { %s8044_s24 = sld [smem:[%s8933_s0 + %s7866_s28]]   ;;  %s7870_s28 = smov 29  }
  0x2e   :  { %8965 = sst [smem:[#allocation45_spill]] %s8024_s27 }
  0x2f   :  { %8966 = sst [smem:[#allocation46_spill]] %s8029_s30 }
  0x30   :  { %8967 = sst [smem:[#allocation47_spill]] %s8034_s19 }
  0x31   :  { %8968 = sst [smem:[#allocation48_spill]] %s8039_s4 }
  0x32   :  { %s8049_s25 = sld [smem:[%s8933_s0 + %s7867_s7]]   ;;  %s7871_s7 = smov 30  }
  0x33   :  { %8969 = sst [smem:[#allocation49_spill]] %s8044_s24 }
  0x34   :  { %s8054_s8 = sld [smem:[%s8933_s0 + %s7868_s15]]   ;;  %s7872_s15 = smov 31  }
  0x35   :  { %s8059_s29 = sld [smem:[%s8933_s0 + %s7869_s22]]   ;;  %s7873_s22 = smov 32  }
  0x36   :  { %s8064_s12 = sld [smem:[%s8933_s0 + %s7870_s28]]   ;;  %s7874_s28 = smov 33  }
  0x37   :  { %s8069_s20 = sld [smem:[%s8933_s0 + %s7871_s7]]   ;;  %s7875_s7 = smov 34  }
  0x38   :  { %8970 = sst [smem:[#allocation50_spill]] %s8049_s25 }
  0x39   :  { %s8074_s14 = sld [smem:[%s8933_s0 + %s7872_s15]]   ;;  %s7876_s15 = smov 35  }
  0x3a   :  { %8971 = sst [smem:[#allocation51_spill]] %s8054_s8 }
  0x3b   :  { %8972 = sst [smem:[#allocation52_spill]] %s8059_s29 }
  0x3c   :  { %s8079_s21 = sld [smem:[%s8933_s0 + %s7873_s22]]   ;;  %s7877_s22 = smov 36  }
  0x3d   :  { %8973 = sst [smem:[#allocation53_spill]] %s8069_s20 }
  0x3e   :  { %s8084_s27 = sld [smem:[%s8933_s0 + %s7874_s28]]   ;;  %s7878_s28 = smov 37  }
  0x3f   :  { %8974 = sst [smem:[#allocation54_spill]] %s8074_s14 }
  0x40   :  { %s8089_s3 = sld [smem:[%s8933_s0 + %s7875_s7]]   ;;  %s7879_s7 = smov 38  }
  0x41   :  { %s8094_s4 = sld [smem:[%s8933_s0 + %s7876_s15]]   ;;  %s7880_s15 = smov 39  }
  0x42   :  { %8975 = sst [smem:[#allocation55_spill]] %s8079_s21 }
  0x43   :  { %s8099_s30 = sld [smem:[%s8933_s0 + %s7877_s22]]   ;;  %s7881_s22 = smov 40  }
  0x44   :  { %s8104_s6 = sld [smem:[%s8933_s0 + %s7878_s28]]   ;;  %s7882_s28 = smov 41  }
  0x45   :  { %s8109_s25 = sld [smem:[%s8933_s0 + %s7879_s7]]   ;;  %s7883_s7 = smov 42  }
  0x46   :  { %s8114_s8 = sld [smem:[%s8933_s0 + %s7880_s15]]   ;;  %s7884_s15 = smov 43  }
  0x47   :  { %s8119_s19 = sld [smem:[%s8933_s0 + %s7881_s22]]   ;;  %s7885_s22 = smov 44  }
  0x48   :  { %s8124_s24 = sld [smem:[%s8933_s0 + %s7882_s28]]   ;;  %s7886_s28 = smov 45  }
  0x49   :  { %s8129_s9 = sld [smem:[%s8933_s0 + %s7883_s7]]   ;;  %s7887_s7 = smov 46  }
  0x4a   :  { %s8134_s17 = sld [smem:[%s8933_s0 + %s7884_s15]]   ;;  %s7888_s15 = smov 47  }
  0x4b   :  { %s8139_s20 = sld [smem:[%s8933_s0 + %s7885_s22]]   ;;  %s7889_s22 = smov 48  }
  0x4c   :  { %s8144_s29 = sld [smem:[%s8933_s0 + %s7886_s28]]  }
  0x4d   :  { %s8149_s14 = sld [smem:[%s8933_s0 + %s7887_s7]]  }
  0x4e   :  { %s8154_s21 = sld [smem:[%s8933_s0 + %s7888_s15]]  }
  0x51   :  { %8976 = sst [smem:[#allocation56_spill]] %s8139_s20 }
  0x52   :  { %s8159_s20 = sld [smem:[%s8933_s0 + %s7889_s22]]  }
  0x53   :  { %103 = vsyncpa [#allocation3], 0 }
  0x54   :  { %104 = vsyncpa [#allocation6], 0 }
  0x55   :  { %105 = vsyncpa [#allocation9], 0 }
  0x56   :  { %106 = vsyncpa [#allocation12], 0 }
  0x57   :  { %107 = vsyncpa [#allocation15], 0 }
  0x58   :  { %108 = vsyncpa [#allocation4], 0 }
  0x59   :  { %109 = vsyncpa [#allocation18], 0  ;;  %s7890_s28 = smov [#allocation5]   ;;  %s7891_s2 = smov [#allocation8]  }
  0x5a   :  { %s194_s1 = sshll.u32 %s7890_s28, 4  ;;  %s214_s7 = sshll.u32 %s7891_s2, 4  ;;  %s195_s1 = int_to_ptr.vmem [resolvable:$true] %s194_s1  ;;  %s215_s7 = int_to_ptr.vmem [resolvable:$true] %s214_s7 }
  0x5b   :  { %s7636_s10 = scalar_lea.vmem %s195_s1, 16  ;;  %s7640_s11 = scalar_lea.vmem %s195_s1, 32 }
  0x5c   :  { %p7637_p0 = scmp.ne.s32.totalorder %s195_s1, %s7636_s10  ;;  %p7641_p1 = scmp.lt.s32.totalorder %s195_s1, %s195_s1 }
  0x5d   :  { %p7642_p2 = scmp.lt.s32.totalorder %s7640_s11, %s7636_s10 }
  0x5f   :  { %p7643_p3 = por %p7642_p2, %p7641_p1 }
  0x61   :  { %p7644_p4 = pnand %p7643_p3, %p7637_p0 }
  0x63   :  { %7647 = shalt.err (!%p7644_p4)
}
  0x64   :  { %197 = dma.hbm_to_vmem [thread:$0]  %s8094_s4, 16, %s195_s1, [#allocation6]  }
  0x65   :  { %s7656_s0 = scalar_lea.vmem %s215_s7, 16  ;;  %s7660_s15 = scalar_lea.vmem %s215_s7, 32 }
  0x66   :  { %p7657_p5 = scmp.ne.s32.totalorder %s215_s7, %s7656_s0  ;;  %p7661_p6 = scmp.lt.s32.totalorder %s215_s7, %s215_s7 }
  0x67   :  { %p7662_p7 = scmp.lt.s32.totalorder %s7660_s15, %s7656_s0 }
  0x69   :  { %p7663_p8 = por %p7662_p7, %p7661_p6 }
  0x6b   :  { %p7664_p9 = pnand %p7663_p8, %p7657_p5 }
  0x6d   :  { %7667 = shalt.err (!%p7664_p9)
}
  0x6e   :  { %217 = dma.hbm_to_vmem [thread:$0]  %s8104_s6, 16, %s215_s7, [#allocation9]  }
  0x6f   :  { %s7892_s16 = smov [#allocation11]   ;;  %s7893_s22 = smov [#allocation2]  }
  0x70   :  { %s240_s18 = sshll.u32 %s7892_s16, 4  ;;  %s184_s23 = sshll.u32 %s7893_s22, 4  ;;  %s241_s18 = int_to_ptr.vmem [resolvable:$true] %s240_s18  ;;  %s185_s23 = int_to_ptr.vmem [resolvable:$true] %s184_s23 }
  0x71   :  { %s7676_s26 = scalar_lea.vmem %s241_s18, 16  ;;  %s7680_s28 = scalar_lea.vmem %s241_s18, 32 }
  0x72   :  { %p7677_p10 = scmp.ne.s32.totalorder %s241_s18, %s7676_s26  ;;  %p7681_p11 = scmp.lt.s32.totalorder %s241_s18, %s241_s18 }
  0x73   :  { %p7682_p12 = scmp.lt.s32.totalorder %s7680_s28, %s7676_s26 }
  0x75   :  { %p7683_p13 = por %p7682_p12, %p7681_p11 }
  0x77   :  { %p7684_p0 = pnand %p7683_p13, %p7677_p10 }
  0x79   :  { %7687 = shalt.err (!%p7684_p0)
}
  0x7a   :  { %243 = dma.hbm_to_vmem [thread:$0]  %s8129_s9, 16, %s241_s18, [#allocation12]  }
  0x7b   :  { %s7696_s4 = scalar_lea.vmem %s185_s23, 16  ;;  %s7700_s1 = scalar_lea.vmem %s185_s23, 32 }
  0x7c   :  { %p7697_p1 = scmp.ne.s32.totalorder %s185_s23, %s7696_s4  ;;  %p7701_p2 = scmp.lt.s32.totalorder %s185_s23, %s185_s23 }
  0x7d   :  { %p7702_p3 = scmp.lt.s32.totalorder %s7700_s1, %s7696_s4 }
  0x7f   :  { %p7703_p4 = por %p7702_p3, %p7701_p2 }
  0x81   :  { %p7704_p5 = pnand %p7703_p4, %p7697_p1 }
  0x83   :  { %7707 = shalt.err (!%p7704_p5)
}
  0x84   :  { %187 = dma.hbm_to_vmem [thread:$0]  %s8089_s3, 16, %s185_s23, [#allocation3]  }
  0x85   :  { %s7894_s6 = smov [#allocation7]   ;;  %s7895_s7 = smov [#allocation10]  }
  0x86   :  { %s204_s2 = sshll.u32 %s7894_s6, 4  ;;  %s224_s10 = sshll.u32 %s7895_s7, 4  ;;  %s205_s2 = int_to_ptr.vmem [resolvable:$true] %s204_s2  ;;  %s225_s10 = int_to_ptr.vmem [resolvable:$true] %s224_s10 }
  0x87   :  { %s7716_s11 = scalar_lea.vmem %s205_s2, 16  ;;  %s7720_s0 = scalar_lea.vmem %s205_s2, 32 }
  0x88   :  { %p7717_p6 = scmp.ne.s32.totalorder %s205_s2, %s7716_s11  ;;  %p7721_p7 = scmp.lt.s32.totalorder %s205_s2, %s205_s2 }
  0x89   :  { %p7722_p8 = scmp.lt.s32.totalorder %s7720_s0, %s7716_s11 }
  0x8b   :  { %p7723_p9 = por %p7722_p8, %p7721_p7 }
  0x8d   :  { %p7724_p10 = pnand %p7723_p9, %p7717_p6 }
  0x8f   :  { %7727 = shalt.err (!%p7724_p10)
}
  0x90   :  { %207 = dma.hbm_to_vmem [thread:$0]  %s8099_s30, 16, %s205_s2, [#allocation6]  }
  0x91   :  { %s7736_s9 = scalar_lea.vmem %s225_s10, 16  ;;  %s7740_s15 = scalar_lea.vmem %s225_s10, 32 }
  0x92   :  { %p7737_p11 = scmp.ne.s32.totalorder %s225_s10, %s7736_s9  ;;  %p7741_p12 = scmp.lt.s32.totalorder %s225_s10, %s225_s10 }
  0x93   :  { %p7742_p13 = scmp.lt.s32.totalorder %s7740_s15, %s7736_s9 }
  0x95   :  { %p7743_p0 = por %p7742_p13, %p7741_p12 }
  0x97   :  { %p7744_p1 = pnand %p7743_p0, %p7737_p11 }
  0x99   :  { %7747 = shalt.err (!%p7744_p1)
}
  0x9a   :  { %227 = dma.hbm_to_vmem [thread:$0]  %s8109_s25, 16, %s225_s10, [#allocation9]  }
  0x9b   :  { %s7896_s3 = smov [#allocation13]   ;;  %s7897_s18 = smov [#allocation14]  }
  0x9c   :  { %s250_s16 = sshll.u32 %s7896_s3, 4  ;;  %s262_s22 = sshll.u32 %s7897_s18, 4  ;;  %s251_s16 = int_to_ptr.vmem [resolvable:$true] %s250_s16  ;;  %s263_s22 = int_to_ptr.vmem [resolvable:$true] %s262_s22 }
  0x9d   :  { %s7756_s23 = scalar_lea.vmem %s251_s16, 16  ;;  %s7760_s26 = scalar_lea.vmem %s251_s16, 32 }
  0x9e   :  { %p7757_p2 = scmp.ne.s32.totalorder %s251_s16, %s7756_s23  ;;  %p7761_p3 = scmp.lt.s32.totalorder %s251_s16, %s251_s16 }
  0x9f   :  { %p7762_p4 = scmp.lt.s32.totalorder %s7760_s26, %s7756_s23 }
  0xa1   :  { %p7763_p5 = por %p7762_p4, %p7761_p3 }
  0xa3   :  { %p7764_p6 = pnand %p7763_p5, %p7757_p2 }
  0xa5   :  { %7767 = shalt.err (!%p7764_p6)
}
  0xa6   :  { %253 = dma.hbm_to_vmem [thread:$0]  %s8134_s17, 16, %s251_s16, [#allocation12]  }
  0xa7   :  { %s7776_s30 = scalar_lea.vmem %s263_s22, 16  ;;  %s7780_s28 = scalar_lea.vmem %s263_s22, 32 }
  0xa8   :  { %p7777_p7 = scmp.ne.s32.totalorder %s263_s22, %s7776_s30  ;;  %p7781_p8 = scmp.lt.s32.totalorder %s263_s22, %s263_s22 }
  0xa9   :  { %p7782_p9 = scmp.lt.s32.totalorder %s7780_s28, %s7776_s30 }
  0xab   :  { %p7783_p10 = por %p7782_p9, %p7781_p8 }
  0xad   :  { %p7784_p11 = pnand %p7783_p10, %p7777_p7 }
  0xaf   :  { %7787 = shalt.err (!%p7784_p11)
}
  0xb0   :  { %265 = dma.hbm_to_vmem [thread:$0]  %s8144_s29, 16, %s263_s22, [#allocation15]  }
  0xb1   :  { %7828 = dma.done.wait [#allocation3], 16  }
  0xb2   :  { %7829 = vsyncadd [#allocation3], 4294967280 }
  0xb3   :  { %7830 = dma.done.wait [#allocation6], 32  }
  0xb4   :  { %7831 = vsyncadd [#allocation6], 4294967264 }
  0xb5   :  { %7832 = dma.done.wait [#allocation9], 32  }
  0xb6   :  { %7833 = vsyncadd [#allocation9], 4294967264 }
  0xb7   :  { %7834 = dma.done.wait [#allocation12], 32  }
  0xb8   :  { %7835 = vsyncadd [#allocation12], 4294967264 }
  0xb9   :  { %7836 = dma.done.wait [#allocation15], 16  }
  0xba   :  { %7837 = vsyncadd [#allocation15], 4294967280  ;;  %vm302_vm0 = vcmask 261120   ;;  %v300_v0 = vld [vmem:[%s7919_s5] sm:$0xff]  ;;  %v301_v1 = vld [vmem:[%s7919_s5 + $0x8] sm:$0xff]  ;;  %v7898_v38 = vmov 0.0  }
  0xbb   :  { %v303_v2 = vsel %vm302_vm0, %v300_v0, 0.0  ;;  %v306_v3 = vsel %vm302_vm0, %v301_v1, 0.0  ;;  %v351_v14 = vld [vmem:[%s8124_s24 + $0x18] sm:$0xff]  ;;  %v350_v16 = vld [vmem:[%s8124_s24 + $0x10] sm:$0xff]  ;;  %v349_v18 = vld [vmem:[%s8124_s24 + $0x8] sm:$0xff]  ;;  %vm7899_vm1 = vmmov 0  }
  0xbc   :  { %304 = vadd.xlane.f32.xlu0 %v303_v2  ;;  %v443_v15 = vld [vmem:[%s8114_s8 + $0x18] sm:$0xff]  ;;  %6970 = vmatprep.subr.mxu0 %v351_v14  ;;  %v442_v17 = vld [vmem:[%s8114_s8 + $0x10] sm:$0xff]  ;;  %v441_v19 = vld [vmem:[%s8114_s8 + $0x8] sm:$0xff]  ;;  %vm554_vm2 = vcmask 64512   ;;  %s7900_s5 = smov 120   ;;  %s7901_s17 = smov 112  }
  0xbd   :  { %6981 = vmatprep.subr.mxu1 %v443_v15  ;;  %6971 = vmatpush3.msra.mxu0 %v351_v14  ;;  %v348_v20 = vld [vmem:[%s8124_s24] sm:$0xff]  ;;  %v6621_v29 = vld [vmem:[#allocation13] ss:$0 sm:$0xff]  ;;  %v6622_v31 = vld [vmem:[#allocation11] ss:$0 sm:$0xff]  ;;  %s7902_s25 = smov 104  }
  0xbe   :  { %6982 = vmatpush3.msra.mxu1 %v443_v15  ;;  %6972 = vmatprep.subr.mxu0 %v350_v16  ;;  %v440_v21 = vld [vmem:[%s8114_s8] sm:$0xff]  ;;  %v6623_v42 = vld [vmem:[#allocation10] ss:$0 sm:$0xff]  ;;  %s7903_s29 = smov 96   ;;  %s7904_s8 = smov 8   ;;  %vm1920_vm3 = vcmask 130048  }
  0xbf   :  { %6983 = vmatprep.subr.mxu1 %v442_v17  ;;  %6973 = vmatpush3.msra.mxu0 %v350_v16  ;;  %v6626_v39 = vld [vmem:[#allocation7] ss:$0 sm:$0xff]  ;;  %v6646_v62 = vld [vmem:[%s7929_s13 + $0x1] ss:$0 sm:$0xff]  ;;  %v6645_v2 = vld [vmem:[%s7929_s13] ss:$0 sm:$0xff] }
  0xc0   :  { %307 = vadd.xlane.f32.xlu0 %v306_v3  ;;  %6984 = vmatpush3.msra.mxu1 %v442_v17  ;;  %v6647_v16 = vld [vmem:[%s7929_s13 + $0x2] ss:$0 sm:$0xff]  ;;  %s7905_s24 = smov 16   ;;  %s7906_s4 = smov 24   ;;  %vm1922_vm4 = vcmask 195584   ;;  %vm2202_vm5 = vcmask 523264  }
  0xc1   :  { %6974 = vmatprep.subr.mxu0 %v349_v18  ;;  %6985 = vmatprep.subr.mxu1 %v441_v19  ;;  %s8978_s1 = sld [smem:[#allocation54_spill]]  ;;  %vm2333_vm6 = vcmask 1040384   ;;  %vm2416_vm7 = vcmask 74752   ;;  %vm2502_vm8 = vcmask 33792   ;;  %vm2595_vm9 = vcmask 1041408  }
  0xc2   :  { %6975 = vmatpush3.msra.mxu0 %v349_v18  ;;  %6986 = vmatpush3.msra.mxu1 %v441_v19  ;;  %s8981_s6 = sld [smem:[#allocation56_spill]]  ;;  %vm2518_vm10 = vcmask 1044480   ;;  %vm2591_vm11 = vcmask 80896   ;;  %vm2514_vm12 = vcmask 39936  }
  0xc3   :  { %6976 = vmatprep.subr.mxu0 %v348_v20  ;;  %6987 = vmatprep.subr.mxu1 %v440_v21  ;;  %s8982_s2 = sld [smem:[#allocation27_spill]] }
  0xc4   :  { %6977 = vmatpush3.msra.mxu0 %v348_v20  ;;  %6988 = vmatpush3.msra.mxu1 %v440_v21  ;;  %s8983_s7 = sld [smem:[#allocation26_spill]] }
  0xc5   :  { %6997 = vmatprep.subr.mxu1 %v7898_v38  ;;  %6992 = vmatprep.subr.mxu0 %v7898_v38  ;;  %s8984_s10 = sld [smem:[#allocation49_spill]] }
  0xc6   :  { %s8985_s11 = sld [smem:[#allocation47_spill]] }
  0xc7   :  { %s8986_s0 = sld [smem:[#allocation51_spill]] }
  0xc8   :  { %s8987_s9 = sld [smem:[#allocation50_spill]] }
  0xc9   :  { %s8988_s15 = sld [smem:[#allocation44_spill]] }
  0xca   :  { %s8989_s3 = sld [smem:[#allocation46_spill]] }
  0xcb   :  { %s8990_s16 = sld [smem:[#allocation48_spill]] }
  0xcc   :  { %s8991_s18 = sld [smem:[#allocation31_spill]] }
  0xcd   :  { %s8992_s22 = sld [smem:[#allocation45_spill]] }
  0xce   :  { %s8993_s23 = sld [smem:[#allocation28_spill]] }
  0xcf   :  { %s8994_s26 = sld [smem:[#allocation33_spill]] }
  0xd0   :  { %s8995_s30 = sld [smem:[#allocation39_spill]] }
  0xd1   :  { %s8996_s28 = sld [smem:[#allocation38_spill]] }
 0x145   :  { %v305_v4 = vpop.xlane.xlu0 %304 }
 0x146   :  { %v310_v5 = vmul.f32 0.03125, %v305_v4 }
 0x148   :  { %v312_v6 = vsub.f32 %v300_v0, %v310_v5 }
 0x149   :  { %v308_v7 = vpop.xlane.xlu0 %307 }
 0x14a   :  { %v311_v8 = vmul.f32 0.03125, %v308_v7  ;;  %v314_v9 = vmul.f32 %v312_v6, %v312_v6 }
 0x14c   :  { %v313_v10 = vsub.f32 %v301_v1, %v311_v8  ;;  %v316_v11 = vsel %vm302_vm0, %v314_v9, 0.0 }
 0x14d   :  { %317 = vadd.xlane.f32.xlu1 %v316_v11 }
 0x14e   :  { %v315_v12 = vmul.f32 %v313_v10, %v313_v10 }
 0x150   :  { %v319_v13 = vsel %vm302_vm0, %v315_v12, 0.0 }
 0x151   :  { %320 = vadd.xlane.f32.xlu1 %v319_v13 }
 0x1d6   :  { %v318_v22 = vpop.xlane.xlu1 %317 }
 0x1d7   :  { %v322_v23 = vmul.f32 0.03125, %v318_v22  ;;  %v6650_v22 = vld [vmem:[%s7929_s13 + $0x5] ss:$0 sm:$0xff] }
 0x1d9   :  { %v324_v24 = vadd.f32 1e-05, %v322_v23  ;;  %v6649_v23 = vld [vmem:[%s7929_s13 + $0x4] ss:$0 sm:$0xff] }
 0x1da   :  { %v321_v25 = vpop.xlane.xlu1 %320 }
 0x1db   :  { %7480 = vrsqrt.f32 %v324_v24  ;;  %v323_v26 = vmul.f32 0.03125, %v321_v25 }
 0x1dd   :  { %v325_v27 = vadd.f32 1e-05, %v323_v26 }
 0x1df   :  { %7482 = vrsqrt.f32 %v325_v27 }
 0x1e8   :  { %v7481_v28 = vpop.eup %7480 }
 0x1e9   :  { %v328_v30 = vmul.f32 %v7481_v28, %v312_v6 }
 0x1eb   :  { %v337_v32 = vmul.f32 %v6621_v29, %v328_v30 }
 0x1ec   :  { %v7483_v33 = vpop.eup %7482 }
 0x1ed   :  { %v329_v34 = vmul.f32 %v7483_v33, %v313_v10  ;;  %v8183_v35 = vadd.f32 %v6622_v31, %v337_v32  ;;  %v6648_v10 = vld [vmem:[%s7929_s13 + $0x3] ss:$0 sm:$0xff]  ;;  %v6651_v32 = vld [vmem:[%s7929_s13 + $0x6] ss:$0 sm:$0xff] }
 0x1ef   :  { %v338_v36 = vmul.f32 %v6621_v29, %v329_v34  ;;  %6978 = vmatprep.mubr.msk.f32.mxu0 %vm302_vm0, %v8183_v35  ;;  %6989 = vmatprep.mubr.msk.f32.mxu1 %vm302_vm0, %v8183_v35 }
 0x1f1   :  { %v8189_v37 = vadd.f32 %v6622_v31, %v338_v36 }
 0x1f3   :  { %6979 = vmatmul.mubr.msk.f32.vlgmr.msra.gmra.mxu0 %vm302_vm0, %v8189_v37  ;;  %6990 = vmatmul.mubr.msk.f32.vlgmr.msra.gmra.mxu1 %vm302_vm0, %v8189_v37 }
 0x1f4   :  { %6999 = vmatprep.mubr.msk.f32.mxu1 %vm7899_vm1, %v7898_v38  ;;  %6994 = vmatprep.mubr.msk.f32.mxu0 %vm7899_vm1, %v7898_v38 }
 0x2b3   :  { %v6980_v40 = vpop.f32.mrf.mxu0  ;;  %v6991_v41 = vpop.f32.mrf.mxu1 }
 0x2b4   :  { %v8201_v43 = vadd.f32 %v6991_v41, %v6626_v39  ;;  %v437_v47 = vadd.f32 %v6980_v40, %v6623_v42 }
 0x2b5   :  { %v517_v44 = vpop.f32.mrf.mxu1  ;;  %v431_v45 = vpop.f32.mrf.mxu0 }
 0x2b6   :  { %v8203_v46 = vadd.f32 %v6626_v39, %v517_v44  ;;  %544 = vrot.lane.b32.xlu1 %v8201_v43, %s7900_s5  ;;  %6998 = vmatpush3.xpose.msk.msra.mxu1 %vm554_vm2, %v8201_v43  ;;  %v432_v48 = vadd.f32 %v6623_v42, %v431_v45  ;;  %v6652_v42 = vld [vmem:[%s7929_s13 + $0x7] ss:$0 sm:$0xff] }
 0x2b7   :  { %7007 = vmatprep.subr.mxu1 %v7898_v38 }
 0x2b8   :  { %542 = vrot.lane.b32.xlu0 %v8203_v46, %s7900_s5  ;;  %6993 = vmatpush3.xpose.msk.msra.mxu0 %vm554_vm2, %v8203_v46 }
 0x2b9   :  { %7000 = vmatmul.mubr.msk.f32.vlgmr.msra.gmra.mxu1 %vm554_vm2, %v437_v47  ;;  %7002 = vmatprep.subr.mxu0 %v7898_v38 }
 0x2ba   :  { %530 = vrot.lane.b32.xlu1 %v437_v47, %s7900_s5  ;;  %7009 = vmatprep.mubr.msk.f32.mxu1 %vm7899_vm1, %v7898_v38 }
 0x2bb   :  { %6995 = vmatmul.mubr.msk.f32.vlgmr.msra.gmra.mxu0 %vm554_vm2, %v432_v48 }
 0x2bc   :  { %546 = vrot.lane.b32.xlu0 %v8203_v46, %s7901_s17  ;;  %7004 = vmatprep.mubr.msk.f32.mxu0 %vm7899_vm1, %v7898_v38 }
 0x2be   :  { %548 = vrot.lane.b32.xlu1 %v8201_v43, %s7901_s17 }
 0x2c0   :  { %532 = vrot.lane.b32.xlu0 %v432_v48, %s7901_s17 }
 0x2c2   :  { %528 = vrot.lane.b32.xlu1 %v432_v48, %s7900_s5 }
 0x2c4   :  { %550 = vrot.lane.b32.xlu0 %v8203_v46, %s7902_s25 }
 0x2c6   :  { %534 = vrot.lane.b32.xlu1 %v437_v47, %s7901_s17 }
 0x2c8   :  { %536 = vrot.lane.b32.xlu0 %v432_v48, %s7902_s25 }
 0x2ca   :  { %552 = vrot.lane.b32.xlu1 %v8201_v43, %s7902_s25 }
 0x2ce   :  { %538 = vrot.lane.b32.xlu1 %v437_v47, %s7902_s25 }
 0x328   :  { %v8235_v49 = vpop.permute.xlu1 %544 }
 0x329   :  { %7008 = vmatpush3.xpose.msk.msra.mxu1 %vm554_vm2, %v8235_v49 }
 0x32a   :  { %v8239_v50 = vpop.permute.xlu0 %542  ;;  %7017 = vmatprep.subr.mxu1 %v7898_v38 }
 0x32b   :  { %7003 = vmatpush3.xpose.msk.msra.mxu0 %vm554_vm2, %v8239_v50 }
 0x32c   :  { %v531_v51 = vpop.permute.xlu1 %530  ;;  %7012 = vmatprep.subr.mxu0 %v7898_v38 }
 0x32d   :  { %7010 = vmatmul.mubr.msk.f32.vlgmr.msra.gmra.mxu1 %vm554_vm2, %v531_v51 }
 0x32e   :  { %v8246_v52 = vpop.permute.xlu0 %546  ;;  %7019 = vmatprep.mubr.msk.f32.mxu1 %vm7899_vm1, %v7898_v38 }
 0x330   :  { %v8250_v53 = vpop.permute.xlu1 %548 }
 0x331   :  { %7018 = vmatpush3.xpose.msk.msra.mxu1 %vm554_vm2, %v8250_v53 }
 0x332   :  { %v533_v54 = vpop.permute.xlu0 %532  ;;  %7027 = vmatprep.subr.mxu1 %v7898_v38 }
 0x334   :  { %v529_v55 = vpop.permute.xlu1 %528 }
 0x335   :  { %7005 = vmatmul.mubr.msk.f32.vlgmr.msra.gmra.mxu0 %vm554_vm2, %v529_v55 }
 0x336   :  { %7013 = vmatpush3.xpose.msk.msra.mxu0 %vm554_vm2, %v8246_v52  ;;  %v8258_v56 = vpop.permute.xlu0 %550  ;;  %7014 = vmatprep.mubr.msk.f32.mxu0 %vm7899_vm1, %v7898_v38 }
 0x337   :  { %7022 = vmatprep.subr.mxu0 %v7898_v38 }
 0x338   :  { %v535_v57 = vpop.permute.xlu1 %534 }
 0x339   :  { %7015 = vmatmul.mubr.msk.f32.vlgmr.msra.gmra.mxu0 %vm554_vm2, %v533_v54  ;;  %7020 = vmatmul.mubr.msk.f32.vlgmr.msra.gmra.mxu1 %vm554_vm2, %v535_v57 }
 0x33a   :  { %7023 = vmatpush3.xpose.msk.msra.mxu0 %vm554_vm2, %v8258_v56  ;;  %7024 = vmatprep.mubr.msk.f32.mxu0 %vm7899_vm1, %v7898_v38  ;;  %v537_v58 = vpop.permute.xlu0 %536 }
 0x33b   :  { %7029 = vmatprep.mubr.msk.f32.mxu1 %vm7899_vm1, %v7898_v38  ;;  %7032 = vmatprep.subr.mxu0 %v7898_v38 }
 0x33c   :  { %v8272_v59 = vpop.permute.xlu1 %552 }
 0x33d   :  { %7025 = vmatmul.mubr.msk.f32.vlgmr.msra.gmra.mxu0 %vm554_vm2, %v537_v58  ;;  %7028 = vmatpush3.xpose.msk.msra.mxu1 %vm554_vm2, %v8272_v59 }
 0x33e   :  { %7037 = vmatprep.subr.mxu1 %v7898_v38  ;;  %7034 = vmatprep.mubr.msk.f32.mxu0 %vm7899_vm1, %v7898_v38 }
 0x340   :  { %v539_v60 = vpop.permute.xlu1 %538 }
 0x341   :  { %7030 = vmatmul.mubr.msk.f32.vlgmr.msra.gmra.mxu1 %vm554_vm2, %v539_v60 }
 0x342   :  { %7039 = vmatprep.mubr.msk.f32.mxu1 %vm7899_vm1, %v7898_v38 }
 0x379   :  { %v699_v61 = vpop.f32.mrf.mxu1 }
 0x37a   :  { %v1148_v63 = vmul.f32 0.35355338, %v699_v61 }
 0x37b   :  { %v625_v0 = vpop.f32.mrf.mxu0  ;;  %v7001_v1 = vpop.f32.mrf.mxu1 }
 0x37c   :  { %v1147_v3 = vmul.f32 0.35355338, %v625_v0  ;;  %v1204_v4 = vadd.f32 %v6646_v62, %v1148_v63 }
 0x37d   :  { %v6996_v5 = vpop.f32.mrf.mxu0 }
 0x37e   :  { %v1214_v6 = vsel %vm554_vm2, %v1204_v4, -inf  ;;  %v1203_v7 = vadd.f32 %v6645_v2, %v1147_v3 }
 0x37f   :  { %1215 = vmax.xlane.f32.xlu1 %v1214_v6 }
 0x380   :  { %v1211_v8 = vsel %vm554_vm2, %v1203_v7, -inf }
 0x381   :  { %1212 = vmax.xlane.f32.xlu0 %v1211_v8 }
 0x3ed   :  { %v847_v9 = vpop.f32.mrf.mxu1 }
 0x3ee   :  { %v1150_v11 = vmul.f32 0.35355338, %v847_v9 }
 0x3ef   :  { %v7011_v12 = vpop.f32.mrf.mxu1 }
 0x3f0   :  { %v1206_v13 = vadd.f32 %v6648_v10, %v1150_v11 }
 0x3f2   :  { %v1220_v14 = vsel %vm554_vm2, %v1206_v13, -inf }
 0x3f3   :  { %1221 = vmax.xlane.f32.xlu0 %v1220_v14 }
 0x3f5   :  { %v773_v15 = vpop.f32.mrf.mxu0 }
 0x3f6   :  { %v1149_v17 = vmul.f32 0.35355338, %v773_v15 }
 0x3f7   :  { %v7006_v18 = vpop.f32.mrf.mxu0 }
 0x3f8   :  { %v1205_v19 = vadd.f32 %v6647_v16, %v1149_v17 }
 0x3f9   :  { %v921_v20 = vpop.f32.mrf.mxu0  ;;  %v995_v21 = vpop.f32.mrf.mxu1 }
 0x3fa   :  { %v1151_v24 = vmul.f32 0.35355338, %v921_v20  ;;  %v1152_v25 = vmul.f32 0.35355338, %v995_v21  ;;  %v1217_v26 = vsel %vm554_vm2, %v1205_v19, -inf }
 0x3fb   :  { %v7016_v27 = vpop.f32.mrf.mxu0  ;;  %v7021_v28 = vpop.f32.mrf.mxu1  ;;  %1218 = vmax.xlane.f32.xlu0 %v1217_v26 }
 0x3fc   :  { %v1208_v29 = vadd.f32 %v6650_v22, %v1152_v25  ;;  %v1207_v30 = vadd.f32 %v6649_v23, %v1151_v24 }
 0x3fd   :  { %v1069_v31 = vpop.f32.mrf.mxu0 }
 0x3fe   :  { %v1153_v33 = vmul.f32 0.35355338, %v1069_v31  ;;  %v1226_v34 = vsel %vm554_vm2, %v1208_v29, -inf  ;;  %v1223_v36 = vsel %vm554_vm2, %v1207_v30, -inf }
 0x3ff   :  { %v7026_v39 = vpop.f32.mrf.mxu0  ;;  %1227 = vmax.xlane.f32.xlu1 %v1226_v34  ;;  %1224 = vmax.xlane.f32.xlu0 %v1223_v36 }
 0x400   :  { %v1209_v40 = vadd.f32 %v6651_v32, %v1153_v33 }
 0x401   :  { %v1143_v41 = vpop.f32.mrf.mxu1 }
 0x402   :  { %v1154_v44 = vmul.f32 0.35355338, %v1143_v41  ;;  %v1229_v45 = vsel %vm554_vm2, %v1209_v40, -inf }
 0x403   :  { %v7031_v47 = vpop.f32.mrf.mxu1  ;;  %1230 = vmax.xlane.f32.xlu0 %v1229_v45 }
 0x404   :  { %v1210_v48 = vadd.f32 %v6652_v42, %v1154_v44 }
 0x406   :  { %v1232_v51 = vsel %vm554_vm2, %v1210_v48, -inf }
 0x407   :  { %1233 = vmax.xlane.f32.xlu1 %v1232_v51 }
 0x40a   :  { %v1213_v54 = vpop.xlane.xlu0 %1212 }
 0x40b   :  { %v1235_v55 = vsub.f32 %v1203_v7, %v1213_v54 }
 0x40d   :  { %v1243_v57 = vmul.f32 1.442695, %v1235_v55 }
 0x40f   :  { %7484 = vpow2.f32 %v1243_v57 }
 0x418   :  { %1375 = vrot.lane.b32.xlu1 %v8201_v43, %s7903_s29  ;;  %v1216_v43 = vpop.xlane.xlu1 %1215 }
 0x419   :  { %1299 = vrot.lane.b32.xlu0 %v8203_v46, %s7903_s29  ;;  %v1236_v58 = vsub.f32 %v1204_v4, %v1216_v43 }
 0x41b   :  { %v1245_v60 = vmul.f32 1.442695, %v1236_v58 }
 0x41c   :  { %1451 = vrot.lane.b32.xlu1 %v8239_v50, %s7903_s29  ;;  %v8311_v46 = vpop.eup %7484 }
 0x41d   :  { %1603 = vrot.lane.b32.xlu0 %v8246_v52, %s7903_s29  ;;  %7486 = vpow2.f32 %v1245_v60  ;;  %v1259_v50 = vsel %vm554_vm2, %v8311_v46, 0.0 }
 0x420   :  { %1527 = vrot.lane.b32.xlu1 %v8235_v49, %s7903_s29 }
 0x424   :  { %1679 = vrot.lane.b32.xlu1 %v8250_v53, %s7903_s29 }
 0x42a   :  { %v8315_v52 = vpop.eup %7486 }
 0x42b   :  { %v1262_v49 = vsel %vm554_vm2, %v8315_v52, 0.0 }
 0x43c   :  { %1260 = vadd.xlane.f32.xlu0 %v1259_v50 }
 0x448   :  { %1263 = vadd.xlane.f32.xlu1 %v1262_v49 }
 0x47c   :  { %v1222_v61 = vpop.xlane.xlu0 %1221 }
 0x47d   :  { %v1238_v53 = vsub.f32 %v1206_v13, %v1222_v61 }
 0x47f   :  { %v1249_v62 = vmul.f32 1.442695, %v1238_v53 }
 0x481   :  { %7488 = vpow2.f32 %v1249_v62 }
 0x484   :  { %v1219_v63 = vpop.xlane.xlu0 %1218 }
 0x485   :  { %v1237_v0 = vsub.f32 %v1205_v19, %v1219_v63 }
 0x487   :  { %v1247_v1 = vmul.f32 1.442695, %v1237_v0 }
 0x488   :  { %v1228_v2 = vpop.xlane.xlu1 %1227  ;;  %v1225_v3 = vpop.xlane.xlu0 %1224 }
 0x489   :  { %7490 = vpow2.f32 %v1247_v1  ;;  %v1240_v4 = vsub.f32 %v1208_v29, %v1228_v2  ;;  %v1239_v5 = vsub.f32 %v1207_v30, %v1225_v3  ;;  %v1942_v2 = vld [vmem:[%s8119_s19 + $0x18] sm:$0xff]  ;;  %v1941_v3 = vld [vmem:[%s8119_s19 + $0x10] sm:$0xff] }
 0x48b   :  { %v1253_v6 = vmul.f32 1.442695, %v1240_v4  ;;  %v1251_v7 = vmul.f32 1.442695, %v1239_v5  ;;  %v1940_v5 = vld [vmem:[%s8119_s19 + $0x8] sm:$0xff] }
 0x48c   :  { %v1231_v8 = vpop.xlane.xlu0 %1230 }
 0x48d   :  { %7492 = vpow2.f32 %v1253_v6  ;;  %v1241_v9 = vsub.f32 %v1209_v40, %v1231_v8  ;;  %v1939_v6 = vld [vmem:[%s8119_s19] sm:$0xff]  ;;  %s8977_s19 = sld [smem:[#allocation55_spill]] }
 0x48e   :  { %v7489_v10 = vpop.eup %7488  ;;  %7494 = vpow2.f32 %v1251_v7 }
 0x48f   :  { %v1255_v11 = vmul.f32 1.442695, %v1241_v9  ;;  %v1268_v12 = vsel %vm554_vm2, %v7489_v10, 0.0 }
 0x490   :  { %v1234_v13 = vpop.xlane.xlu1 %1233  ;;  %1269 = vadd.xlane.f32.xlu1 %v1268_v12  ;;  %v1300_v14 = vpop.permute.xlu0 %1299 }
 0x491   :  { %7496 = vpow2.f32 %v1255_v11  ;;  %v1242_v15 = vsub.f32 %v1210_v48, %v1234_v13  ;;  %7033 = vmatpush3.msra.mxu0 %v1300_v14 }
 0x492   :  { %7042 = vmatprep.subr.mxu0 %v7898_v38 }
 0x493   :  { %v1257_v16 = vmul.f32 1.442695, %v1242_v15 }
 0x494   :  { %v1376_v17 = vpop.permute.xlu1 %1375  ;;  %v1604_v28 = vpop.permute.xlu0 %1603 }
 0x495   :  { %7498 = vpow2.f32 %v1257_v16  ;;  %7038 = vmatpush3.msra.mxu1 %v1376_v17 }
 0x496   :  { %v7491_v18 = vpop.eup %7490  ;;  %7047 = vmatprep.subr.mxu1 %v7898_v38 }
 0x497   :  { %v1265_v19 = vsel %vm554_vm2, %v7491_v18, 0.0 }
 0x498   :  { %1266 = vadd.xlane.f32.xlu0 %v1265_v19  ;;  %v1452_v29 = vpop.permute.xlu1 %1451 }
 0x49a   :  { %v7493_v20 = vpop.eup %7492 }
 0x49b   :  { %v7495_v21 = vpop.eup %7494  ;;  %v1274_v22 = vsel %vm554_vm2, %v7493_v20, 0.0 }
 0x49c   :  { %1275 = vadd.xlane.f32.xlu1 %v1274_v22  ;;  %v1271_v23 = vsel %vm554_vm2, %v7495_v21, 0.0  ;;  %v1528_v31 = vpop.permute.xlu1 %1527 }
 0x49d   :  { %1272 = vadd.xlane.f32.xlu0 %v1271_v23 }
 0x49e   :  { %v8325_v24 = vpop.eup %7496 }
 0x49f   :  { %v1277_v25 = vsel %vm554_vm2, %v8325_v24, 0.0 }
 0x4a0   :  { %v1680_v32 = vpop.permute.xlu1 %1679 }
 0x4a1   :  { %1278 = vadd.xlane.f32.xlu0 %v1277_v25 }
 0x4a2   :  { %v8329_v26 = vpop.eup %7498 }
 0x4a3   :  { %v1280_v27 = vsel %vm554_vm2, %v8329_v26, 0.0 }
 0x4a4   :  { %1281 = vadd.xlane.f32.xlu1 %v1280_v27 }
 0x4b5   :  { %1831 = vrot.lane.b32.xlu1 %v8272_v59, %s7903_s29 }
 0x4b7   :  { %1755 = vrot.lane.b32.xlu0 %v8258_v56, %s7903_s29 }
 0x4c5   :  { %v1261_v30 = vpop.xlane.xlu0 %1260 }
 0x4c6   :  { %7500 = vrcp.f32 %v1261_v30 }
 0x4d1   :  { %v1264_v33 = vpop.xlane.xlu1 %1263 }
 0x4d2   :  { %7502 = vrcp.f32 %v1264_v33 }
 0x4d3   :  { %v7501_v34 = vpop.eup %7500 }
 0x4d4   :  { %v1291_v36 = vmul.f32 %v7501_v34, %v8311_v46 }
 0x4d6   :  { %7035 = vmatmul.mubr.msk.f32.vlgmr.msra.gmra.mxu0 %vm554_vm2, %v1291_v36 }
 0x4d7   :  { %7043 = vmatpush3.msra.mxu0 %v1452_v29  ;;  %7044 = vmatprep.mubr.msk.f32.mxu0 %vm7899_vm1, %v7898_v38  ;;  %v6661_v29 = vld [vmem:[#allocation8] ss:$0 sm:$0xff] }
 0x4d8   :  { %7052 = vmatprep.subr.mxu0 %v7898_v38 }
 0x4df   :  { %v7503_v56 = vpop.eup %7502 }
 0x4e0   :  { %v1292_v59 = vmul.f32 %v7503_v56, %v8315_v52 }
 0x4e2   :  { %7040 = vmatmul.mubr.msk.f32.vlgmr.msra.gmra.mxu1 %vm554_vm2, %v1292_v59 }
 0x4e3   :  { %7048 = vmatpush3.msra.mxu1 %v1528_v31  ;;  %7049 = vmatprep.mubr.msk.f32.mxu1 %vm7899_vm1, %v7898_v38 }
 0x4e4   :  { %7057 = vmatprep.subr.mxu1 %v7898_v38 }
 0x519   :  { %v1270_v39 = vpop.xlane.xlu1 %1269 }
 0x51a   :  { %7504 = vrcp.f32 %v1270_v39 }
 0x521   :  { %v1267_v40 = vpop.xlane.xlu0 %1266 }
 0x522   :  { %7506 = vrcp.f32 %v1267_v40 }
 0x525   :  { %v1276_v41 = vpop.xlane.xlu1 %1275 }
 0x526   :  { %7508 = vrcp.f32 %v1276_v41  ;;  %v1273_v42 = vpop.xlane.xlu0 %1272 }
 0x527   :  { %v7505_v44 = vpop.eup %7504  ;;  %7510 = vrcp.f32 %v1273_v42 }
 0x528   :  { %v1294_v45 = vmul.f32 %v7505_v44, %v7489_v10 }
 0x52a   :  { %v1279_v47 = vpop.xlane.xlu0 %1278  ;;  %7050 = vmatmul.mubr.msk.f32.vlgmr.msra.gmra.mxu1 %vm554_vm2, %v1294_v45 }
 0x52b   :  { %7512 = vrcp.f32 %v1279_v47  ;;  %7058 = vmatpush3.msra.mxu1 %v1680_v32  ;;  %7059 = vmatprep.mubr.msk.f32.mxu1 %vm7899_vm1, %v7898_v38 }
 0x52c   :  { %7067 = vmatprep.subr.mxu1 %v7898_v38 }
 0x52d   :  { %v1282_v48 = vpop.xlane.xlu1 %1281 }
 0x52e   :  { %7514 = vrcp.f32 %v1282_v48  ;;  %v1756_v46 = vpop.permute.xlu0 %1755 }
 0x52f   :  { %v7507_v51 = vpop.eup %7506 }
 0x530   :  { %v1293_v54 = vmul.f32 %v7507_v51, %v7491_v18  ;;  %v2080_v51 = vld [vmem:[%s8064_s12 + $0x18] sm:$0xff] }
 0x531   :  { %v1832_v60 = vpop.permute.xlu1 %1831 }
 0x532   :  { %7045 = vmatmul.mubr.msk.f32.vlgmr.msra.gmra.mxu0 %vm554_vm2, %v1293_v54  ;;  %v2079_v54 = vld [vmem:[%s8064_s12 + $0x10] sm:$0xff] }
 0x533   :  { %v7509_v55 = vpop.eup %7508  ;;  %7053 = vmatpush3.msra.mxu0 %v1604_v28  ;;  %7054 = vmatprep.mubr.msk.f32.mxu0 %vm7899_vm1, %v7898_v38 }
 0x534   :  { %v7511_v57 = vpop.eup %7510  ;;  %7062 = vmatprep.subr.mxu0 %v7898_v38  ;;  %v1296_v43 = vmul.f32 %v7509_v55, %v7493_v20  ;;  %v2078_v55 = vld [vmem:[%s8064_s12 + $0x8] sm:$0xff] }
 0x535   :  { %v1295_v58 = vmul.f32 %v7511_v57, %v7495_v21  ;;  %v2077_v57 = vld [vmem:[%s8064_s12] sm:$0xff]  ;;  %s8979_s12 = sld [smem:[#allocation52_spill]] }
 0x536   :  { %7060 = vmatmul.mubr.msk.f32.vlgmr.msra.gmra.mxu1 %vm554_vm2, %v1296_v43 }
 0x537   :  { %7055 = vmatmul.mubr.msk.f32.vlgmr.msra.gmra.mxu0 %vm554_vm2, %v1295_v58  ;;  %7068 = vmatpush3.msra.mxu1 %v1832_v60 }
 0x538   :  { %v7513_v50 = vpop.eup %7512  ;;  %7063 = vmatpush3.msra.mxu0 %v1756_v46  ;;  %7064 = vmatprep.mubr.msk.f32.mxu0 %vm7899_vm1, %v7898_v38 }
 0x539   :  { %v1297_v52 = vmul.f32 %v7513_v50, %v8325_v24  ;;  %7069 = vmatprep.mubr.msk.f32.mxu1 %vm7899_vm1, %v7898_v38  ;;  %7072 = vmatprep.subr.mxu0 %v1942_v2 }
 0x53a   :  { %7083 = vmatprep.subr.mxu1 %v2080_v51 }
 0x53b   :  { %v7515_v49 = vpop.eup %7514  ;;  %7065 = vmatmul.mubr.msk.f32.vlgmr.msra.gmra.mxu0 %vm554_vm2, %v1297_v52 }
 0x53c   :  { %v1298_v61 = vmul.f32 %v7515_v49, %v8329_v26  ;;  %7073 = vmatpush3.msra.mxu0 %v1942_v2 }
 0x53d   :  { %7074 = vmatprep.subr.mxu0 %v1941_v3 }
 0x53e   :  { %7070 = vmatmul.mubr.msk.f32.vlgmr.msra.gmra.mxu1 %vm554_vm2, %v1298_v61  ;;  %7075 = vmatpush3.msra.mxu0 %v1941_v3  ;;  %v6664_v61 = vld [vmem:[%s8084_s27] ss:$0 sm:$0xff]  ;;  %s8980_s27 = sld [smem:[#allocation53_spill]] }
 0x53f   :  { %7076 = vmatprep.subr.mxu0 %v1940_v5  ;;  %7084 = vmatpush3.msra.mxu1 %v2080_v51 }
 0x540   :  { %7077 = vmatpush3.msra.mxu0 %v1940_v5  ;;  %7085 = vmatprep.subr.mxu1 %v2079_v54  ;;  %v2194_v5 = vld [vmem:[%s8978_s1 + $0x38] sm:$0xff] }
 0x541   :  { %7078 = vmatprep.subr.mxu0 %v1939_v6  ;;  %7086 = vmatpush3.msra.mxu1 %v2079_v54 }
 0x542   :  { %7079 = vmatpush3.msra.mxu0 %v1939_v6  ;;  %7087 = vmatprep.subr.mxu1 %v2078_v55  ;;  %v2193_v6 = vld [vmem:[%s8978_s1 + $0x30] sm:$0xff] }
 0x543   :  { %7088 = vmatpush3.msra.mxu1 %v2078_v55  ;;  %7094 = vmatprep.subr.mxu0 %v2194_v5 }
 0x544   :  { %7089 = vmatprep.subr.mxu1 %v2077_v57 }
 0x545   :  { %7090 = vmatpush3.msra.mxu1 %v2077_v57 }
 0x546   :  { %7113 = vmatprep.subr.mxu1 %v7898_v38 }
 0x596   :  { %v1371_v53 = vpop.f32.mrf.mxu0 }
 0x598   :  { %v7036_v62 = vpop.f32.mrf.mxu0 }
 0x599   :  { %v6665_v62 = vld [vmem:[%s8977_s19] ss:$0 sm:$0xff]  ;;  %s8997_s19 = sld [smem:[#allocation30_spill]] }
 0x5a2   :  { %v1447_v63 = vpop.f32.mrf.mxu1 }
 0x5a4   :  { %v7041_v0 = vpop.f32.mrf.mxu1 }
 0x5ea   :  { %v1599_v1 = vpop.f32.mrf.mxu1 }
 0x5eb   :  { %1925 = vrot.lane.b32.xlu0 %v1599_v1, %s7904_s8 }
 0x5ec   :  { %v7051_v4 = vpop.f32.mrf.mxu1 }
 0x5f2   :  { %v1523_v7 = vpop.f32.mrf.mxu0 }
 0x5f3   :  { %1908 = vrot.lane.b32.xlu0 %v1523_v7, %s7904_s8  ;;  %v2192_v7 = vld [vmem:[%s8978_s1 + $0x28] sm:$0xff] }
 0x5f4   :  { %v7046_v8 = vpop.f32.mrf.mxu0 }
 0x5f5   :  { %v2191_v8 = vld [vmem:[%s8978_s1 + $0x20] sm:$0xff] }
 0x5f6   :  { %v1751_v9 = vpop.f32.mrf.mxu1 }
 0x5f7   :  { %v1675_v10 = vpop.f32.mrf.mxu0  ;;  %1929 = vrot.lane.b32.xlu0 %v1751_v9, %s7905_s24  ;;  %v2190_v9 = vld [vmem:[%s8978_s1 + $0x18] sm:$0xff] }
 0x5f8   :  { %1912 = vrot.lane.b32.xlu1 %v1675_v10, %s7905_s24  ;;  %v7061_v11 = vpop.f32.mrf.mxu1  ;;  %v2189_v10 = vld [vmem:[%s8978_s1 + $0x10] sm:$0xff] }
 0x5f9   :  { %v7056_v12 = vpop.f32.mrf.mxu0  ;;  %v2188_v11 = vld [vmem:[%s8978_s1 + $0x8] sm:$0xff] }
 0x5fa   :  { %v2187_v12 = vld [vmem:[%s8978_s1] sm:$0xff]  ;;  %s9005_s1 = sld [smem:[#allocation36_spill]] }
 0x5fb   :  { %v1827_v13 = vpop.f32.mrf.mxu0 }
 0x5fc   :  { %1916 = vrot.lane.b32.xlu1 %v1827_v13, %s7906_s4  ;;  %v6666_v13 = vld [vmem:[%s8979_s12] ss:$0 sm:$0xff]  ;;  %s9006_s12 = sld [smem:[#allocation43_spill]] }
 0x5fd   :  { %v7066_v14 = vpop.f32.mrf.mxu0 }
 0x5fe   :  { %v1903_v15 = vpop.f32.mrf.mxu1 }
 0x600   :  { %1933 = vrot.lane.b32.xlu1 %v1903_v15, %s7906_s4  ;;  %v7071_v16 = vpop.f32.mrf.mxu1 }
 0x65d   :  { %v1926_v17 = vpop.permute.xlu0 %1925 }
 0x65e   :  { %v1936_v25 = vsel %vm554_vm2, %v1447_v63, %v1926_v17 }
 0x665   :  { %v1909_v18 = vpop.permute.xlu0 %1908 }
 0x666   :  { %v1919_v20 = vsel %vm554_vm2, %v1371_v53, %v1909_v18 }
 0x669   :  { %v1930_v23 = vpop.permute.xlu0 %1929 }
 0x66a   :  { %v1913_v19 = vpop.permute.xlu1 %1912  ;;  %v1937_v26 = vsel %vm1920_vm3, %v1936_v25, %v1930_v23 }
 0x66b   :  { %v1921_v21 = vsel %vm1920_vm3, %v1919_v20, %v1913_v19 }
 0x66e   :  { %v1917_v22 = vpop.permute.xlu1 %1916 }
 0x66f   :  { %v1923_v24 = vsel %vm1922_vm4, %v1921_v21, %v1917_v22 }
 0x670   :  { %7080 = vmatprep.mubr.msk.f32.mxu0 %vm302_vm0, %v1923_v24 }
 0x672   :  { %v1934_v27 = vpop.permute.xlu1 %1933 }
 0x673   :  { %v1938_v28 = vsel %vm1922_vm4, %v1937_v26, %v1934_v27 }
 0x674   :  { %7081 = vmatmul.mubr.msk.f32.vlgmr.msra.gmra.mxu0 %vm302_vm0, %v1938_v28 }
 0x675   :  { %7095 = vmatpush3.msra.mxu0 %v2194_v5 }
 0x676   :  { %7096 = vmatprep.subr.mxu0 %v2193_v6 }
 0x677   :  { %7097 = vmatpush3.msra.mxu0 %v2193_v6 }
 0x678   :  { %7098 = vmatprep.subr.mxu0 %v2192_v7 }
 0x679   :  { %7099 = vmatpush3.msra.mxu0 %v2192_v7 }
 0x67a   :  { %7100 = vmatprep.subr.mxu0 %v2191_v8 }
 0x67b   :  { %7101 = vmatpush3.msra.mxu0 %v2191_v8 }
 0x67c   :  { %7102 = vmatprep.subr.mxu0 %v2190_v9 }
 0x67d   :  { %7103 = vmatpush3.msra.mxu0 %v2190_v9 }
 0x67e   :  { %7104 = vmatprep.subr.mxu0 %v2189_v10 }
 0x67f   :  { %7105 = vmatpush3.msra.mxu0 %v2189_v10 }
 0x680   :  { %7106 = vmatprep.subr.mxu0 %v2188_v11 }
 0x681   :  { %7107 = vmatpush3.msra.mxu0 %v2188_v11  ;;  %v2428_v11 = vld [vmem:[%s8982_s2] sm:$0x1f] }
 0x682   :  { %7108 = vmatprep.subr.mxu0 %v2187_v12 }
 0x683   :  { %7109 = vmatpush3.msra.mxu0 %v2187_v12 }
 0x684   :  { %7130 = vmatprep.subr.mxu0 %v7898_v38 }
 0x734   :  { %v7082_v30 = vpop.f32.mrf.mxu0 }
 0x735   :  { %v2028_v31 = vadd.f32 %v7082_v30, %v6661_v29 }
 0x736   :  { %v2022_v32 = vpop.f32.mrf.mxu0 }
 0x737   :  { %v2023_v33 = vadd.f32 %v6661_v29, %v2022_v32  ;;  %v2032_v34 = vadd.f32 %v2028_v31, %v8189_v37 }
 0x739   :  { %v2036_v36 = vsel %vm302_vm0, %v2032_v34, 0.0  ;;  %v2031_v56 = vadd.f32 %v2023_v33, %v8183_v35 }
 0x73a   :  { %2037 = vadd.xlane.f32.xlu1 %v2036_v36 }
 0x73b   :  { %v2033_v59 = vsel %vm302_vm0, %v2031_v56, 0.0 }
 0x73c   :  { %2034 = vadd.xlane.f32.xlu0 %v2033_v59 }
 0x7c3   :  { %v2038_v39 = vpop.xlane.xlu1 %2037 }
 0x7c4   :  { %v2040_v40 = vmul.f32 0.03125, %v2038_v39 }
 0x7c5   :  { %v2035_v41 = vpop.xlane.xlu0 %2034 }
 0x7c6   :  { %v2039_v42 = vmul.f32 0.03125, %v2035_v41  ;;  %v2042_v44 = vsub.f32 %v2032_v34, %v2040_v40 }
 0x7c8   :  { %v2041_v45 = vsub.f32 %v2031_v56, %v2039_v42  ;;  %v2044_v48 = vmul.f32 %v2042_v44, %v2042_v44  ;;  %v6669_v56 = vld [vmem:[%s8980_s27] ss:$0 sm:$0xff]  ;;  %s9007_s27 = sld [smem:[#allocation42_spill]] }
 0x7ca   :  { %v2043_v47 = vmul.f32 %v2041_v45, %v2041_v45  ;;  %v2048_v35 = vsel %vm302_vm0, %v2044_v48, 0.0 }
 0x7cc   :  { %v2045_v37 = vsel %vm302_vm0, %v2043_v47, 0.0 }
 0x7cd   :  { %2046 = vadd.xlane.f32.xlu0 %v2045_v37 }
 0x7d1   :  { %2049 = vadd.xlane.f32.xlu0 %v2048_v35 }
 0x856   :  { %v2047_v43 = vpop.xlane.xlu0 %2046 }
 0x857   :  { %v2051_v58 = vmul.f32 0.03125, %v2047_v43 }
 0x859   :  { %v2053_v60 = vadd.f32 1e-05, %v2051_v58 }
 0x85a   :  { %v2050_v46 = vpop.xlane.xlu0 %2049 }
 0x85b   :  { %7516 = vrsqrt.f32 %v2053_v60  ;;  %v2052_v50 = vmul.f32 0.03125, %v2050_v46  ;;  %v2336_v46 = vld [vmem:[%s8981_s6 + $0x8] sm:$0x3] }
 0x85d   :  { %v2054_v52 = vadd.f32 1e-05, %v2052_v50  ;;  %v2335_v50 = vld [vmem:[%s8981_s6] sm:$0xff] }
 0x85f   :  { %7518 = vrsqrt.f32 %v2054_v52 }
 0x868   :  { %v7517_v49 = vpop.eup %7516 }
 0x869   :  { %v2057_v53 = vmul.f32 %v7517_v49, %v2041_v45 }
 0x86b   :  { %v2066_v63 = vmul.f32 %v6664_v61, %v2057_v53 }
 0x86c   :  { %v7519_v0 = vpop.eup %7518 }
 0x86d   :  { %v2058_v1 = vmul.f32 %v7519_v0, %v2042_v44  ;;  %v8396_v2 = vadd.f32 %v6665_v62, %v2066_v63 }
 0x86f   :  { %v2067_v3 = vmul.f32 %v6664_v61, %v2058_v1  ;;  %7091 = vmatprep.mubr.msk.f32.mxu1 %vm302_vm0, %v8396_v2  ;;  %v6672_v1 = vld [vmem:[#allocation5] ss:$0 sm:$0xff] }
 0x871   :  { %v2076_v4 = vadd.f32 %v6665_v62, %v2067_v3 }
 0x873   :  { %7092 = vmatmul.mubr.msk.f32.vlgmr.msra.gmra.mxu1 %vm302_vm0, %v2076_v4 }
 0x874   :  { %7117 = vmatprep.mubr.msk.f32.mxu1 %vm7899_vm1, %v7898_v38  ;;  %7114 = vmatpush3.xpose.msk.msra.mxu1 %vm302_vm0, %v2336_v46 }
 0x875   :  { %7115 = vmatprep.subr.mxu1 %v7898_v38 }
 0x878   :  { %7116 = vmatpush3.xpose.msk.msra.mxu1 %vm302_vm0, %v2335_v50 }
 0x879   :  { %7120 = vmatprep.subr.mxu1 %v7898_v38 }
 0x933   :  { %v7093_v14 = vpop.f32.mrf.mxu1 }
 0x934   :  { %v2166_v15 = vadd.f32 %v7093_v14, %v6666_v13 }
 0x935   :  { %v2160_v16 = vpop.f32.mrf.mxu1 }
 0x936   :  { %v2170_v17 = vmul.f32 %v2166_v15, %v2166_v15  ;;  %v2161_v18 = vadd.f32 %v6666_v13, %v2160_v16 }
 0x938   :  { %v2172_v19 = vmul.f32 %v2170_v17, %v2166_v15  ;;  %v2169_v20 = vmul.f32 %v2161_v18, %v2161_v18 }
 0x93a   :  { %v2174_v21 = vmul.f32 0.044715, %v2172_v19  ;;  %v2171_v22 = vmul.f32 %v2169_v20, %v2161_v18 }
 0x93c   :  { %v2176_v23 = vadd.f32 %v2174_v21, %v2166_v15  ;;  %v2173_v24 = vmul.f32 0.044715, %v2171_v22 }
 0x93e   :  { %v2178_v25 = vmul.f32 0.7978846, %v2176_v23  ;;  %v2175_v26 = vadd.f32 %v2173_v24, %v2161_v18 }
 0x940   :  { %7520 = vtanh.f32 %v2178_v25  ;;  %v2177_v27 = vmul.f32 0.7978846, %v2175_v26 }
 0x942   :  { %7522 = vtanh.f32 %v2177_v27 }
 0x94d   :  { %v7521_v28 = vpop.eup %7520 }
 0x94e   :  { %v2182_v29 = vadd.f32 1.0, %v7521_v28 }
 0x94f   :  { %v7523_v30 = vpop.eup %7522 }
 0x950   :  { %v2181_v31 = vadd.f32 1.0, %v7523_v30  ;;  %v2184_v32 = vmul.f32 0.5, %v2182_v29 }
 0x952   :  { %v2183_v33 = vmul.f32 0.5, %v2181_v31  ;;  %v2186_v36 = vmul.f32 %v2184_v32, %v2166_v15 }
 0x954   :  { %v2185_v34 = vmul.f32 %v2183_v33, %v2161_v18 }
 0x956   :  { %7110 = vmatprep.mubr.msk.f32.mxu0 %vm2202_vm5, %v2185_v34 }
 0x957   :  { %7111 = vmatmul.mubr.msk.f32.vlgmr.msra.gmra.mxu0 %vm2202_vm5, %v2186_v36 }
 0x958   :  { %7134 = vmatprep.mubr.msk.f32.mxu0 %vm7899_vm1, %v7898_v38  ;;  %7131 = vmatpush3.msk.msra.mxu0 %vm2595_vm9, %v2336_v46 }
 0x959   :  { %7132 = vmatprep.subr.mxu0 %v7898_v38 }
 0x95a   :  { %7133 = vmatpush3.msra.mxu0 %v2335_v50 }
 0xa17   :  { %v7112_v59 = vpop.f32.mrf.mxu0 }
 0xa18   :  { %v2281_v39 = vadd.f32 %v7112_v59, %v6669_v56 }
 0xa19   :  { %v2275_v40 = vpop.f32.mrf.mxu0 }
 0xa1a   :  { %v2276_v41 = vadd.f32 %v6669_v56, %v2275_v40  ;;  %v2285_v42 = vadd.f32 %v2281_v39, %v2076_v4  ;;  %v6673_v4 = vld [vmem:[#allocation2] ss:$0 sm:$0xff] }
 0xa1b   :  { %v2668_v40 = vld [vmem:[%s8983_s7] sm:$0xff] }
 0xa1c   :  { %v2289_v44 = vsel %vm302_vm0, %v2285_v42, 0.0  ;;  %v2284_v45 = vadd.f32 %v2276_v41, %v8396_v2 }
 0xa1d   :  { %2290 = vadd.xlane.f32.xlu0 %v2289_v44 }
 0xa1e   :  { %v2286_v47 = vsel %vm302_vm0, %v2284_v45, 0.0 }
 0xa1f   :  { %2287 = vadd.xlane.f32.xlu1 %v2286_v47 }
 0xaa6   :  { %v2291_v37 = vpop.xlane.xlu0 %2290 }
 0xaa7   :  { %v2293_v48 = vmul.f32 0.03125, %v2291_v37 }
 0xaa8   :  { %v2288_v35 = vpop.xlane.xlu1 %2287 }
 0xaa9   :  { %v2295_v51 = vsub.f32 %v2285_v42, %v2293_v48  ;;  %v2292_v54 = vmul.f32 0.03125, %v2288_v35 }
 0xaab   :  { %v2294_v55 = vsub.f32 %v2284_v45, %v2292_v54  ;;  %v2297_v57 = vmul.f32 %v2295_v51, %v2295_v51  ;;  %v2669_v45 = vld [vmem:[%s8983_s7 + $0x8] sm:$0xff] }
 0xaad   :  { %v2301_v43 = vsel %vm302_vm0, %v2297_v57, 0.0  ;;  %v2296_v58 = vmul.f32 %v2294_v55, %v2294_v55 }
 0xaae   :  { %2302 = vadd.xlane.f32.xlu0 %v2301_v43 }
 0xaaf   :  { %v2298_v60 = vsel %vm302_vm0, %v2296_v58, 0.0 }
 0xab0   :  { %2299 = vadd.xlane.f32.xlu1 %v2298_v60 }
 0xb37   :  { %v2303_v52 = vpop.xlane.xlu0 %2302 }
 0xb38   :  { %v2305_v49 = vmul.f32 0.03125, %v2303_v52 }
 0xb39   :  { %v2300_v61 = vpop.xlane.xlu1 %2299 }
 0xb3a   :  { %v2307_v53 = vadd.f32 1e-05, %v2305_v49  ;;  %v2304_v62 = vmul.f32 0.03125, %v2300_v61  ;;  %v2730_v61 = vld [vmem:[%s8984_s10 + $0x18] sm:$0xff] }
 0xb3c   :  { %7524 = vrsqrt.f32 %v2307_v53  ;;  %v2306_v63 = vadd.f32 1e-05, %v2304_v62  ;;  %v2822_v53 = vld [vmem:[%s8985_s11 + $0x18] sm:$0xff]  ;;  %v2729_v62 = vld [vmem:[%s8984_s10 + $0x10] sm:$0xff] }
 0xb3d   :  { %7148 = vmatprep.subr.mxu0 %v2822_v53 }
 0xb3e   :  { %7526 = vrsqrt.f32 %v2306_v63  ;;  %v2821_v63 = vld [vmem:[%s8985_s11 + $0x10] sm:$0xff] }
 0xb49   :  { %v7525_v0 = vpop.eup %7524 }
 0xb4a   :  { %v2311_v2 = vmul.f32 %v7525_v0, %v2295_v51  ;;  %v2728_v0 = vld [vmem:[%s8984_s10 + $0x8] sm:$0xff] }
 0xb4b   :  { %v7527_v3 = vpop.eup %7526 }
 0xb4c   :  { %v2310_v5 = vmul.f32 %v7527_v3, %v2294_v55  ;;  %v2320_v6 = vmul.f32 %v6672_v1, %v2311_v2  ;;  %v2727_v2 = vld [vmem:[%s8984_s10] sm:$0xff] }
 0xb4d   :  { %v2819_v3 = vld [vmem:[%s8985_s11] sm:$0xff] }
 0xb4e   :  { %v2319_v7 = vmul.f32 %v6672_v1, %v2310_v5  ;;  %v8429_v8 = vadd.f32 %v6673_v4, %v2320_v6  ;;  %v2820_v1 = vld [vmem:[%s8985_s11 + $0x8] sm:$0xff] }
 0xb50   :  { %v8431_v9 = vadd.f32 %v6673_v4, %v2319_v7  ;;  %v2331_v10 = vrot.slane %v8429_v8, 7 }
 0xb52   :  { %v2334_v12 = vsel %vm2333_vm6, %v8431_v9, %v2331_v10 }
 0xb53   :  { %7118 = vmatmul.mubr.msk.f32.vlgmr.msra.gmra.mxu1 %vm302_vm0, %v2334_v12 }
 0xb54   :  { %7121 = vmatpush3.xpose.msk.msra.mxu1 %vm302_vm0, %v2428_v11  ;;  %7122 = vmatprep.mubr.msk.f32.mxu1 %vm7899_vm1, %v7898_v38 }
 0xb55   :  { %7125 = vmatprep.subr.mxu1 %v7898_v38 }
 0xb57   :  { %7123 = vmatmul.mubr.msk.f32.vlgmr.msra.gmra.mxu1 %vm302_vm0, %v2334_v12 }
 0xb58   :  { %7127 = vmatprep.mubr.msk.f32.mxu1 %vm7899_vm1, %v7898_v38  ;;  %7126 = vmatpush3.msk.msra.mxu1 %vm2518_vm10, %v2428_v11 }
 0xb59   :  { %7137 = vmatprep.subr.mxu1 %v2730_v61 }
 0xc13   :  { %v2412_v13 = vpop.f32.mrf.mxu1 }
 0xc14   :  { %v2417_v14 = vsel %vm2416_vm7, %v2412_v13, -inf }
 0xc15   :  { %2418 = vmax.xlane.f32.xlu0 %v2417_v14  ;;  %v7119_v15 = vpop.f32.mrf.mxu1 }
 0xc17   :  { %v2498_v16 = vpop.f32.mrf.mxu1 }
 0xc18   :  { %v2503_v17 = vsel %vm2502_vm8, %v2498_v16, -inf }
 0xc19   :  { %2504 = vmax.xlane.f32.xlu1 %v2503_v17  ;;  %v7124_v18 = vpop.f32.mrf.mxu1 }
 0xc9e   :  { %v2419_v19 = vpop.xlane.xlu0 %2418 }
 0xc9f   :  { %v2420_v20 = vsub.f32 %v2412_v13, %v2419_v19  ;;  %v6683_v13 = vld [vmem:[%s8986_s0] ss:$0 sm:$0xff] }
 0xca1   :  { %v2421_v21 = vmul.f32 1.442695, %v2420_v20 }
 0xca2   :  { %v2505_v22 = vpop.xlane.xlu1 %2504 }
 0xca3   :  { %7528 = vpow2.f32 %v2421_v21  ;;  %v2506_v23 = vsub.f32 %v2498_v16, %v2505_v22  ;;  %v6684_v16 = vld [vmem:[%s8987_s9] ss:$0 sm:$0xff] }
 0xca4   :  { %v6688_v22 = vld [vmem:[%s8988_s15] ss:$0 sm:$0xff] }
 0xca5   :  { %v2507_v24 = vmul.f32 1.442695, %v2506_v23 }
 0xca7   :  { %7530 = vpow2.f32 %v2507_v24 }
 0xcb0   :  { %v7529_v25 = vpop.eup %7528 }
 0xcb1   :  { %v2423_v26 = vsel %vm2416_vm7, %v7529_v25, 0.0 }
 0xcb2   :  { %2424 = vadd.xlane.f32.xlu0 %v2423_v26 }
 0xcb4   :  { %v7531_v27 = vpop.eup %7530 }
 0xcb5   :  { %v2509_v28 = vsel %vm2502_vm8, %v7531_v27, 0.0 }
 0xcb6   :  { %2510 = vadd.xlane.f32.xlu1 %v2509_v28 }
 0xd3b   :  { %v2425_v29 = vpop.xlane.xlu0 %2424 }
 0xd3c   :  { %7532 = vrcp.f32 %v2425_v29 }
 0xd3f   :  { %v2511_v30 = vpop.xlane.xlu1 %2510 }
 0xd40   :  { %7534 = vrcp.f32 %v2511_v30 }
 0xd49   :  { %v7533_v31 = vpop.eup %7532 }
 0xd4a   :  { %v2427_v32 = vmul.f32 %v7533_v31, %v7529_v25  ;;  %v6685_v25 = vld [vmem:[%s8989_s3] ss:$0 sm:$0xff] }
 0xd4c   :  { %7135 = vmatmul.mubr.msk.f32.vlgmr.msra.gmra.mxu0 %vm2591_vm11, %v2427_v32 }
 0xd4d   :  { %v7535_v33 = vpop.eup %7534  ;;  %7149 = vmatpush3.msra.mxu0 %v2822_v53 }
 0xd4e   :  { %v2513_v34 = vmul.f32 %v7535_v33, %v7531_v27  ;;  %7150 = vmatprep.subr.mxu0 %v2821_v63 }
 0xd4f   :  { %7151 = vmatpush3.msra.mxu0 %v2821_v63 }
 0xd50   :  { %7128 = vmatmul.mubr.msk.f32.vlgmr.msra.gmra.mxu1 %vm2514_vm12, %v2513_v34  ;;  %7152 = vmatprep.subr.mxu0 %v2820_v1 }
 0xd51   :  { %7138 = vmatpush3.msra.mxu1 %v2730_v61  ;;  %7153 = vmatpush3.msra.mxu0 %v2820_v1 }
 0xd52   :  { %7139 = vmatprep.subr.mxu1 %v2729_v62  ;;  %7154 = vmatprep.subr.mxu0 %v2819_v3 }
 0xd53   :  { %7140 = vmatpush3.msra.mxu1 %v2729_v62  ;;  %7155 = vmatpush3.msra.mxu0 %v2819_v3 }
 0xd54   :  { %7141 = vmatprep.subr.mxu1 %v2728_v0  ;;  %7164 = vmatprep.subr.mxu0 %v7898_v38 }
 0xd55   :  { %7142 = vmatpush3.msra.mxu1 %v2728_v0 }
 0xd56   :  { %7143 = vmatprep.subr.mxu1 %v2727_v2 }
 0xd57   :  { %7144 = vmatpush3.msra.mxu1 %v2727_v2 }
 0xd58   :  { %7159 = vmatprep.subr.mxu1 %v7898_v38 }
 0xe0c   :  { %v2664_v36 = vpop.f32.mrf.mxu0 }
 0xe0e   :  { %v7136_v56 = vpop.f32.mrf.mxu0 }
 0xe10   :  { %v2587_v59 = vpop.f32.mrf.mxu1 }
 0xe11   :  { %v2665_v39 = vadd.f32 %v2664_v36, %v2587_v59 }
 0xe12   :  { %v7129_v41 = vpop.f32.mrf.mxu1 }
 0xe13   :  { %v2671_v42 = vrot.slane %v2665_v39, 1  ;;  %v2673_v44 = vsel %vm2333_vm6, %v2665_v39, 0.0 }
 0xe14   :  { %v2675_v47 = vadd.f32 %v2673_v44, %v2668_v40 }
 0xe15   :  { %v2674_v37 = vsel %vm2333_vm6, %v2671_v42, 0.0 }
 0xe16   :  { %v2677_v48 = vsel %vm302_vm0, %v2675_v47, 0.0  ;;  %v2676_v35 = vadd.f32 %v2674_v37, %v2669_v45 }
 0xe17   :  { %2678 = vadd.xlane.f32.xlu0 %v2677_v48 }
 0xe18   :  { %v2680_v51 = vsel %vm302_vm0, %v2676_v35, 0.0 }
 0xe19   :  { %2681 = vadd.xlane.f32.xlu1 %v2680_v51  ;;  %v7907_v51 = vmov -1e+09  }
 0xea0   :  { %v2679_v54 = vpop.xlane.xlu0 %2678 }
 0xea1   :  { %v2683_v55 = vmul.f32 0.03125, %v2679_v54 }
 0xea2   :  { %v2682_v57 = vpop.xlane.xlu1 %2681 }
 0xea3   :  { %v2685_v43 = vsub.f32 %v2675_v47, %v2683_v55  ;;  %v2684_v58 = vmul.f32 0.03125, %v2682_v57  ;;  %v2721_v47 = vlaneseq }
 0xea5   :  { %v2686_v60 = vsub.f32 %v2676_v35, %v2684_v58  ;;  %v2687_v46 = vmul.f32 %v2685_v43, %v2685_v43  ;;  %v2722_v37 = vshrl.u32 %v2721_v47, 7  ;;  %v2724_v48 = vand.u32 127, %v2721_v47 }
 0xea7   :  { %v2689_v50 = vsel %vm302_vm0, %v2687_v46, 0.0  ;;  %v2688_v52 = vmul.f32 %v2686_v60, %v2686_v60  ;;  %vm2725_vm13 = vcmp.le.s32.totalorder %v2724_v48, %v2722_v37 }
 0xea8   :  { %2690 = vadd.xlane.f32.xlu0 %v2689_v50  ;;  %v2726_v54 = vsel %vm2725_vm13, 0.0, %v7907_v51 }
 0xea9   :  { %v2692_v49 = vsel %vm302_vm0, %v2688_v52, 0.0 }
 0xeaa   :  { %2693 = vadd.xlane.f32.xlu1 %v2692_v49 }
 0xf31   :  { %v2691_v4 = vpop.xlane.xlu0 %2690 }
 0xf32   :  { %v2695_v5 = vmul.f32 0.03125, %v2691_v4 }
 0xf33   :  { %v2694_v6 = vpop.xlane.xlu1 %2693 }
 0xf34   :  { %v2697_v7 = vadd.f32 1e-05, %v2695_v5  ;;  %v2696_v10 = vmul.f32 0.03125, %v2694_v6 }
 0xf36   :  { %7536 = vrsqrt.f32 %v2697_v7  ;;  %v2698_v11 = vadd.f32 1e-05, %v2696_v10 }
 0xf38   :  { %7538 = vrsqrt.f32 %v2698_v11 }
 0xf43   :  { %v7537_v12 = vpop.eup %7536 }
 0xf44   :  { %v2701_v14 = vmul.f32 %v7537_v12, %v2685_v43 }
 0xf45   :  { %v7539_v15 = vpop.eup %7538 }
 0xf46   :  { %v2702_v17 = vmul.f32 %v7539_v15, %v2686_v60  ;;  %v2710_v18 = vmul.f32 %v6683_v13, %v2701_v14 }
 0xf48   :  { %v2711_v19 = vmul.f32 %v6683_v13, %v2702_v17  ;;  %v8471_v20 = vadd.f32 %v6684_v16, %v2710_v18 }
 0xf4a   :  { %v8473_v21 = vadd.f32 %v6684_v16, %v2711_v19  ;;  %7145 = vmatprep.mubr.msk.f32.mxu1 %vm302_vm0, %v8471_v20  ;;  %7156 = vmatprep.mubr.msk.f32.mxu0 %vm302_vm0, %v8471_v20 }
 0xf4c   :  { %7146 = vmatmul.mubr.msk.f32.vlgmr.msra.gmra.mxu1 %vm302_vm0, %v8473_v21  ;;  %7157 = vmatmul.mubr.msk.f32.vlgmr.msra.gmra.mxu0 %vm302_vm0, %v8473_v21 }
 0xf4d   :  { %7166 = vmatprep.mubr.msk.f32.mxu0 %vm7899_vm1, %v7898_v38  ;;  %7161 = vmatprep.mubr.msk.f32.mxu1 %vm7899_vm1, %v7898_v38 }
0x100c   :  { %v7147_v23 = vpop.f32.mrf.mxu1  ;;  %v7158_v24 = vpop.f32.mrf.mxu0 }
0x100d   :  { %v8489_v26 = vadd.f32 %v7158_v24, %v6688_v22  ;;  %v2816_v30 = vadd.f32 %v7147_v23, %v6685_v25 }
0x100e   :  { %v2896_v27 = vpop.f32.mrf.mxu0  ;;  %v2810_v28 = vpop.f32.mrf.mxu1 }
0x100f   :  { %v8491_v29 = vadd.f32 %v6688_v22, %v2896_v27  ;;  %2923 = vrot.lane.b32.xlu1 %v8489_v26, %s7900_s5  ;;  %7165 = vmatpush3.xpose.msk.msra.mxu0 %vm554_vm2, %v8489_v26  ;;  %v2811_v31 = vadd.f32 %v6685_v25, %v2810_v28 }
0x1010   :  { %7174 = vmatprep.subr.mxu0 %v7898_v38 }
0x1011   :  { %2921 = vrot.lane.b32.xlu0 %v8491_v29, %s7900_s5  ;;  %7160 = vmatpush3.xpose.msk.msra.mxu1 %vm554_vm2, %v8491_v29 }
0x1012   :  { %7167 = vmatmul.mubr.msk.f32.vlgmr.msra.gmra.mxu0 %vm554_vm2, %v2816_v30  ;;  %7169 = vmatprep.subr.mxu1 %v7898_v38 }
0x1013   :  { %2909 = vrot.lane.b32.xlu1 %v2816_v30, %s7900_s5  ;;  %7176 = vmatprep.mubr.msk.f32.mxu0 %vm7899_vm1, %v7898_v38 }
0x1014   :  { %7162 = vmatmul.mubr.msk.f32.vlgmr.msra.gmra.mxu1 %vm554_vm2, %v2811_v31 }
0x1015   :  { %2925 = vrot.lane.b32.xlu0 %v8491_v29, %s7901_s17  ;;  %7171 = vmatprep.mubr.msk.f32.mxu1 %vm7899_vm1, %v7898_v38 }
0x1017   :  { %2927 = vrot.lane.b32.xlu1 %v8489_v26, %s7901_s17 }
0x1019   :  { %2911 = vrot.lane.b32.xlu0 %v2811_v31, %s7901_s17 }
0x101b   :  { %2907 = vrot.lane.b32.xlu1 %v2811_v31, %s7900_s5 }
0x101d   :  { %2929 = vrot.lane.b32.xlu0 %v8491_v29, %s7902_s25 }
0x101f   :  { %2913 = vrot.lane.b32.xlu1 %v2816_v30, %s7901_s17 }
0x1021   :  { %2915 = vrot.lane.b32.xlu0 %v2811_v31, %s7902_s25 }
0x1023   :  { %2931 = vrot.lane.b32.xlu1 %v8489_v26, %s7902_s25 }
0x1027   :  { %2917 = vrot.lane.b32.xlu1 %v2816_v30, %s7902_s25 }
0x1081   :  { %v8523_v32 = vpop.permute.xlu1 %2923 }
0x1082   :  { %7175 = vmatpush3.xpose.msk.msra.mxu0 %vm554_vm2, %v8523_v32 }
0x1083   :  { %v8527_v33 = vpop.permute.xlu0 %2921  ;;  %7184 = vmatprep.subr.mxu0 %v7898_v38 }
0x1084   :  { %7170 = vmatpush3.xpose.msk.msra.mxu1 %vm554_vm2, %v8527_v33 }
0x1085   :  { %v2910_v34 = vpop.permute.xlu1 %2909  ;;  %7179 = vmatprep.subr.mxu1 %v7898_v38 }
0x1086   :  { %7177 = vmatmul.mubr.msk.f32.vlgmr.msra.gmra.mxu0 %vm554_vm2, %v2910_v34 }
0x1087   :  { %v8534_v36 = vpop.permute.xlu0 %2925  ;;  %7186 = vmatprep.mubr.msk.f32.mxu0 %vm7899_vm1, %v7898_v38 }
0x1089   :  { %v8538_v56 = vpop.permute.xlu1 %2927 }
0x108a   :  { %7185 = vmatpush3.xpose.msk.msra.mxu0 %vm554_vm2, %v8538_v56 }
0x108b   :  { %v2912_v59 = vpop.permute.xlu0 %2911  ;;  %7194 = vmatprep.subr.mxu0 %v7898_v38 }
0x108d   :  { %v2908_v39 = vpop.permute.xlu1 %2907 }
0x108e   :  { %7172 = vmatmul.mubr.msk.f32.vlgmr.msra.gmra.mxu1 %vm554_vm2, %v2908_v39 }
0x108f   :  { %7180 = vmatpush3.xpose.msk.msra.mxu1 %vm554_vm2, %v8534_v36  ;;  %v8546_v40 = vpop.permute.xlu0 %2929  ;;  %7181 = vmatprep.mubr.msk.f32.mxu1 %vm7899_vm1, %v7898_v38 }
0x1090   :  { %7189 = vmatprep.subr.mxu1 %v7898_v38 }
0x1091   :  { %v2914_v41 = vpop.permute.xlu1 %2913 }
0x1092   :  { %7182 = vmatmul.mubr.msk.f32.vlgmr.msra.gmra.mxu1 %vm554_vm2, %v2912_v59  ;;  %7187 = vmatmul.mubr.msk.f32.vlgmr.msra.gmra.mxu0 %vm554_vm2, %v2914_v41 }
0x1093   :  { %7190 = vmatpush3.xpose.msk.msra.mxu1 %vm554_vm2, %v8546_v40  ;;  %7191 = vmatprep.mubr.msk.f32.mxu1 %vm7899_vm1, %v7898_v38  ;;  %v2916_v42 = vpop.permute.xlu0 %2915 }
0x1094   :  { %7196 = vmatprep.mubr.msk.f32.mxu0 %vm7899_vm1, %v7898_v38  ;;  %7199 = vmatprep.subr.mxu1 %v7898_v38 }
0x1095   :  { %v8560_v44 = vpop.permute.xlu1 %2931 }
0x1096   :  { %7192 = vmatmul.mubr.msk.f32.vlgmr.msra.gmra.mxu1 %vm554_vm2, %v2916_v42  ;;  %7195 = vmatpush3.xpose.msk.msra.mxu0 %vm554_vm2, %v8560_v44 }
0x1097   :  { %7204 = vmatprep.subr.mxu0 %v7898_v38  ;;  %7201 = vmatprep.mubr.msk.f32.mxu1 %vm7899_vm1, %v7898_v38 }
0x1099   :  { %v2918_v45 = vpop.permute.xlu1 %2917 }
0x109a   :  { %7197 = vmatmul.mubr.msk.f32.vlgmr.msra.gmra.mxu0 %vm554_vm2, %v2918_v45 }
0x109b   :  { %7206 = vmatprep.mubr.msk.f32.mxu0 %vm7899_vm1, %v7898_v38 }
0x10d2   :  { %v3077_v35 = vpop.f32.mrf.mxu0 }
0x10d3   :  { %v3526_v55 = vmul.f32 0.35355338, %v3077_v35 }
0x10d4   :  { %v3003_v57 = vpop.f32.mrf.mxu1  ;;  %v7168_v43 = vpop.f32.mrf.mxu0 }
0x10d5   :  { %v3525_v58 = vmul.f32 0.35355338, %v3003_v57  ;;  %v3534_v60 = vadd.f32 %v3526_v55, %v2726_v54 }
0x10d6   :  { %v7163_v46 = vpop.f32.mrf.mxu1 }
0x10d7   :  { %v3544_v50 = vsel %vm554_vm2, %v3534_v60, -inf  ;;  %v3533_v52 = vadd.f32 %v3525_v58, %v2726_v54 }
0x10d8   :  { %3545 = vmax.xlane.f32.xlu1 %v3544_v50 }
0x10d9   :  { %v3541_v49 = vsel %vm554_vm2, %v3533_v52, -inf }
0x10da   :  { %3542 = vmax.xlane.f32.xlu0 %v3541_v49 }
0x1146   :  { %v3225_v61 = vpop.f32.mrf.mxu0 }
0x1147   :  { %v3528_v53 = vmul.f32 0.35355338, %v3225_v61 }
0x1148   :  { %v7178_v62 = vpop.f32.mrf.mxu0 }
0x1149   :  { %v3536_v63 = vadd.f32 %v3528_v53, %v2726_v54 }
0x114b   :  { %v3550_v0 = vsel %vm554_vm2, %v3536_v63, -inf }
0x114c   :  { %3551 = vmax.xlane.f32.xlu0 %v3550_v0 }
0x114e   :  { %v3151_v1 = vpop.f32.mrf.mxu1 }
0x114f   :  { %v3527_v2 = vmul.f32 0.35355338, %v3151_v1 }
0x1150   :  { %v7173_v3 = vpop.f32.mrf.mxu1 }
0x1151   :  { %v3535_v4 = vadd.f32 %v3527_v2, %v2726_v54 }
0x1152   :  { %v3299_v5 = vpop.f32.mrf.mxu1  ;;  %v3373_v6 = vpop.f32.mrf.mxu0 }
0x1153   :  { %v3529_v7 = vmul.f32 0.35355338, %v3299_v5  ;;  %v3530_v10 = vmul.f32 0.35355338, %v3373_v6  ;;  %v3547_v11 = vsel %vm554_vm2, %v3535_v4, -inf }
0x1154   :  { %v7188_v12 = vpop.f32.mrf.mxu0  ;;  %3548 = vmax.xlane.f32.xlu0 %v3547_v11  ;;  %v7183_v13 = vpop.f32.mrf.mxu1 }
0x1155   :  { %v3538_v14 = vadd.f32 %v3530_v10, %v2726_v54  ;;  %v3537_v15 = vadd.f32 %v3529_v7, %v2726_v54 }
0x1156   :  { %v3447_v16 = vpop.f32.mrf.mxu1 }
0x1157   :  { %v3531_v17 = vmul.f32 0.35355338, %v3447_v16  ;;  %v3556_v18 = vsel %vm554_vm2, %v3538_v14, -inf  ;;  %v3553_v19 = vsel %vm554_vm2, %v3537_v15, -inf }
0x1158   :  { %3557 = vmax.xlane.f32.xlu1 %v3556_v18  ;;  %3554 = vmax.xlane.f32.xlu0 %v3553_v19  ;;  %v7193_v22 = vpop.f32.mrf.mxu1 }
0x1159   :  { %v3539_v23 = vadd.f32 %v3531_v17, %v2726_v54 }
0x115a   :  { %v3521_v24 = vpop.f32.mrf.mxu0 }
0x115b   :  { %v3532_v25 = vmul.f32 0.35355338, %v3521_v24  ;;  %v3559_v27 = vsel %vm554_vm2, %v3539_v23, -inf }
0x115c   :  { %v7198_v28 = vpop.f32.mrf.mxu0  ;;  %3560 = vmax.xlane.f32.xlu0 %v3559_v27 }
0x115d   :  { %v3540_v30 = vadd.f32 %v3532_v25, %v2726_v54 }
0x115f   :  { %v3562_v31 = vsel %vm554_vm2, %v3540_v30, -inf }
0x1160   :  { %3563 = vmax.xlane.f32.xlu1 %v3562_v31 }
0x1163   :  { %v3543_v34 = vpop.xlane.xlu0 %3542 }
0x1164   :  { %v3565_v59 = vsub.f32 %v3533_v52, %v3543_v34 }
0x1166   :  { %v3573_v39 = vmul.f32 1.442695, %v3565_v59 }
0x1168   :  { %7540 = vpow2.f32 %v3573_v39 }
0x1171   :  { %3705 = vrot.lane.b32.xlu1 %v8489_v26, %s7903_s29  ;;  %v3546_v26 = vpop.xlane.xlu1 %3545 }
0x1172   :  { %3629 = vrot.lane.b32.xlu0 %v8491_v29, %s7903_s29  ;;  %v3566_v41 = vsub.f32 %v3534_v60, %v3546_v26 }
0x1174   :  { %v3575_v42 = vmul.f32 1.442695, %v3566_v41 }
0x1175   :  { %3781 = vrot.lane.b32.xlu1 %v8527_v33, %s7903_s29  ;;  %v8591_v29 = vpop.eup %7540 }
0x1176   :  { %3933 = vrot.lane.b32.xlu0 %v8534_v36, %s7903_s29  ;;  %7542 = vpow2.f32 %v3575_v42  ;;  %v3589_v33 = vsel %vm554_vm2, %v8591_v29, 0.0 }
0x1179   :  { %3857 = vrot.lane.b32.xlu1 %v8523_v32, %s7903_s29 }
0x117d   :  { %4009 = vrot.lane.b32.xlu1 %v8538_v56, %s7903_s29 }
0x1183   :  { %v8595_v36 = vpop.eup %7542 }
0x1184   :  { %v3592_v32 = vsel %vm554_vm2, %v8595_v36, 0.0 }
0x1195   :  { %3590 = vadd.xlane.f32.xlu0 %v3589_v33 }
0x11a1   :  { %3593 = vadd.xlane.f32.xlu1 %v3592_v32 }
0x11d5   :  { %v3552_v45 = vpop.xlane.xlu0 %3551 }
0x11d6   :  { %v3568_v56 = vsub.f32 %v3536_v63, %v3552_v45 }
0x11d8   :  { %v3579_v47 = vmul.f32 1.442695, %v3568_v56 }
0x11da   :  { %7544 = vpow2.f32 %v3579_v47 }
0x11dd   :  { %v3549_v37 = vpop.xlane.xlu0 %3548 }
0x11de   :  { %v3567_v48 = vsub.f32 %v3535_v4, %v3549_v37 }
0x11e0   :  { %v3577_v35 = vmul.f32 1.442695, %v3567_v48 }
0x11e1   :  { %v3558_v51 = vpop.xlane.xlu1 %3557  ;;  %v3555_v54 = vpop.xlane.xlu0 %3554 }
0x11e2   :  { %7546 = vpow2.f32 %v3577_v35  ;;  %v3570_v55 = vsub.f32 %v3538_v14, %v3558_v51  ;;  %v3569_v57 = vsub.f32 %v3537_v15, %v3555_v54 }
0x11e4   :  { %v3583_v43 = vmul.f32 1.442695, %v3570_v55  ;;  %v3581_v58 = vmul.f32 1.442695, %v3569_v57  ;;  %v4270_v55 = vld [vmem:[%s8990_s16 + $0x18] sm:$0xff]  ;;  %v4269_v57 = vld [vmem:[%s8990_s16 + $0x10] sm:$0xff] }
0x11e5   :  { %v3561_v60 = vpop.xlane.xlu0 %3560 }
0x11e6   :  { %7548 = vpow2.f32 %v3583_v43  ;;  %v3571_v46 = vsub.f32 %v3539_v23, %v3561_v60  ;;  %v4267_v60 = vld [vmem:[%s8990_s16] sm:$0xff] }
0x11e7   :  { %v7545_v50 = vpop.eup %7544  ;;  %7550 = vpow2.f32 %v3581_v58  ;;  %v4268_v58 = vld [vmem:[%s8990_s16 + $0x8] sm:$0xff] }
0x11e8   :  { %v3585_v52 = vmul.f32 1.442695, %v3571_v46  ;;  %v3598_v49 = vsel %vm554_vm2, %v7545_v50, 0.0 }
0x11e9   :  { %v3564_v61 = vpop.xlane.xlu1 %3563  ;;  %3599 = vadd.xlane.f32.xlu1 %v3598_v49  ;;  %v3630_v53 = vpop.permute.xlu0 %3629 }
0x11ea   :  { %7552 = vpow2.f32 %v3585_v52  ;;  %v3572_v62 = vsub.f32 %v3540_v30, %v3564_v61  ;;  %7200 = vmatpush3.msra.mxu1 %v3630_v53 }
0x11eb   :  { %7209 = vmatprep.subr.mxu1 %v7898_v38 }
0x11ec   :  { %v3587_v63 = vmul.f32 1.442695, %v3572_v62 }
0x11ed   :  { %v3706_v0 = vpop.permute.xlu1 %3705  ;;  %v3934_v13 = vpop.permute.xlu0 %3933 }
0x11ee   :  { %7554 = vpow2.f32 %v3587_v63  ;;  %7205 = vmatpush3.msra.mxu0 %v3706_v0 }
0x11ef   :  { %v7547_v1 = vpop.eup %7546  ;;  %7214 = vmatprep.subr.mxu0 %v7898_v38 }
0x11f0   :  { %v3595_v2 = vsel %vm554_vm2, %v7547_v1, 0.0 }
0x11f1   :  { %3596 = vadd.xlane.f32.xlu0 %v3595_v2  ;;  %v3782_v14 = vpop.permute.xlu1 %3781 }
0x11f3   :  { %v7549_v3 = vpop.eup %7548 }
0x11f4   :  { %v7551_v4 = vpop.eup %7550  ;;  %v3604_v5 = vsel %vm554_vm2, %v7549_v3, 0.0 }
0x11f5   :  { %3605 = vadd.xlane.f32.xlu1 %v3604_v5  ;;  %v3601_v6 = vsel %vm554_vm2, %v7551_v4, 0.0  ;;  %v3858_v16 = vpop.permute.xlu1 %3857 }
0x11f6   :  { %3602 = vadd.xlane.f32.xlu0 %v3601_v6 }
0x11f7   :  { %v8605_v7 = vpop.eup %7552 }
0x11f8   :  { %v3607_v10 = vsel %vm554_vm2, %v8605_v7, 0.0 }
0x11f9   :  { %v4010_v17 = vpop.permute.xlu1 %4009 }
0x11fa   :  { %3608 = vadd.xlane.f32.xlu0 %v3607_v10 }
0x11fb   :  { %v8609_v11 = vpop.eup %7554 }
0x11fc   :  { %v3610_v12 = vsel %vm554_vm2, %v8609_v11, 0.0 }
0x11fd   :  { %3611 = vadd.xlane.f32.xlu1 %v3610_v12 }
0x120e   :  { %4161 = vrot.lane.b32.xlu1 %v8560_v44, %s7903_s29 }
0x1210   :  { %4085 = vrot.lane.b32.xlu0 %v8546_v40, %s7903_s29 }
0x121e   :  { %v3591_v15 = vpop.xlane.xlu0 %3590 }
0x121f   :  { %7556 = vrcp.f32 %v3591_v15 }
0x122a   :  { %v3594_v18 = vpop.xlane.xlu1 %3593 }
0x122b   :  { %7558 = vrcp.f32 %v3594_v18  ;;  %v4498_v18 = vld [vmem:[%s8991_s18 + $0x8] sm:$0xff] }
0x122c   :  { %v7557_v19 = vpop.eup %7556 }
0x122d   :  { %v3621_v22 = vmul.f32 %v7557_v19, %v8591_v29  ;;  %v4497_v19 = vld [vmem:[%s8991_s18] sm:$0xff] }
0x122f   :  { %7202 = vmatmul.mubr.msk.f32.vlgmr.msra.gmra.mxu1 %vm554_vm2, %v3621_v22  ;;  %v6715_v22 = vld [vmem:[%s8992_s22] ss:$0 sm:$0xff] }
0x1230   :  { %7210 = vmatpush3.msra.mxu1 %v3782_v14  ;;  %7211 = vmatprep.mubr.msk.f32.mxu1 %vm7899_vm1, %v7898_v38 }
0x1231   :  { %7219 = vmatprep.subr.mxu1 %v7898_v38 }
0x1238   :  { %v7559_v40 = vpop.eup %7558 }
0x1239   :  { %v3622_v44 = vmul.f32 %v7559_v40, %v8595_v36 }
0x123b   :  { %7207 = vmatmul.mubr.msk.f32.vlgmr.msra.gmra.mxu0 %vm554_vm2, %v3622_v44 }
0x123c   :  { %7215 = vmatpush3.msra.mxu0 %v3858_v16  ;;  %7216 = vmatprep.mubr.msk.f32.mxu0 %vm7899_vm1, %v7898_v38 }
0x123d   :  { %7224 = vmatprep.subr.mxu0 %v7898_v38 }
0x1272   :  { %v3600_v23 = vpop.xlane.xlu1 %3599 }
0x1273   :  { %7560 = vrcp.f32 %v3600_v23 }
0x127a   :  { %v3597_v24 = vpop.xlane.xlu0 %3596 }
0x127b   :  { %7562 = vrcp.f32 %v3597_v24 }
0x127e   :  { %v3606_v25 = vpop.xlane.xlu1 %3605 }
0x127f   :  { %7564 = vrcp.f32 %v3606_v25  ;;  %v3603_v27 = vpop.xlane.xlu0 %3602 }
0x1280   :  { %v7561_v28 = vpop.eup %7560  ;;  %7566 = vrcp.f32 %v3603_v27 }
0x1281   :  { %v3624_v30 = vmul.f32 %v7561_v28, %v7545_v50  ;;  %v4500_v50 = vld [vmem:[%s8991_s18 + $0x18] sm:$0xff] }
0x1283   :  { %v3609_v31 = vpop.xlane.xlu0 %3608  ;;  %7217 = vmatmul.mubr.msk.f32.vlgmr.msra.gmra.mxu0 %vm554_vm2, %v3624_v30  ;;  %v6723_v30 = vld [vmem:[%s8993_s23] ss:$0 sm:$0xff] }
0x1284   :  { %7568 = vrcp.f32 %v3609_v31  ;;  %7225 = vmatpush3.msra.mxu0 %v4010_v17  ;;  %7226 = vmatprep.mubr.msk.f32.mxu0 %vm7899_vm1, %v7898_v38  ;;  %v4499_v17 = vld [vmem:[%s8991_s18 + $0x10] sm:$0xff] }
0x1285   :  { %7234 = vmatprep.subr.mxu0 %v7898_v38 }
0x1286   :  { %v3612_v34 = vpop.xlane.xlu1 %3611 }
0x1287   :  { %7570 = vrcp.f32 %v3612_v34  ;;  %v4086_v36 = vpop.permute.xlu0 %4085 }
0x1288   :  { %v7563_v59 = vpop.eup %7562 }
0x1289   :  { %v3623_v39 = vmul.f32 %v7563_v59, %v7547_v1 }
0x128a   :  { %v4162_v33 = vpop.permute.xlu1 %4161 }
0x128b   :  { %7212 = vmatmul.mubr.msk.f32.vlgmr.msra.gmra.mxu1 %vm554_vm2, %v3623_v39 }
0x128c   :  { %v7565_v26 = vpop.eup %7564  ;;  %7220 = vmatpush3.msra.mxu1 %v3934_v13  ;;  %7221 = vmatprep.mubr.msk.f32.mxu1 %vm7899_vm1, %v7898_v38 }
0x128d   :  { %v7567_v41 = vpop.eup %7566  ;;  %7229 = vmatprep.subr.mxu1 %v7898_v38  ;;  %v3626_v42 = vmul.f32 %v7565_v26, %v7549_v3 }
0x128e   :  { %v3625_v29 = vmul.f32 %v7567_v41, %v7551_v4 }
0x128f   :  { %7227 = vmatmul.mubr.msk.f32.vlgmr.msra.gmra.mxu0 %vm554_vm2, %v3626_v42 }
0x1290   :  { %7222 = vmatmul.mubr.msk.f32.vlgmr.msra.gmra.mxu1 %vm554_vm2, %v3625_v29  ;;  %7235 = vmatpush3.msra.mxu0 %v4162_v33 }
0x1291   :  { %v7569_v32 = vpop.eup %7568  ;;  %7230 = vmatpush3.msra.mxu1 %v4086_v36  ;;  %7231 = vmatprep.mubr.msk.f32.mxu1 %vm7899_vm1, %v7898_v38 }
0x1292   :  { %v3627_v45 = vmul.f32 %v7569_v32, %v8605_v7  ;;  %7236 = vmatprep.mubr.msk.f32.mxu0 %vm7899_vm1, %v7898_v38  ;;  %7239 = vmatprep.subr.mxu1 %v4270_v55 }
0x1294   :  { %v7571_v56 = vpop.eup %7570  ;;  %7232 = vmatmul.mubr.msk.f32.vlgmr.msra.gmra.mxu1 %vm554_vm2, %v3627_v45  ;;  %v4408_v45 = vld [vmem:[%s8994_s26 + $0x18] sm:$0xff] }
0x1295   :  { %v3628_v47 = vmul.f32 %v7571_v56, %v8609_v11  ;;  %7240 = vmatpush3.msra.mxu1 %v4270_v55  ;;  %v4407_v56 = vld [vmem:[%s8994_s26 + $0x10] sm:$0xff]  ;;  %7250 = vmatprep.subr.mxu0 %v4408_v45 }
0x1296   :  { %7241 = vmatprep.subr.mxu1 %v4269_v57 }
0x1297   :  { %7237 = vmatmul.mubr.msk.f32.vlgmr.msra.gmra.mxu0 %vm554_vm2, %v3628_v47  ;;  %7242 = vmatpush3.msra.mxu1 %v4269_v57  ;;  %v4406_v47 = vld [vmem:[%s8994_s26 + $0x8] sm:$0xff] }
0x1298   :  { %7243 = vmatprep.subr.mxu1 %v4268_v58  ;;  %7251 = vmatpush3.msra.mxu0 %v4408_v45 }
0x1299   :  { %7244 = vmatpush3.msra.mxu1 %v4268_v58  ;;  %7252 = vmatprep.subr.mxu0 %v4407_v56 }
0x129a   :  { %7245 = vmatprep.subr.mxu1 %v4267_v60  ;;  %7253 = vmatpush3.msra.mxu0 %v4407_v56 }
0x129b   :  { %7246 = vmatpush3.msra.mxu1 %v4267_v60  ;;  %7254 = vmatprep.subr.mxu0 %v4406_v47  ;;  %v6718_v60 = vld [vmem:[%s8995_s30] ss:$0 sm:$0xff] }
0x129c   :  { %7261 = vmatprep.subr.mxu1 %v4500_v50  ;;  %7255 = vmatpush3.msra.mxu0 %v4406_v47 }
0x12ef   :  { %v3701_v37 = vpop.f32.mrf.mxu1 }
0x12f1   :  { %v7203_v48 = vpop.f32.mrf.mxu1 }
0x12fb   :  { %v3777_v35 = vpop.f32.mrf.mxu0 }
0x12fd   :  { %v7208_v51 = vpop.f32.mrf.mxu0 }
0x1343   :  { %v3929_v54 = vpop.f32.mrf.mxu0 }
0x1344   :  { %4253 = vrot.lane.b32.xlu0 %v3929_v54, %s7904_s8 }
0x1345   :  { %v7218_v43 = vpop.f32.mrf.mxu0 }
0x134b   :  { %v3853_v46 = vpop.f32.mrf.mxu1 }
0x134c   :  { %4238 = vrot.lane.b32.xlu0 %v3853_v46, %s7904_s8 }
0x134d   :  { %v7213_v52 = vpop.f32.mrf.mxu1 }
0x134f   :  { %v4081_v49 = vpop.f32.mrf.mxu0 }
0x1350   :  { %v4005_v61 = vpop.f32.mrf.mxu1  ;;  %4257 = vrot.lane.b32.xlu0 %v4081_v49, %s7905_s24 }
0x1351   :  { %4242 = vrot.lane.b32.xlu1 %v4005_v61, %s7905_s24  ;;  %v7228_v53 = vpop.f32.mrf.mxu0 }
0x1352   :  { %v7223_v62 = vpop.f32.mrf.mxu1 }
0x1354   :  { %v4157_v63 = vpop.f32.mrf.mxu1 }
0x1355   :  { %4246 = vrot.lane.b32.xlu1 %v4157_v63, %s7906_s4 }
0x1356   :  { %v7233_v0 = vpop.f32.mrf.mxu1 }
0x1357   :  { %v4233_v1 = vpop.f32.mrf.mxu0  ;;  %v6720_v0 = vld [vmem:[%s8997_s19] ss:$0 sm:$0xff] }
0x1359   :  { %4261 = vrot.lane.b32.xlu1 %v4233_v1, %s7906_s4  ;;  %v7238_v2 = vpop.f32.mrf.mxu0 }
0x13b6   :  { %v4254_v3 = vpop.permute.xlu0 %4253 }
0x13b7   :  { %v4264_v13 = vsel %vm554_vm2, %v3777_v35, %v4254_v3 }
0x13be   :  { %v4239_v4 = vpop.permute.xlu0 %4238 }
0x13bf   :  { %v4249_v6 = vsel %vm554_vm2, %v3701_v37, %v4239_v4  ;;  %v4405_v37 = vld [vmem:[%s8994_s26] sm:$0xff] }
0x13c0   :  { %7256 = vmatprep.subr.mxu0 %v4405_v37 }
0x13c1   :  { %7257 = vmatpush3.msra.mxu0 %v4405_v37 }
0x13c2   :  { %v4258_v11 = vpop.permute.xlu0 %4257  ;;  %7272 = vmatprep.subr.mxu0 %v7898_v38 }
0x13c3   :  { %v4243_v5 = vpop.permute.xlu1 %4242  ;;  %v4265_v14 = vsel %vm1920_vm3, %v4264_v13, %v4258_v11 }
0x13c4   :  { %v4250_v7 = vsel %vm1920_vm3, %v4249_v6, %v4243_v5 }
0x13c7   :  { %v4247_v10 = vpop.permute.xlu1 %4246 }
0x13c8   :  { %v4251_v12 = vsel %vm1922_vm4, %v4250_v7, %v4247_v10 }
0x13c9   :  { %7247 = vmatprep.mubr.msk.f32.mxu1 %vm302_vm0, %v4251_v12 }
0x13cb   :  { %v4262_v15 = vpop.permute.xlu1 %4261 }
0x13cc   :  { %v4266_v16 = vsel %vm1922_vm4, %v4265_v14, %v4262_v15 }
0x13cd   :  { %7248 = vmatmul.mubr.msk.f32.vlgmr.msra.gmra.mxu1 %vm302_vm0, %v4266_v16 }
0x13ce   :  { %7262 = vmatpush3.msra.mxu1 %v4500_v50  ;;  %7269 = vmatprep.mubr.msk.f32.mxu1 %vm302_vm0, %v8431_v9  ;;  %v6719_v50 = vld [vmem:[%s8996_s28] ss:$0 sm:$0xff] }
0x13cf   :  { %7263 = vmatprep.subr.mxu1 %v4499_v17 }
0x13d0   :  { %7264 = vmatpush3.msra.mxu1 %v4499_v17 }
0x13d1   :  { %7265 = vmatprep.subr.mxu1 %v4498_v18 }
0x13d2   :  { %7266 = vmatpush3.msra.mxu1 %v4498_v18 }
0x13d3   :  { %7267 = vmatprep.subr.mxu1 %v4497_v19 }
0x13d4   :  { %7268 = vmatpush3.msra.mxu1 %v4497_v19 }
0x13d5   :  { %7270 = vmatmul.mubr.msk.f32.vlgmr.msra.gmra.mxu1 %vm302_vm0, %v8429_v8  ;;  %7282 = vmatprep.subr.mxu1 %v7898_v38 }
0x13d6   :  { %7284 = vmatprep.mubr.msk.f32.mxu1 %vm7899_vm1, %v7898_v38 }
0x148d   :  { %v7249_v40 = vpop.f32.mrf.mxu1 }
0x148e   :  { %v4356_v9 = vadd.f32 %v7249_v40, %v6715_v22  ;;  %v7620_v40 = vld [vmem:[%s7929_s13] ss:$0 sm:$0xff] }
0x148f   :  { %v4350_v44 = vpop.f32.mrf.mxu1 }
0x1490   :  { %v4360_v23 = vadd.f32 %v4356_v9, %v8473_v21  ;;  %v4351_v24 = vadd.f32 %v6715_v22, %v4350_v44 }
0x1492   :  { %v4359_v25 = vadd.f32 %v4351_v24, %v8471_v20  ;;  %v4364_v27 = vsel %vm302_vm0, %v4360_v23, 0.0 }
0x1493   :  { %4365 = vadd.xlane.f32.xlu1 %v4364_v27  ;;  %v7621_v27 = vld [vmem:[%s7929_s13 + $0x1] ss:$0 sm:$0xff] }
0x1494   :  { %v4361_v28 = vsel %vm302_vm0, %v4359_v25, 0.0 }
0x1495   :  { %4362 = vadd.xlane.f32.xlu0 %v4361_v28  ;;  %v7271_v8 = vpop.f32.mrf.mxu1 }
0x1496   :  { %v8680_v31 = vadd.f32 %v7271_v8, %v6723_v30 }
0x1497   :  { %v4579_v36 = vpop.f32.mrf.mxu1 }
0x1498   :  { %v8688_v32 = vadd.f32 %v6723_v30, %v4579_v36 }
0x14a4   :  { %4606 = vrot.lane.b32.xlu1 %v8680_v31, %s7900_s5 }
0x14a8   :  { %4610 = vrot.lane.b32.xlu1 %v8680_v31, %s7901_s17 }
0x151c   :  { %v4366_v21 = vpop.xlane.xlu1 %4365 }
0x151d   :  { %v4368_v20 = vmul.f32 0.03125, %v4366_v21 }
0x151e   :  { %v4363_v34 = vpop.xlane.xlu0 %4362 }
0x151f   :  { %v4367_v59 = vmul.f32 0.03125, %v4363_v34  ;;  %v4370_v39 = vsub.f32 %v4360_v23, %v4368_v20  ;;  %v7622_v34 = vld [vmem:[%s7929_s13 + $0x3] ss:$0 sm:$0xff] }
0x1520   :  { %v8731_v5 = vpop.permute.xlu1 %4606 }
0x1521   :  { %v4369_v26 = vsub.f32 %v4359_v25, %v4367_v59  ;;  %v4372_v29 = vmul.f32 %v4370_v39, %v4370_v39 }
0x1523   :  { %v4371_v41 = vmul.f32 %v4369_v26, %v4369_v26  ;;  %v4376_v33 = vsel %vm302_vm0, %v4372_v29, 0.0  ;;  %v7623_v29 = vld [vmem:[%s7929_s13 + $0x2] ss:$0 sm:$0xff] }
0x1524   :  { %v8744_v6 = vpop.permute.xlu1 %4610 }
0x1525   :  { %v4373_v42 = vsel %vm302_vm0, %v4371_v41, 0.0 }
0x1526   :  { %4374 = vadd.xlane.f32.xlu0 %v4373_v42 }
0x152a   :  { %4377 = vadd.xlane.f32.xlu0 %v4376_v33 }
0x1540   :  { %4604 = vrot.lane.b32.xlu0 %v8688_v32, %s7900_s5 }
0x1544   :  { %4608 = vrot.lane.b32.xlu0 %v8688_v32, %s7901_s17 }
0x1548   :  { %4612 = vrot.lane.b32.xlu0 %v8688_v32, %s7902_s25 }
0x15af   :  { %v4375_v48 = vpop.xlane.xlu0 %4374 }
0x15b0   :  { %v4379_v35 = vmul.f32 0.03125, %v4375_v48 }
0x15b2   :  { %v4381_v51 = vadd.f32 1e-05, %v4379_v35 }
0x15b3   :  { %v4378_v54 = vpop.xlane.xlu0 %4377 }
0x15b4   :  { %7572 = vrsqrt.f32 %v4381_v51  ;;  %v4380_v55 = vmul.f32 0.03125, %v4378_v54  ;;  %v7624_v51 = vld [vmem:[%s7929_s13 + $0x4] ss:$0 sm:$0xff] }
0x15b6   :  { %v4382_v57 = vadd.f32 1e-05, %v4380_v55  ;;  %v7625_v55 = vld [vmem:[%s7929_s13 + $0x5] ss:$0 sm:$0xff] }
0x15b7   :  { %v8701_v43 = vpop.permute.xlu0 %4604 }
0x15b8   :  { %7574 = vrsqrt.f32 %v4382_v57  ;;  %7283 = vmatpush3.xpose.msk.msra.mxu1 %vm554_vm2, %v8701_v43 }
0x15b9   :  { %7292 = vmatprep.subr.mxu1 %v7898_v38 }
0x15bb   :  { %v8746_v7 = vpop.permute.xlu0 %4608 }
0x15bf   :  { %v8749_v11 = vpop.permute.xlu0 %4612 }
0x15c1   :  { %v7573_v58 = vpop.eup %7572 }
0x15c2   :  { %v4385_v46 = vmul.f32 %v7573_v58, %v4369_v26 }
0x15c4   :  { %v4394_v52 = vmul.f32 %v6718_v60, %v4385_v46 }
0x15c5   :  { %v7575_v49 = vpop.eup %7574 }
0x15c6   :  { %v4386_v61 = vmul.f32 %v7575_v49, %v4370_v39  ;;  %v8708_v53 = vadd.f32 %v6719_v50, %v4394_v52  ;;  %v7626_v49 = vld [vmem:[%s7929_s13 + $0x6] ss:$0 sm:$0xff] }
0x15c8   :  { %v4395_v62 = vmul.f32 %v6718_v60, %v4386_v61  ;;  %7258 = vmatprep.mubr.msk.f32.mxu0 %vm302_vm0, %v8708_v53 }
0x15ca   :  { %v8712_v63 = vadd.f32 %v6719_v50, %v4395_v62 }
0x15cc   :  { %7259 = vmatmul.mubr.msk.f32.vlgmr.msra.gmra.mxu0 %vm302_vm0, %v8712_v63 }
0x15cd   :  { %7273 = vmatpush3.xpose.msk.msra.mxu0 %vm554_vm2, %v8688_v32  ;;  %7274 = vmatprep.mubr.msk.f32.mxu0 %vm7899_vm1, %v7898_v38 }
0x15ce   :  { %7277 = vmatprep.subr.mxu0 %v7898_v38 }
0x168c   :  { %v7260_v1 = vpop.f32.mrf.mxu0 }
0x168d   :  { %v4494_v2 = vadd.f32 %v7260_v1, %v6720_v0 }
0x168e   :  { %v4488_v3 = vpop.f32.mrf.mxu0 }
0x168f   :  { %v4489_v4 = vadd.f32 %v6720_v0, %v4488_v3  ;;  %4592 = vrot.lane.b32.xlu1 %v4494_v2, %s7900_s5  ;;  %v7627_v3 = vld [vmem:[%s7929_s13 + $0x7] ss:$0 sm:$0xff]  ;;  %s8998_s13 = sld [smem:[#allocation32_spill]] }
0x1691   :  { %4594 = vrot.lane.b32.xlu0 %v4489_v4, %s7901_s17  ;;  %7275 = vmatmul.mubr.msk.f32.vlgmr.msra.gmra.mxu0 %vm554_vm2, %v4489_v4 }
0x1692   :  { %7278 = vmatpush3.xpose.msk.msra.mxu0 %vm554_vm2, %v8680_v31  ;;  %7279 = vmatprep.mubr.msk.f32.mxu0 %vm7899_vm1, %v7898_v38 }
0x1693   :  { %4590 = vrot.lane.b32.xlu1 %v4489_v4, %s7900_s5  ;;  %7287 = vmatprep.subr.mxu0 %v7898_v38  ;;  %s8999_s5 = sld [smem:[#allocation29_spill]] }
0x1695   :  { %4598 = vrot.lane.b32.xlu0 %v4489_v4, %s7902_s25  ;;  %7280 = vmatmul.mubr.msk.f32.vlgmr.msra.gmra.mxu0 %vm554_vm2, %v4494_v2 }
0x1696   :  { %7288 = vmatpush3.xpose.msk.msra.mxu0 %vm554_vm2, %v8731_v5  ;;  %7289 = vmatprep.mubr.msk.f32.mxu0 %vm7899_vm1, %v7898_v38 }
0x1697   :  { %4596 = vrot.lane.b32.xlu1 %v4494_v2, %s7901_s17  ;;  %7297 = vmatprep.subr.mxu0 %v7898_v38  ;;  %s9000_s17 = sld [smem:[#allocation35_spill]] }
0x169b   :  { %4614 = vrot.lane.b32.xlu1 %v8680_v31, %s7902_s25 }
0x169f   :  { %4600 = vrot.lane.b32.xlu1 %v4494_v2, %s7902_s25  ;;  %s9001_s25 = sld [smem:[#allocation41_spill]] }
0x1701   :  { %v4593_v10 = vpop.permute.xlu1 %4592 }
0x1702   :  { %7290 = vmatmul.mubr.msk.f32.vlgmr.msra.gmra.mxu0 %vm554_vm2, %v4593_v10 }
0x1703   :  { %7298 = vmatpush3.xpose.msk.msra.mxu0 %vm554_vm2, %v8744_v6  ;;  %7299 = vmatprep.mubr.msk.f32.mxu0 %vm7899_vm1, %v7898_v38  ;;  %v4595_v13 = vpop.permute.xlu0 %4594 }
0x1704   :  { %7307 = vmatprep.subr.mxu0 %v7898_v38 }
0x1705   :  { %v4591_v12 = vpop.permute.xlu1 %4590 }
0x1706   :  { %7285 = vmatmul.mubr.msk.f32.vlgmr.msra.gmra.mxu1 %vm554_vm2, %v4591_v12 }
0x1707   :  { %7293 = vmatpush3.xpose.msk.msra.mxu1 %vm554_vm2, %v8746_v7  ;;  %7294 = vmatprep.mubr.msk.f32.mxu1 %vm7899_vm1, %v7898_v38  ;;  %v4599_v15 = vpop.permute.xlu0 %4598 }
0x1708   :  { %7302 = vmatprep.subr.mxu1 %v7898_v38 }
0x1709   :  { %v4597_v14 = vpop.permute.xlu1 %4596 }
0x170a   :  { %7295 = vmatmul.mubr.msk.f32.vlgmr.msra.gmra.mxu1 %vm554_vm2, %v4595_v13  ;;  %7300 = vmatmul.mubr.msk.f32.vlgmr.msra.gmra.mxu0 %vm554_vm2, %v4597_v14 }
0x170b   :  { %7303 = vmatpush3.xpose.msk.msra.mxu1 %vm554_vm2, %v8749_v11  ;;  %7304 = vmatprep.mubr.msk.f32.mxu1 %vm7899_vm1, %v7898_v38 }
0x170c   :  { %7309 = vmatprep.mubr.msk.f32.mxu0 %vm7899_vm1, %v7898_v38  ;;  %7312 = vmatprep.subr.mxu1 %v7898_v38 }
0x170d   :  { %v8771_v16 = vpop.permute.xlu1 %4614 }
0x170e   :  { %7305 = vmatmul.mubr.msk.f32.vlgmr.msra.gmra.mxu1 %vm554_vm2, %v4599_v15  ;;  %7308 = vmatpush3.xpose.msk.msra.mxu0 %vm554_vm2, %v8771_v16 }
0x170f   :  { %7317 = vmatprep.subr.mxu0 %v7898_v38  ;;  %7314 = vmatprep.mubr.msk.f32.mxu1 %vm7899_vm1, %v7898_v38 }
0x1711   :  { %v4601_v17 = vpop.permute.xlu1 %4600 }
0x1712   :  { %7310 = vmatmul.mubr.msk.f32.vlgmr.msra.gmra.mxu0 %vm554_vm2, %v4601_v17 }
0x1713   :  { %7319 = vmatprep.mubr.msk.f32.mxu0 %vm7899_vm1, %v7898_v38 }
0x1751   :  { %v4686_v18 = vpop.f32.mrf.mxu0 }
0x1752   :  { %v5208_v19 = vmul.f32 0.35355338, %v4686_v18 }
0x1753   :  { %v7276_v22 = vpop.f32.mrf.mxu0 }
0x1754   :  { %v5216_v9 = vadd.f32 %v7620_v40, %v5208_v19 }
0x1755   :  { %v4760_v44 = vpop.f32.mrf.mxu0 }
0x1756   :  { %v5209_v23 = vmul.f32 0.35355338, %v4760_v44  ;;  %v5224_v24 = vsel %vm554_vm2, %v5216_v9, -inf }
0x1757   :  { %5225 = vmax.xlane.f32.xlu0 %v5224_v24  ;;  %v7281_v25 = vpop.f32.mrf.mxu0 }
0x1758   :  { %v5217_v28 = vadd.f32 %v7621_v27, %v5209_v23 }
0x175a   :  { %v5227_v8 = vsel %vm554_vm2, %v5217_v28, -inf }
0x175b   :  { %5228 = vmax.xlane.f32.xlu1 %v5227_v8 }
0x17c2   :  { %v4908_v30 = vpop.f32.mrf.mxu0 }
0x17c3   :  { %v5211_v21 = vmul.f32 0.35355338, %v4908_v30 }
0x17c4   :  { %v7291_v20 = vpop.f32.mrf.mxu0 }
0x17c5   :  { %v5219_v59 = vadd.f32 %v7622_v34, %v5211_v21 }
0x17c6   :  { %v4834_v39 = vpop.f32.mrf.mxu1 }
0x17c7   :  { %v5210_v26 = vmul.f32 0.35355338, %v4834_v39  ;;  %v5233_v41 = vsel %vm554_vm2, %v5219_v59, -inf }
0x17c8   :  { %5234 = vmax.xlane.f32.xlu0 %v5233_v41  ;;  %v7286_v42 = vpop.f32.mrf.mxu1 }
0x17c9   :  { %v5218_v33 = vadd.f32 %v7623_v29, %v5210_v26 }
0x17ca   :  { %v4982_v36 = vpop.f32.mrf.mxu1  ;;  %v5056_v45 = vpop.f32.mrf.mxu0 }
0x17cb   :  { %v5212_v56 = vmul.f32 0.35355338, %v4982_v36  ;;  %v5213_v47 = vmul.f32 0.35355338, %v5056_v45  ;;  %v5230_v37 = vsel %vm554_vm2, %v5218_v33, -inf }
0x17cc   :  { %v7301_v48 = vpop.f32.mrf.mxu0  ;;  %5231 = vmax.xlane.f32.xlu0 %v5230_v37  ;;  %v7296_v35 = vpop.f32.mrf.mxu1 }
0x17cd   :  { %v5220_v54 = vadd.f32 %v7624_v51, %v5212_v56  ;;  %v5221_v57 = vadd.f32 %v7625_v55, %v5213_v47 }
0x17ce   :  { %v5130_v58 = vpop.f32.mrf.mxu1 }
0x17cf   :  { %v5214_v60 = vmul.f32 0.35355338, %v5130_v58  ;;  %v5239_v46 = vsel %vm554_vm2, %v5221_v57, -inf  ;;  %v5236_v50 = vsel %vm554_vm2, %v5220_v54, -inf }
0x17d0   :  { %5240 = vmax.xlane.f32.xlu1 %v5239_v46  ;;  %5237 = vmax.xlane.f32.xlu0 %v5236_v50  ;;  %v7306_v52 = vpop.f32.mrf.mxu1 }
0x17d1   :  { %v5222_v61 = vadd.f32 %v7626_v49, %v5214_v60 }
0x17d2   :  { %v5204_v62 = vpop.f32.mrf.mxu0 }
0x17d3   :  { %v5215_v0 = vmul.f32 0.35355338, %v5204_v62  ;;  %v5242_v1 = vsel %vm554_vm2, %v5222_v61, -inf }
0x17d4   :  { %v7311_v2 = vpop.f32.mrf.mxu0  ;;  %5243 = vmax.xlane.f32.xlu0 %v5242_v1 }
0x17d5   :  { %v5223_v4 = vadd.f32 %v7627_v3, %v5215_v0 }
0x17d7   :  { %v5245_v10 = vsel %vm554_vm2, %v5223_v4, -inf }
0x17d8   :  { %5246 = vmax.xlane.f32.xlu1 %v5245_v10 }
0x17e0   :  { %v5226_v12 = vpop.xlane.xlu0 %5225 }
0x17e1   :  { %v5248_v13 = vsub.f32 %v5216_v9, %v5226_v12 }
0x17e3   :  { %v5256_v14 = vmul.f32 1.442695, %v5248_v13 }
0x17e5   :  { %7576 = vpow2.f32 %v5256_v14 }
0x17e9   :  { %5388 = vrot.lane.b32.xlu1 %v8680_v31, %s7903_s29  ;;  %v5229_v31 = vpop.xlane.xlu1 %5228 }
0x17ea   :  { %5312 = vrot.lane.b32.xlu0 %v8688_v32, %s7903_s29  ;;  %v5249_v15 = vsub.f32 %v5217_v28, %v5229_v31 }
0x17ec   :  { %v5258_v17 = vmul.f32 1.442695, %v5249_v15 }
0x17ed   :  { %5464 = vrot.lane.b32.xlu1 %v8701_v43, %s7903_s29 }
0x17ee   :  { %5616 = vrot.lane.b32.xlu0 %v8746_v7, %s7903_s29  ;;  %7578 = vpow2.f32 %v5258_v17 }
0x17f1   :  { %5540 = vrot.lane.b32.xlu1 %v8731_v5, %s7903_s29 }
0x17f2   :  { %v8810_v32 = vpop.eup %7576 }
0x17f3   :  { %v5272_v43 = vsel %vm554_vm2, %v8810_v32, 0.0 }
0x17f5   :  { %5692 = vrot.lane.b32.xlu1 %v8744_v6, %s7903_s29 }
0x17fb   :  { %v8814_v7 = vpop.eup %7578 }
0x17fc   :  { %v5275_v5 = vsel %vm554_vm2, %v8814_v7, 0.0 }
0x180d   :  { %5273 = vadd.xlane.f32.xlu0 %v5272_v43 }
0x1819   :  { %5276 = vadd.xlane.f32.xlu1 %v5275_v5 }
0x1851   :  { %v5235_v18 = vpop.xlane.xlu0 %5234 }
0x1852   :  { %v5251_v6 = vsub.f32 %v5219_v59, %v5235_v18 }
0x1854   :  { %v5262_v19 = vmul.f32 1.442695, %v5251_v6 }
0x1855   :  { %v5232_v22 = vpop.xlane.xlu0 %5231 }
0x1856   :  { %7580 = vpow2.f32 %v5262_v19  ;;  %v5250_v40 = vsub.f32 %v5218_v33, %v5232_v22 }
0x1858   :  { %v5260_v9 = vmul.f32 1.442695, %v5250_v40 }
0x1859   :  { %v5241_v44 = vpop.xlane.xlu1 %5240  ;;  %v5238_v23 = vpop.xlane.xlu0 %5237 }
0x185a   :  { %7582 = vpow2.f32 %v5260_v9  ;;  %v5253_v24 = vsub.f32 %v5221_v57, %v5241_v44  ;;  %v5252_v25 = vsub.f32 %v5220_v54, %v5238_v23  ;;  %v5953_v9 = vld [vmem:[%s8998_s13 + $0x18] sm:$0xff]  ;;  %v5952_v44 = vld [vmem:[%s8998_s13 + $0x10] sm:$0xff] }
0x185c   :  { %v5266_v27 = vmul.f32 1.442695, %v5253_v24  ;;  %v5264_v28 = vmul.f32 1.442695, %v5252_v25  ;;  %v5950_v25 = vld [vmem:[%s8998_s13] sm:$0xff] }
0x185d   :  { %v5244_v8 = vpop.xlane.xlu0 %5243 }
0x185e   :  { %7584 = vpow2.f32 %v5266_v27  ;;  %v5254_v30 = vsub.f32 %v5222_v61, %v5244_v8 }
0x185f   :  { %7586 = vpow2.f32 %v5264_v28 }
0x1860   :  { %v5268_v21 = vmul.f32 1.442695, %v5254_v30 }
0x1861   :  { %v5247_v20 = vpop.xlane.xlu1 %5246  ;;  %v5313_v34 = vpop.permute.xlu0 %5312 }
0x1862   :  { %7588 = vpow2.f32 %v5268_v21  ;;  %v5255_v59 = vsub.f32 %v5223_v4, %v5247_v20  ;;  %7313 = vmatpush3.msra.mxu1 %v5313_v34 }
0x1863   :  { %v7581_v39 = vpop.eup %7580  ;;  %7322 = vmatprep.subr.mxu1 %v7898_v38 }
0x1864   :  { %v5270_v26 = vmul.f32 1.442695, %v5255_v59  ;;  %v5281_v41 = vsel %vm554_vm2, %v7581_v39, 0.0 }
0x1865   :  { %v5389_v42 = vpop.permute.xlu1 %5388  ;;  %5282 = vadd.xlane.f32.xlu1 %v5281_v41  ;;  %v5617_v54 = vpop.permute.xlu0 %5616 }
0x1866   :  { %7590 = vpow2.f32 %v5270_v26  ;;  %7318 = vmatpush3.msra.mxu0 %v5389_v42 }
0x1867   :  { %v7583_v29 = vpop.eup %7582  ;;  %7327 = vmatprep.subr.mxu0 %v7898_v38 }
0x1868   :  { %v5278_v33 = vsel %vm554_vm2, %v7583_v29, 0.0 }
0x1869   :  { %5279 = vadd.xlane.f32.xlu0 %v5278_v33  ;;  %v5465_v55 = vpop.permute.xlu1 %5464 }
0x186b   :  { %v7585_v36 = vpop.eup %7584 }
0x186c   :  { %v7587_v45 = vpop.eup %7586  ;;  %v5287_v56 = vsel %vm554_vm2, %v7585_v36, 0.0 }
0x186d   :  { %5288 = vadd.xlane.f32.xlu1 %v5287_v56  ;;  %v5284_v47 = vsel %vm554_vm2, %v7587_v45, 0.0  ;;  %v5541_v58 = vpop.permute.xlu1 %5540 }
0x186e   :  { %5285 = vadd.xlane.f32.xlu0 %v5284_v47 }
0x186f   :  { %v8824_v37 = vpop.eup %7588 }
0x1870   :  { %v5290_v48 = vsel %vm554_vm2, %v8824_v37, 0.0 }
0x1871   :  { %v5693_v60 = vpop.permute.xlu1 %5692 }
0x1872   :  { %5291 = vadd.xlane.f32.xlu0 %v5290_v48 }
0x1873   :  { %v8828_v35 = vpop.eup %7590 }
0x1874   :  { %v5293_v51 = vsel %vm554_vm2, %v8828_v35, 0.0 }
0x1875   :  { %5294 = vadd.xlane.f32.xlu1 %v5293_v51 }
0x1886   :  { %5844 = vrot.lane.b32.xlu1 %v8771_v16, %s7903_s29 }
0x1888   :  { %5768 = vrot.lane.b32.xlu0 %v8749_v11, %s7903_s29  ;;  %s9002_s29 = sld [smem:[#allocation40_spill]] }
0x1896   :  { %v5274_v57 = vpop.xlane.xlu0 %5273 }
0x1897   :  { %7592 = vrcp.f32 %v5274_v57 }
0x18a2   :  { %v5277_v46 = vpop.xlane.xlu1 %5276 }
0x18a3   :  { %7594 = vrcp.f32 %v5277_v46 }
0x18a4   :  { %v7593_v50 = vpop.eup %7592 }
0x18a5   :  { %v5304_v52 = vmul.f32 %v7593_v50, %v8810_v32 }
0x18a7   :  { %7315 = vmatmul.mubr.msk.f32.vlgmr.msra.gmra.mxu1 %vm554_vm2, %v5304_v52 }
0x18a8   :  { %7323 = vmatpush3.msra.mxu1 %v5465_v55  ;;  %7324 = vmatprep.mubr.msk.f32.mxu1 %vm7899_vm1, %v7898_v38 }
0x18a9   :  { %7332 = vmatprep.subr.mxu1 %v7898_v38 }
0x18b0   :  { %v7595_v11 = vpop.eup %7594 }
0x18b1   :  { %v5305_v16 = vmul.f32 %v7595_v11, %v8814_v7 }
0x18b3   :  { %7320 = vmatmul.mubr.msk.f32.vlgmr.msra.gmra.mxu0 %vm554_vm2, %v5305_v16 }
0x18b4   :  { %7328 = vmatpush3.msra.mxu0 %v5541_v58  ;;  %7329 = vmatprep.mubr.msk.f32.mxu0 %vm7899_vm1, %v7898_v38 }
0x18b5   :  { %7337 = vmatprep.subr.mxu0 %v7898_v38 }
0x18ee   :  { %v5283_v49 = vpop.xlane.xlu1 %5282 }
0x18ef   :  { %7596 = vrcp.f32 %v5283_v49 }
0x18f2   :  { %v5280_v61 = vpop.xlane.xlu0 %5279 }
0x18f3   :  { %7598 = vrcp.f32 %v5280_v61 }
0x18f6   :  { %v5289_v62 = vpop.xlane.xlu1 %5288 }
0x18f7   :  { %7600 = vrcp.f32 %v5289_v62  ;;  %v5286_v0 = vpop.xlane.xlu0 %5285 }
0x18f8   :  { %7602 = vrcp.f32 %v5286_v0 }
0x18fb   :  { %v5292_v1 = vpop.xlane.xlu0 %5291 }
0x18fc   :  { %v7597_v2 = vpop.eup %7596  ;;  %7604 = vrcp.f32 %v5292_v1 }
0x18fd   :  { %v5307_v3 = vmul.f32 %v7597_v2, %v7581_v39 }
0x18fe   :  { %v5295_v4 = vpop.xlane.xlu1 %5294 }
0x18ff   :  { %7606 = vrcp.f32 %v5295_v4  ;;  %7330 = vmatmul.mubr.msk.f32.vlgmr.msra.gmra.mxu0 %vm554_vm2, %v5307_v3  ;;  %v5769_v32 = vpop.permute.xlu0 %5768  ;;  %v6091_v4 = vld [vmem:[%s9000_s17 + $0x18] sm:$0xff] }
0x1900   :  { %v7599_v10 = vpop.eup %7598  ;;  %7338 = vmatpush3.msra.mxu0 %v5693_v60  ;;  %7339 = vmatprep.mubr.msk.f32.mxu0 %vm7899_vm1, %v7898_v38 }
0x1901   :  { %v5306_v12 = vmul.f32 %v7599_v10, %v7583_v29  ;;  %7347 = vmatprep.subr.mxu0 %v7898_v38  ;;  %v6090_v10 = vld [vmem:[%s9000_s17 + $0x10] sm:$0xff] }
0x1902   :  { %v5845_v17 = vpop.permute.xlu1 %5844 }
0x1903   :  { %7325 = vmatmul.mubr.msk.f32.vlgmr.msra.gmra.mxu1 %vm554_vm2, %v5306_v12  ;;  %v6089_v12 = vld [vmem:[%s9000_s17 + $0x8] sm:$0xff] }
0x1904   :  { %v7601_v13 = vpop.eup %7600  ;;  %7333 = vmatpush3.msra.mxu1 %v5617_v54  ;;  %7334 = vmatprep.mubr.msk.f32.mxu1 %vm7899_vm1, %v7898_v38  ;;  %v6750_v54 = vld [vmem:[%s8999_s5] ss:$0 sm:$0xff] }
0x1905   :  { %v7603_v14 = vpop.eup %7602  ;;  %7342 = vmatprep.subr.mxu1 %v7898_v38  ;;  %v5309_v31 = vmul.f32 %v7601_v13, %v7585_v36  ;;  %v6088_v13 = vld [vmem:[%s9000_s17] sm:$0xff] }
0x1906   :  { %v5308_v15 = vmul.f32 %v7603_v14, %v7587_v45 }
0x1907   :  { %7340 = vmatmul.mubr.msk.f32.vlgmr.msra.gmra.mxu0 %vm554_vm2, %v5309_v31 }
0x1908   :  { %7335 = vmatmul.mubr.msk.f32.vlgmr.msra.gmra.mxu1 %vm554_vm2, %v5308_v15  ;;  %7348 = vmatpush3.msra.mxu0 %v5845_v17 }
0x1909   :  { %v7605_v43 = vpop.eup %7604  ;;  %7343 = vmatpush3.msra.mxu1 %v5769_v32  ;;  %7344 = vmatprep.mubr.msk.f32.mxu1 %vm7899_vm1, %v7898_v38 }
0x190a   :  { %v5310_v7 = vmul.f32 %v7605_v43, %v8824_v37  ;;  %7349 = vmatprep.mubr.msk.f32.mxu0 %vm7899_vm1, %v7898_v38  ;;  %7352 = vmatprep.subr.mxu1 %v5953_v9  ;;  %v5951_v38 = vld [vmem:[%s8998_s13 + $0x8] sm:$0xff] }
0x190b   :  { %7363 = vmatprep.subr.mxu0 %v6091_v4 }
0x190c   :  { %v7607_v5 = vpop.eup %7606  ;;  %7345 = vmatmul.mubr.msk.f32.vlgmr.msra.gmra.mxu1 %vm554_vm2, %v5310_v7 }
0x190d   :  { %v5311_v18 = vmul.f32 %v7607_v5, %v8828_v35  ;;  %7353 = vmatpush3.msra.mxu1 %v5953_v9  ;;  %v6753_v5 = vld [vmem:[%s9001_s25] ss:$0 sm:$0xff] }
0x190e   :  { %7354 = vmatprep.subr.mxu1 %v5952_v44 }
0x190f   :  { %7350 = vmatmul.mubr.msk.f32.vlgmr.msra.gmra.mxu0 %vm554_vm2, %v5311_v18  ;;  %7355 = vmatpush3.msra.mxu1 %v5952_v44 }
0x1910   :  { %7356 = vmatprep.subr.mxu1 %v5951_v38  ;;  %7364 = vmatpush3.msra.mxu0 %v6091_v4 }
0x1911   :  { %7357 = vmatpush3.msra.mxu1 %v5951_v38  ;;  %7365 = vmatprep.subr.mxu0 %v6090_v10 }
0x1912   :  { %7358 = vmatprep.subr.mxu1 %v5950_v25  ;;  %7366 = vmatpush3.msra.mxu0 %v6090_v10 }
0x1913   :  { %7359 = vmatpush3.msra.mxu1 %v5950_v25  ;;  %7367 = vmatprep.subr.mxu0 %v6089_v12 }
0x1914   :  { %7368 = vmatpush3.msra.mxu0 %v6089_v12 }
0x1915   :  { %7369 = vmatprep.subr.mxu0 %v6088_v13 }
0x1916   :  { %7370 = vmatpush3.msra.mxu0 %v6088_v13 }
0x1967   :  { %v5384_v6 = vpop.f32.mrf.mxu1 }
0x1969   :  { %v7316_v19 = vpop.f32.mrf.mxu1 }
0x1973   :  { %v5460_v22 = vpop.f32.mrf.mxu0 }
0x1975   :  { %v7321_v40 = vpop.f32.mrf.mxu0 }
0x19bf   :  { %v5612_v23 = vpop.f32.mrf.mxu0 }
0x19c0   :  { %5936 = vrot.lane.b32.xlu0 %v5612_v23, %s7904_s8 }
0x19c1   :  { %v7331_v24 = vpop.f32.mrf.mxu0 }
0x19c3   :  { %v5536_v27 = vpop.f32.mrf.mxu1 }
0x19c4   :  { %5921 = vrot.lane.b32.xlu0 %v5536_v27, %s7904_s8 }
0x19c5   :  { %v7326_v28 = vpop.f32.mrf.mxu1 }
0x19c7   :  { %v5764_v8 = vpop.f32.mrf.mxu0 }
0x19c8   :  { %v5688_v30 = vpop.f32.mrf.mxu1  ;;  %5940 = vrot.lane.b32.xlu0 %v5764_v8, %s7905_s24 }
0x19c9   :  { %5925 = vrot.lane.b32.xlu1 %v5688_v30, %s7905_s24  ;;  %v7341_v21 = vpop.f32.mrf.mxu0  ;;  %s9003_s24 = sld [smem:[#allocation37_spill]] }
0x19ca   :  { %v7336_v20 = vpop.f32.mrf.mxu1 }
0x19cc   :  { %v5840_v34 = vpop.f32.mrf.mxu1 }
0x19cd   :  { %5929 = vrot.lane.b32.xlu1 %v5840_v34, %s7906_s4 }
0x19ce   :  { %v7346_v59 = vpop.f32.mrf.mxu1 }
0x19cf   :  { %v5916_v39 = vpop.f32.mrf.mxu0  ;;  %v6205_v38 = vld [vmem:[%s9003_s24 + $0x38] sm:$0xff]  ;;  %v6204_v24 = vld [vmem:[%s9003_s24 + $0x30] sm:$0xff]  ;;  %v6203_v25 = vld [vmem:[%s9003_s24 + $0x28] sm:$0xff] }
0x19d0   :  { %7374 = vmatprep.subr.mxu1 %v6205_v38  ;;  %v6202_v27 = vld [vmem:[%s9003_s24 + $0x20] sm:$0xff]  ;;  %v6201_v28 = vld [vmem:[%s9003_s24 + $0x18] sm:$0xff]  ;;  %v6200_v8 = vld [vmem:[%s9003_s24 + $0x10] sm:$0xff] }
0x19d1   :  { %5944 = vrot.lane.b32.xlu1 %v5916_v39, %s7906_s4  ;;  %v7351_v26 = vpop.f32.mrf.mxu0  ;;  %s9004_s4 = sld [smem:[#allocation34_spill]]  ;;  %v6199_v30 = vld [vmem:[%s9003_s24 + $0x8] sm:$0xff]  ;;  %v6198_v21 = vld [vmem:[%s9003_s24] sm:$0xff] }
0x19d7   :  { %v6755_v20 = vld [vmem:[%s9004_s4] ss:$0 sm:$0xff] }
0x1a32   :  { %v5937_v41 = vpop.permute.xlu0 %5936 }
0x1a33   :  { %v5947_v37 = vsel %vm554_vm2, %v5460_v22, %v5937_v41 }
0x1a36   :  { %v5922_v42 = vpop.permute.xlu0 %5921 }
0x1a37   :  { %v5932_v33 = vsel %vm554_vm2, %v5384_v6, %v5922_v42  ;;  %v6754_v6 = vld [vmem:[%s9002_s29] ss:$0 sm:$0xff] }
0x1a3a   :  { %v5941_v56 = vpop.permute.xlu0 %5940 }
0x1a3b   :  { %v5926_v29 = vpop.permute.xlu1 %5925  ;;  %v5948_v48 = vsel %vm1920_vm3, %v5947_v37, %v5941_v56 }
0x1a3c   :  { %v5933_v36 = vsel %vm1920_vm3, %v5932_v33, %v5926_v29 }
0x1a3f   :  { %v5930_v45 = vpop.permute.xlu1 %5929 }
0x1a40   :  { %v5934_v47 = vsel %vm1922_vm4, %v5933_v36, %v5930_v45 }
0x1a41   :  { %7360 = vmatprep.mubr.msk.f32.mxu1 %vm302_vm0, %v5934_v47 }
0x1a43   :  { %v5945_v35 = vpop.permute.xlu1 %5944 }
0x1a44   :  { %v5949_v51 = vsel %vm1922_vm4, %v5948_v48, %v5945_v35 }
0x1a45   :  { %7361 = vmatmul.mubr.msk.f32.vlgmr.msra.gmra.mxu1 %vm302_vm0, %v5949_v51 }
0x1a46   :  { %7375 = vmatpush3.msra.mxu1 %v6205_v38 }
0x1a47   :  { %7376 = vmatprep.subr.mxu1 %v6204_v24 }
0x1a48   :  { %7377 = vmatpush3.msra.mxu1 %v6204_v24 }
0x1a49   :  { %7378 = vmatprep.subr.mxu1 %v6203_v25 }
0x1a4a   :  { %7379 = vmatpush3.msra.mxu1 %v6203_v25 }
0x1a4b   :  { %7380 = vmatprep.subr.mxu1 %v6202_v27 }
0x1a4c   :  { %7381 = vmatpush3.msra.mxu1 %v6202_v27 }
0x1a4d   :  { %7382 = vmatprep.subr.mxu1 %v6201_v28 }
0x1a4e   :  { %7383 = vmatpush3.msra.mxu1 %v6201_v28  ;;  %v6762_v28 = vld [vmem:[%s9007_s27] ss:$0 sm:$0xff] }
0x1a4f   :  { %7384 = vmatprep.subr.mxu1 %v6200_v8 }
0x1a50   :  { %7385 = vmatpush3.msra.mxu1 %v6200_v8 }
0x1a51   :  { %7386 = vmatprep.subr.mxu1 %v6199_v30 }
0x1a52   :  { %7387 = vmatpush3.msra.mxu1 %v6199_v30 }
0x1a53   :  { %7388 = vmatprep.subr.mxu1 %v6198_v21 }
0x1a54   :  { %7389 = vmatpush3.msra.mxu1 %v6198_v21  ;;  %v6434_v21 = vld [vmem:[%s8981_s6] sm:$0xff] }
0x1b05   :  { %v7362_v55 = vpop.f32.mrf.mxu1 }
0x1b06   :  { %v6039_v57 = vadd.f32 %v7362_v55, %v6750_v54 }
0x1b07   :  { %v6033_v58 = vpop.f32.mrf.mxu1 }
0x1b08   :  { %v6043_v60 = vadd.f32 %v6039_v57, %v8712_v63  ;;  %v6034_v46 = vadd.f32 %v6750_v54, %v6033_v58 }
0x1b0a   :  { %v6042_v50 = vadd.f32 %v6034_v46, %v8708_v53  ;;  %v6047_v52 = vsel %vm302_vm0, %v6043_v60, 0.0 }
0x1b0b   :  { %6048 = vadd.xlane.f32.xlu1 %v6047_v52 }
0x1b0c   :  { %v6044_v11 = vsel %vm302_vm0, %v6042_v50, 0.0 }
0x1b0d   :  { %6045 = vadd.xlane.f32.xlu0 %v6044_v11 }
0x1b94   :  { %v6049_v16 = vpop.xlane.xlu1 %6048 }
0x1b95   :  { %v6051_v49 = vmul.f32 0.03125, %v6049_v16 }
0x1b96   :  { %v6046_v61 = vpop.xlane.xlu0 %6045 }
0x1b97   :  { %v6050_v62 = vmul.f32 0.03125, %v6046_v61  ;;  %v6053_v0 = vsub.f32 %v6043_v60, %v6051_v49 }
0x1b99   :  { %v6052_v1 = vsub.f32 %v6042_v50, %v6050_v62  ;;  %v6055_v53 = vmul.f32 %v6053_v0, %v6053_v0  ;;  %v6758_v50 = vld [vmem:[%s9005_s1] ss:$0 sm:$0xff] }
0x1b9b   :  { %v6054_v63 = vmul.f32 %v6052_v1, %v6052_v1  ;;  %v6059_v3 = vsel %vm302_vm0, %v6055_v53, 0.0 }
0x1b9d   :  { %v6056_v2 = vsel %vm302_vm0, %v6054_v63, 0.0 }
0x1b9e   :  { %6057 = vadd.xlane.f32.xlu0 %v6056_v2 }
0x1ba2   :  { %6060 = vadd.xlane.f32.xlu0 %v6059_v3 }
0x1c27   :  { %v6058_v14 = vpop.xlane.xlu0 %6057 }
0x1c28   :  { %v6062_v31 = vmul.f32 0.03125, %v6058_v14 }
0x1c2a   :  { %v6064_v15 = vadd.f32 1e-05, %v6062_v31 }
0x1c2b   :  { %v6061_v17 = vpop.xlane.xlu0 %6060 }
0x1c2c   :  { %7608 = vrsqrt.f32 %v6064_v15  ;;  %v6063_v32 = vmul.f32 0.03125, %v6061_v17  ;;  %v6343_v15 = vld [vmem:[%s8149_s14 + $0x18] sm:$0xff]  ;;  %v6342_v17 = vld [vmem:[%s8149_s14 + $0x10] sm:$0xff] }
0x1c2d   :  { %7393 = vmatprep.subr.mxu0 %v6343_v15 }
0x1c2e   :  { %v6065_v43 = vadd.f32 1e-05, %v6063_v32  ;;  %v6341_v32 = vld [vmem:[%s8149_s14 + $0x8] sm:$0xff] }
0x1c30   :  { %7610 = vrsqrt.f32 %v6065_v43  ;;  %v6340_v43 = vld [vmem:[%s8149_s14] sm:$0xff]  ;;  %s7908_s14 = smov [#allocation16]  }
0x1c39   :  { %v7609_v7 = vpop.eup %7608 }
0x1c3a   :  { %v6068_v18 = vmul.f32 %v7609_v7, %v6052_v1  ;;  %v6436_v7 = vld [vmem:[%s8982_s2] sm:$0x1f] }
0x1c3c   :  { %v6077_v19 = vmul.f32 %v6753_v5, %v6068_v18 }
0x1c3d   :  { %v7611_v22 = vpop.eup %7610 }
0x1c3e   :  { %v6069_v40 = vmul.f32 %v7611_v22, %v6053_v0  ;;  %v6086_v9 = vadd.f32 %v6754_v6, %v6077_v19 }
0x1c40   :  { %v6078_v44 = vmul.f32 %v6753_v5, %v6069_v40  ;;  %7371 = vmatprep.mubr.msk.f32.mxu0 %vm302_vm0, %v6086_v9 }
0x1c42   :  { %v6087_v23 = vadd.f32 %v6754_v6, %v6078_v44 }
0x1c44   :  { %7372 = vmatmul.mubr.msk.f32.vlgmr.msra.gmra.mxu0 %vm302_vm0, %v6087_v23 }
0x1c45   :  { %7394 = vmatpush3.msra.mxu0 %v6343_v15 }
0x1c46   :  { %7395 = vmatprep.subr.mxu0 %v6342_v17 }
0x1c47   :  { %7396 = vmatpush3.msra.mxu0 %v6342_v17 }
0x1c48   :  { %7397 = vmatprep.subr.mxu0 %v6341_v32 }
0x1c49   :  { %7398 = vmatpush3.msra.mxu0 %v6341_v32 }
0x1c4a   :  { %7399 = vmatprep.subr.mxu0 %v6340_v43 }
0x1c4b   :  { %7400 = vmatpush3.msra.mxu0 %v6340_v43 }
0x1c4c   :  { %7404 = vmatprep.subr.msk.mxu0 %vm302_vm0, %v6436_v7 }
0x1d04   :  { %v7373_v34 = vpop.f32.mrf.mxu0 }
0x1d05   :  { %v6177_v59 = vadd.f32 %v7373_v34, %v6755_v20  ;;  %v6763_v34 = vld [vmem:[#allocation14] ss:$0 sm:$0xff] }
0x1d06   :  { %v6171_v39 = vpop.f32.mrf.mxu0 }
0x1d07   :  { %v6181_v26 = vmul.f32 %v6177_v59, %v6177_v59  ;;  %v6172_v41 = vadd.f32 %v6755_v20, %v6171_v39  ;;  %v6435_v20 = vld [vmem:[%s8981_s6 + $0x8] sm:$0x3]  ;;  %s6543_s6 = sshll.u32 %s7908_s14, 4  ;;  %s6544_s6 = int_to_ptr.vmem [resolvable:$true] %s6543_s6 }
0x1d08   :  { %s7788_s2 = scalar_lea.vmem %s6544_s6, 256  ;;  %p7793_p13 = scmp.lt.s32.totalorder %s6544_s6, %s6544_s6 }
0x1d09   :  { %v6183_v42 = vmul.f32 %v6181_v26, %v6177_v59  ;;  %v6180_v29 = vmul.f32 %v6172_v41, %v6172_v41  ;;  %p7789_p12 = scmp.ne.s32.totalorder %s6544_s6, %s7788_s2  ;;  %p7794_p0 = scmp.lt.s32.totalorder %s7788_s2, %s7788_s2 }
0x1d0b   :  { %v6185_v33 = vmul.f32 0.044715, %v6183_v42  ;;  %v6182_v36 = vmul.f32 %v6180_v29, %v6172_v41  ;;  %p7795_p1 = por %p7794_p0, %p7793_p13 }
0x1d0d   :  { %v6187_v45 = vadd.f32 %v6185_v33, %v6177_v59  ;;  %v6184_v56 = vmul.f32 0.044715, %v6182_v36  ;;  %p7796_p2 = pnand %p7795_p1, %p7789_p12 }
0x1d0f   :  { %v6189_v47 = vmul.f32 0.7978846, %v6187_v45  ;;  %v6186_v37 = vadd.f32 %v6184_v56, %v6172_v41 }
0x1d11   :  { %7612 = vtanh.f32 %v6189_v47  ;;  %v6188_v48 = vmul.f32 0.7978846, %v6186_v37 }
0x1d13   :  { %7614 = vtanh.f32 %v6188_v48 }
0x1d1e   :  { %v7613_v35 = vpop.eup %7612 }
0x1d1f   :  { %v6193_v51 = vadd.f32 1.0, %v7613_v35 }
0x1d20   :  { %v7615_v54 = vpop.eup %7614 }
0x1d21   :  { %v6192_v55 = vadd.f32 1.0, %v7615_v54  ;;  %v6195_v57 = vmul.f32 0.5, %v6193_v51 }
0x1d23   :  { %v6194_v58 = vmul.f32 0.5, %v6192_v55  ;;  %v6197_v46 = vmul.f32 %v6195_v57, %v6177_v59 }
0x1d25   :  { %v6196_v60 = vmul.f32 %v6194_v58, %v6172_v41 }
0x1d27   :  { %7390 = vmatprep.mubr.msk.f32.mxu1 %vm2202_vm5, %v6196_v60 }
0x1d28   :  { %7391 = vmatmul.mubr.msk.f32.vlgmr.msra.gmra.mxu1 %vm2202_vm5, %v6197_v46 }
0x1de8   :  { %v7392_v52 = vpop.f32.mrf.mxu1 }
0x1de9   :  { %v6291_v11 = vadd.f32 %v7392_v52, %v6758_v50 }
0x1dea   :  { %v6285_v16 = vpop.f32.mrf.mxu1 }
0x1deb   :  { %v6295_v49 = vadd.f32 %v6291_v11, %v6087_v23  ;;  %v6286_v61 = vadd.f32 %v6758_v50, %v6285_v16  ;;  %v6761_v23 = vld [vmem:[%s9006_s12] ss:$0 sm:$0xff] }
0x1ded   :  { %v6294_v62 = vadd.f32 %v6286_v61, %v6086_v9  ;;  %v6299_v0 = vsel %vm302_vm0, %v6295_v49, 0.0 }
0x1dee   :  { %6300 = vadd.xlane.f32.xlu1 %v6299_v0 }
0x1def   :  { %v6296_v1 = vsel %vm302_vm0, %v6294_v62, 0.0 }
0x1df0   :  { %6297 = vadd.xlane.f32.xlu0 %v6296_v1 }
0x1e77   :  { %v6301_v63 = vpop.xlane.xlu1 %6300 }
0x1e78   :  { %v6303_v2 = vmul.f32 0.03125, %v6301_v63 }
0x1e79   :  { %v6298_v53 = vpop.xlane.xlu0 %6297 }
0x1e7a   :  { %v6305_v3 = vsub.f32 %v6295_v49, %v6303_v2  ;;  %v6302_v4 = vmul.f32 0.03125, %v6298_v53 }
0x1e7c   :  { %v6304_v10 = vsub.f32 %v6294_v62, %v6302_v4  ;;  %v6307_v12 = vmul.f32 %v6305_v3, %v6305_v3 }
0x1e7e   :  { %v6311_v13 = vsel %vm302_vm0, %v6307_v12, 0.0  ;;  %v6306_v14 = vmul.f32 %v6304_v10, %v6304_v10 }
0x1e7f   :  { %6312 = vadd.xlane.f32.xlu1 %v6311_v13 }
0x1e80   :  { %v6308_v31 = vsel %vm302_vm0, %v6306_v14, 0.0 }
0x1e81   :  { %6309 = vadd.xlane.f32.xlu0 %v6308_v31 }
0x1f08   :  { %v6313_v5 = vpop.xlane.xlu1 %6312 }
0x1f09   :  { %v6315_v18 = vmul.f32 0.03125, %v6313_v5 }
0x1f0a   :  { %v6310_v6 = vpop.xlane.xlu0 %6309 }
0x1f0b   :  { %v6317_v19 = vadd.f32 1e-05, %v6315_v18  ;;  %v6314_v22 = vmul.f32 0.03125, %v6310_v6 }
0x1f0d   :  { %7616 = vrsqrt.f32 %v6317_v19  ;;  %v6316_v40 = vadd.f32 1e-05, %v6314_v22 }
0x1f0f   :  { %7618 = vrsqrt.f32 %v6316_v40 }
0x1f1a   :  { %v7617_v9 = vpop.eup %7616 }
0x1f1b   :  { %v6321_v44 = vmul.f32 %v7617_v9, %v6305_v3 }
0x1f1c   :  { %v7619_v38 = vpop.eup %7618 }
0x1f1d   :  { %v6320_v24 = vmul.f32 %v7619_v38, %v6304_v10  ;;  %v6330_v25 = vmul.f32 %v6761_v23, %v6321_v44 }
0x1f1f   :  { %v6329_v27 = vmul.f32 %v6761_v23, %v6320_v24  ;;  %v6339_v30 = vadd.f32 %v6762_v28, %v6330_v25 }
0x1f21   :  { %v6338_v8 = vadd.f32 %v6762_v28, %v6329_v27 }
0x1f23   :  { %7401 = vmatprep.mubr.msk.f32.mxu0 %vm302_vm0, %v6338_v8 }
0x1f24   :  { %7402 = vmatmul.mubr.msk.f32.vlgmr.msra.gmra.mxu0 %vm302_vm0, %v6339_v30 }
0x1f25   :  { %7405 = vmatpush3.xpose.msk.msra.mxu0 %vm302_vm0, %v6436_v7  ;;  %7406 = vmatprep.mubr.msk.f32.mxu0 %vm302_vm0, %v6434_v21 }
0x1f28   :  { %7407 = vmatmul.mubr.msk.f32.vlgmr.msra.gmra.mxu0 %vm302_vm0, %v6435_v20 }
0x1fe4   :  { %v7403_v59 = vpop.f32.mrf.mxu0 }
0x1fe5   :  { %v6429_v39 = vadd.f32 %v7403_v59, %v6763_v34 }
0x1fe6   :  { %v6423_v26 = vpop.f32.mrf.mxu0 }
0x1fe7   :  { %6433 = vst [vmem:[#allocation16 + $0x8] sm:$0xff] %v6429_v39  ;;  %v6424_v41 = vadd.f32 %v6763_v34, %v6423_v26 }
0x1fe8   :  { %v7408_v42 = vpop.f32.mrf.mxu0 }
0x1fe9   :  { %6432 = vst [vmem:[#allocation16] sm:$0xff] %v6424_v41  ;;  %v6522_v29 = vmul.f32 %v7408_v42, %v7408_v42 }
0x1fea   :  { %v6512_v33 = vpop.f32.mrf.mxu0 }
0x1feb   :  { %v6521_v36 = vmul.f32 %v6512_v33, %v6512_v33  ;;  %v6524_v45 = vsel %vm2502_vm8, %v6522_v29, 0.0 }
0x1fed   :  { %v6523_v56 = vsel %vm2514_vm12, %v6521_v36, 0.0 }
0x1fee   :  { %v6525_v47 = vadd.f32 %v6524_v45, %v6523_v56 }
0x1ff0   :  { %6526 = vadd.xlane.f32.xlu0 %v6525_v47 }
0x1ff1   :  { %7799 = shalt.err (!%p7796_p2)
}
0x1ff2   :  { %s7909_s7 = smov 128   ;;  %s7910_s10 = smov [#allocation17]   ;;  %vm6536_vm14 = vcmask 0  }
0x1ff3   :  { %6549 = dma.vmem_to_hbm [thread:$0]  %s6544_s6, 256, %s8154_s21, [#allocation4], %s7909_s7, %s7909_s7, %s7904_s8  }
0x1ff4   :  { %s6556_s11 = sshll.u32 %s7910_s10, 4  ;;  %s6557_s11 = int_to_ptr.vmem [resolvable:$true] %s6556_s11 }
0x1ff5   :  { %s7808_s9 = scalar_lea.vmem %s6557_s11, 16  ;;  %s7812_s15 = scalar_lea.vmem %s6557_s11, 32 }
0x1ff6   :  { %p7809_p3 = scmp.ne.s32.totalorder %s6557_s11, %s7808_s9  ;;  %p7813_p4 = scmp.lt.s32.totalorder %s6557_s11, %s6557_s11 }
0x1ff7   :  { %p7814_p5 = scmp.lt.s32.totalorder %s7812_s15, %s7808_s9 }
0x1ff9   :  { %p7815_p6 = por %p7814_p5, %p7813_p4 }
0x1ffb   :  { %p7816_p7 = pnand %p7815_p6, %p7809_p3 }
0x2079   :  { %v6527_v37 = vpop.xlane.xlu0 %6526 }
0x207a   :  { %v6528_v48 = vrot.slane %v6527_v37, 4 }
0x207c   :  { %v6529_v35 = vadd.f32 %v6528_v48, %v6527_v37 }
0x207e   :  { %v6530_v51 = vrot.slane %v6529_v35, 2 }
0x2080   :  { %v6531_v54 = vadd.f32 %v6530_v51, %v6529_v35 }
0x2082   :  { %v6532_v55 = vrot.slane %v6531_v54, 1 }
0x2084   :  { %v6533_v57 = vadd.f32 %v6532_v55, %v6531_v54 }
0x2086   :  { %7409 = vpush %v6533_v57 }
0x20b7   :  { %s7410_s0 = spop %7409 }
0x20b8   :  { %v6535_v58 = vstv %s7410_s0 }
0x20b9   :  { %6537 = vst.msk [vmem:[#allocation17] sm:$0x1] %vm6536_vm14, %v6535_v58 }
0x20ba   :  { %7819 = shalt.err (!%p7816_p7)
}
0x20bb   :  { %6559 = dma.vmem_to_hbm [thread:$0]  %s6557_s11, 16, %s8159_s20, [#allocation18]  }
0x20bc   :  { %7838 = dma.done.wait [#allocation4], 256  }
0x20bd   :  { %7839 = vsyncadd [#allocation4], 4294967040 }
0x20be   :  { %7840 = dma.done.wait [#allocation18], 16  }
0x20bf   :  { %7841 = vsyncadd [#allocation18], 4294967280 }
0x20c0   :  { %6566 = vsyncpa [#allocation3], 1 }
0x20c1   :  { %6567 = vsyncpa [#allocation6], 1 }
0x20c2   :  { %6568 = vsyncpa [#allocation9], 1 }
0x20c3   :  { %6569 = vsyncpa [#allocation12], 1 }
0x20c4   :  { %6570 = vsyncpa [#allocation15], 1 }
0x20c5   :  { %6571 = vsyncpa [#allocation4], 1 }
0x20c6   :  { %6572 = vsyncpa [#allocation18], 1 }

</bundles_post_ra>
